<compile_context>
chip_gen: v7x
topology: tpu7x:2x2x1
jax: 0.10.0
libtpu: 0.0.40
codegen_flags: <defaults>
</compile_context>

<pallas_src>
import functools

import jax
import jax.numpy as jnp
from jax import lax
from jax.experimental import pallas as pl
from jax.experimental.pallas import tpu as pltpu


def _attention_kernel(x_ref, wqkv_ref, wout_ref, bo_ref, out_ref, qkv_scr, *,
                      heads, dim_head, n_valid, tq):
    """One (batch, query-tile) step of fused 1x1-conv attention (NCHW-native).

    x_ref   : (1, C, N_pad)   full-sequence input block (channels x tokens)
    wqkv_ref: (C, 3*h*D)      fused QKV weight (q-scale folded in), resident
    wout_ref: (C, h*D)        output 1x1-conv weight, resident
    bo_ref  : (C, 1)          output 1x1-conv bias, resident
    out_ref : (1, C, TQ)      lane-dense output block
    qkv_scr : (3*h*D, N_pad)  persistent VMEM scratch: QKV for the whole batch
    """
    qi = pl.program_id(1)
    D = dim_head
    hd = heads * D
    n_pad = x_ref.shape[2]

    # --- fused QKV projection for the WHOLE sequence, once per batch --------
    @pl.when(qi == 0)
    def _():
        x = x_ref[0]                                               # (C, N_pad)
        qkv_scr[...] = lax.dot_general(
            wqkv_ref[...], x, (((0,), (0,)), ((), ())),
            preferred_element_type=jnp.float32)                    # (3hD, N_pad)

    q_start = pl.multiple_of(qi * tq, tq)

    o_heads = []
    for h in range(heads):                                         # static loop
        q_h = qkv_scr[pl.ds(h * D, D), pl.ds(q_start, tq)]         # (D, TQ)
        k_h = qkv_scr[pl.ds(hd + h * D, D), :]                     # (D, N_pad)
        v_h = qkv_scr[pl.ds(2 * hd + h * D, D), :]                 # (D, N_pad)

        # sim[j, i] = sum_d k[d, j] * q[d, i]  (keys on sublanes, queries on lanes)
        sim = lax.dot_general(k_h, q_h, (((0,), (0,)), ((), ())),
                              preferred_element_type=jnp.float32)  # (N_pad, TQ)
        if n_pad != n_valid:                                       # static check
            key_idx = lax.broadcasted_iota(jnp.int32, sim.shape, 0)
            sim = jnp.where(key_idx < n_valid, sim, -1e30)

        # stable softmax over the key axis, normalization deferred
        m = jnp.max(sim, axis=0, keepdims=True)                    # (1, TQ)
        e = jnp.exp(sim - m)                                       # (N_pad, TQ)
        l = jnp.sum(e, axis=0, keepdims=True)                      # (1, TQ)

        o_h = jnp.dot(v_h, e, preferred_element_type=jnp.float32)  # (D, TQ)
        o_heads.append(o_h * pl.reciprocal(l, approx=True))

    o_all = jnp.concatenate(o_heads, axis=0)                       # (hD, TQ)

    # --- single wide output projection + bias (lane-dense store) ------------
    y = jnp.dot(wout_ref[...], o_all,
                preferred_element_type=jnp.float32)                # (C, TQ)
    out_ref[0] = y + bo_ref[...]


def attention_forward(x_nchw, w_qkv, w_out, b_out, *, heads=4, dim_head=32,
                      tq=256):
    """Forward pass of `Attention`.  x_nchw: (B, C, H, W) float32 (NCHW)."""
    B, C, H, W = x_nchw.shape
    N = H * W
    D = dim_head
    hd = heads * D
    scale = D ** (-0.5)

    # Pad the token axis to a lane multiple; padded keys are masked in-kernel.
    n_pad = ((N + 127) // 128) * 128
    # Query-tile size: a multiple of 128 that divides n_pad.
    tq = max(128, min(int(tq), n_pad))
    tq = (tq // 128) * 128
    if n_pad % tq != 0:
        tq = 128
    n_q = n_pad // tq

    # --- wrapper glue (no activation transposes: kernel is NCHW-native) -----
    x_bcn = x_nchw.reshape(B, C, N).astype(jnp.float32)
    if n_pad != N:
        x_bcn = jnp.pad(x_bcn, ((0, 0), (0, 0), (0, n_pad - N)))

    w_qkv = jnp.reshape(w_qkv, (3 * hd, C)).astype(jnp.float32)
    w_qkv = w_qkv.at[:hd].multiply(scale)          # fold q-scale into Wq
    wqkv_t = w_qkv.T                               # (C, 3hD), lane-dense
    wout = jnp.reshape(w_out, (C, hd)).astype(jnp.float32)   # (C, hD)
    bo = jnp.reshape(b_out, (C, 1)).astype(jnp.float32)

    kernel = functools.partial(_attention_kernel, heads=heads, dim_head=D,
                               n_valid=N, tq=tq)

    out_bcn = pl.pallas_call(
        kernel,
        out_shape=jax.ShapeDtypeStruct((B, C, n_pad), jnp.float32),
        grid=(B, n_q),
        in_specs=[
            pl.BlockSpec((1, C, n_pad), lambda b, qi: (b, 0, 0)),  # x (full seq)
            pl.BlockSpec((C, 3 * hd), lambda b, qi: (0, 0)),       # Wqkv^T resident
            pl.BlockSpec((C, hd), lambda b, qi: (0, 0)),           # Wout resident
            pl.BlockSpec((C, 1), lambda b, qi: (0, 0)),            # bias resident
        ],
        out_specs=pl.BlockSpec((1, C, tq), lambda b, qi: (b, 0, qi)),
        scratch_shapes=[pltpu.VMEM((3 * hd, n_pad), jnp.float32)],
        compiler_params=pltpu.CompilerParams(
            dimension_semantics=("parallel", "arbitrary"),
            vmem_limit_bytes=32 * 1024 * 1024),
    )(x_bcn, wqkv_t, wout, bo)

    # drop key/query padding; (B, C, N) is already NCHW-ordered -> just reshape
    return out_bcn[:, :, :N].reshape(B, C, H, W)


def attention_ref(x, w_qkv, w_out, b_out, heads, dim_head):
    """Pure-JAX reference mirroring the PyTorch forward exactly."""
    B, C, H, W = x.shape
    N = H * W
    hidden = heads * dim_head
    scale = dim_head ** (-0.5)
    hp = jax.lax.Precision.HIGHEST

    xf = x.reshape(B, C, N)
    qkv = jnp.einsum('oc,bcn->bon', w_qkv.reshape(3 * hidden, C), xf,
                     precision=hp)
    q, k, v = jnp.split(qkv, 3, axis=1)
    q = q.reshape(B, heads, dim_head, N) * scale
    k = k.reshape(B, heads, dim_head, N)
    v = v.reshape(B, heads, dim_head, N)
    sim = jnp.einsum('bhdi,bhdj->bhij', q, k, precision=hp)
    attn = jax.nn.softmax(sim, axis=-1)
    out = jnp.einsum('bhij,bhdj->bhid', attn, v, precision=hp)       # (B,h,N,d)
    out = jnp.transpose(out, (0, 1, 3, 2)).reshape(B, hidden, N)     # b (h d) n
    y = jnp.einsum('oc,bcn->bon', w_out.reshape(C, hidden), out,
                   precision=hp) + b_out.reshape(1, C, 1)
    return y.reshape(B, C, H, W)


if __name__ == "__main__":
    # Shapes consistent with the module defaults: Attention(dim=4, heads=4, dim_head=32)
    B, C, H, W = 2, 4, 16, 16
    heads, dim_head = 4, 32
    hidden = heads * dim_head

    key = jax.random.PRNGKey(0)
    kx, kq, ko, kb = jax.random.split(key, 4)

    x = jax.random.normal(kx, (B, C, H, W), jnp.float32)
    w_qkv = 0.1 * jax.random.normal(kq, (3 * hidden, C), jnp.float32)  # to_qkv (no bias)
    w_out = 0.1 * jax.random.normal(ko, (C, hidden), jnp.float32)      # to_out weight
    b_out = 0.1 * jax.random.normal(kb, (C,), jnp.float32)             # to_out bias

    y = attention_forward(x, w_qkv, w_out, b_out, heads=heads, dim_head=dim_head)
    y = jax.block_until_ready(y)

    y_ref = attention_ref(x, w_qkv, w_out, b_out, heads, dim_head)
    assert y.shape == (B, C, H, W)
    max_err = float(jnp.max(jnp.abs(y - y_ref)))
    assert jnp.allclose(y, y_ref, rtol=2e-3, atol=2e-3), max_err

    print("KERNEL_OK")
</pallas_src>

<mosaic_0001>
module attributes {stable_mosaic.version = 11 : i64} {
  func.func @_attention_kernel(%arg0: i32, %arg1: i32, %arg2: memref<1x4x256xf32, #tpu.memory_space<vmem>>, %arg3: memref<4x384xf32, #tpu.memory_space<vmem>>, %arg4: memref<4x128xf32, #tpu.memory_space<vmem>>, %arg5: memref<4x1xf32, #tpu.memory_space<vmem>>, %arg6: memref<1x4x256xf32, #tpu.memory_space<vmem>>, %arg7: memref<384x256xf32, #tpu.memory_space<vmem>>) attributes {dimension_semantics = [#tpu.dimension_semantics<parallel>, #tpu.dimension_semantics<arbitrary>], iteration_bounds = array<i64: 2, 1>, scalar_prefetch = 0 : i64, scratch_operands = 1 : i64, tpu.core_type = #tpu.core_type<tc>, window_params = [{transform_indices = @transform_0, window_bounds = array<i64: 1, 4, 256>}, {pipeline_mode = #tpu.pipeline_mode<synchronous>, transform_indices = @transform_1, window_bounds = array<i64: 4, 384>}, {pipeline_mode = #tpu.pipeline_mode<synchronous>, transform_indices = @transform_2, window_bounds = array<i64: 4, 128>}, {pipeline_mode = #tpu.pipeline_mode<synchronous>, transform_indices = @transform_3, window_bounds = array<i64: 4, 1>}, {transform_indices = @transform_4, window_bounds = array<i64: 1, 4, 256>}]} {
    %c0_i32 = arith.constant 0 : i32
    %0 = arith.cmpi eq, %arg1, %c0_i32 : i32
    %1 = arith.extui %0 : i1 to i32
    %c0_i32_0 = arith.constant 0 : i32
    %2 = arith.cmpi ne, %1, %c0_i32_0 : i32
    scf.if %2 {
      %c0_32 = arith.constant 0 : index
      %c0_33 = arith.constant 0 : index
      %c0_34 = arith.constant 0 : index
      %78 = vector.load %arg2[%c0_32, %c0_33, %c0_34] : memref<1x4x256xf32, #tpu.memory_space<vmem>>, vector<1x4x256xf32>
      %79 = vector.shape_cast %78 : vector<1x4x256xf32> to vector<4x256xf32>
      %c0_35 = arith.constant 0 : index
      %c0_36 = arith.constant 0 : index
      %80 = vector.load %arg3[%c0_35, %c0_36] : memref<4x384xf32, #tpu.memory_space<vmem>>, vector<4x384xf32>
      %cst_37 = arith.constant dense<0.000000e+00> : vector<384x256xf32>
      %81 = tpu.matmul %80, %79, %cst_37 {dimension_numbers = #tpu.dot_dimension_numbers<[0], [0], [1], [1], [0, 1, 1, 1], [], []>} : vector<4x384xf32>, vector<4x256xf32>, vector<384x256xf32> -> vector<384x256xf32>
      %c0_38 = arith.constant 0 : index
      %c0_39 = arith.constant 0 : index
      %82 = vector.load %arg7[%c0_38, %c0_39] : memref<384x256xf32, #tpu.memory_space<vmem>>, vector<384x256xf32>
      tpu.vector_store %arg7[%c0_38, %c0_39], %81 {strides = array<i32>} : memref<384x256xf32, #tpu.memory_space<vmem>>, vector<384x256xf32>,
    } else {
    }
    %c256_i32 = arith.constant 256 : i32
    %3 = arith.muli %arg1, %c256_i32 : i32
    %4 = tpu.assume_multiple %3, 256 : i32
    %c0 = arith.constant 0 : index
    %5 = arith.index_cast %4 : i32 to index
    %6 = vector.load %arg7[%c0, %5] : memref<384x256xf32, #tpu.memory_space<vmem>>, vector<32x256xf32>
    %c128 = arith.constant 128 : index
    %c0_1 = arith.constant 0 : index
    %7 = vector.load %arg7[%c128, %c0_1] : memref<384x256xf32, #tpu.memory_space<vmem>>, vector<32x256xf32>
    %c256 = arith.constant 256 : index
    %c0_2 = arith.constant 0 : index
    %8 = vector.load %arg7[%c256, %c0_2] : memref<384x256xf32, #tpu.memory_space<vmem>>, vector<32x256xf32>
    %cst = arith.constant dense<0.000000e+00> : vector<256x256xf32>
    %9 = tpu.matmul %7, %6, %cst {dimension_numbers = #tpu.dot_dimension_numbers<[0], [0], [1], [1], [0, 1, 1, 1], [], []>} : vector<32x256xf32>, vector<32x256xf32>, vector<256x256xf32> -> vector<256x256xf32>
    %cst_3 = arith.constant dense<0xFF800000> : vector<256xf32>
    %10 = vector.multi_reduction <maximumf>, %9, %cst_3 [0] : vector<256x256xf32> to vector<256xf32>
    %11 = vector.shape_cast %10 : vector<256xf32> to vector<1x256xf32>
    %12 = vector.broadcast %11 : vector<1x256xf32> to vector<256x256xf32>
    %13 = arith.subf %9, %12 : vector<256x256xf32>
    %14 = math.exp %13 : vector<256x256xf32>
    %cst_4 = arith.constant dense<0.000000e+00> : vector<256xf32>
    %15 = vector.multi_reduction <add>, %14, %cst_4 [0] : vector<256x256xf32> to vector<256xf32>
    %16 = vector.shape_cast %15 : vector<256xf32> to vector<1x256xf32>
    %cst_5 = arith.constant dense<0.000000e+00> : vector<32x256xf32>
    %17 = tpu.matmul %8, %14, %cst_5 {dimension_numbers = #tpu.dot_dimension_numbers<[1], [0], [0], [1], [0, 0, 1, 1], [], []>} : vector<32x256xf32>, vector<256x256xf32>, vector<32x256xf32> -> vector<32x256xf32>
    %18 = tpu.reciprocal %16 {approx = true} : vector<1x256xf32> -> vector<1x256xf32>
    %19 = vector.broadcast %18 : vector<1x256xf32> to vector<32x256xf32>
    %20 = arith.mulf %17, %19 : vector<32x256xf32>
    %c32 = arith.constant 32 : index
    %21 = arith.index_cast %4 : i32 to index
    %22 = vector.load %arg7[%c32, %21] : memref<384x256xf32, #tpu.memory_space<vmem>>, vector<32x256xf32>
    %c160 = arith.constant 160 : index
    %c0_6 = arith.constant 0 : index
    %23 = vector.load %arg7[%c160, %c0_6] : memref<384x256xf32, #tpu.memory_space<vmem>>, vector<32x256xf32>
    %c288 = arith.constant 288 : index
    %c0_7 = arith.constant 0 : index
    %24 = vector.load %arg7[%c288, %c0_7] : memref<384x256xf32, #tpu.memory_space<vmem>>, vector<32x256xf32>
    %cst_8 = arith.constant dense<0.000000e+00> : vector<256x256xf32>
    %25 = tpu.matmul %23, %22, %cst_8 {dimension_numbers = #tpu.dot_dimension_numbers<[0], [0], [1], [1], [0, 1, 1, 1], [], []>} : vector<32x256xf32>, vector<32x256xf32>, vector<256x256xf32> -> vector<256x256xf32>
    %cst_9 = arith.constant dense<0xFF800000> : vector<256xf32>
    %26 = vector.multi_reduction <maximumf>, %25, %cst_9 [0] : vector<256x256xf32> to vector<256xf32>
    %27 = vector.shape_cast %26 : vector<256xf32> to vector<1x256xf32>
    %28 = vector.broadcast %27 : vector<1x256xf32> to vector<256x256xf32>
    %29 = arith.subf %25, %28 : vector<256x256xf32>
    %30 = math.exp %29 : vector<256x256xf32>
    %cst_10 = arith.constant dense<0.000000e+00> : vector<256xf32>
    %31 = vector.multi_reduction <add>, %30, %cst_10 [0] : vector<256x256xf32> to vector<256xf32>
    %32 = vector.shape_cast %31 : vector<256xf32> to vector<1x256xf32>
    %cst_11 = arith.constant dense<0.000000e+00> : vector<32x256xf32>
    %33 = tpu.matmul %24, %30, %cst_11 {dimension_numbers = #tpu.dot_dimension_numbers<[1], [0], [0], [1], [0, 0, 1, 1], [], []>} : vector<32x256xf32>, vector<256x256xf32>, vector<32x256xf32> -> vector<32x256xf32>
    %34 = tpu.reciprocal %32 {approx = true} : vector<1x256xf32> -> vector<1x256xf32>
    %35 = vector.broadcast %34 : vector<1x256xf32> to vector<32x256xf32>
    %36 = arith.mulf %33, %35 : vector<32x256xf32>
    %c64 = arith.constant 64 : index
    %37 = arith.index_cast %4 : i32 to index
    %38 = vector.load %arg7[%c64, %37] : memref<384x256xf32, #tpu.memory_space<vmem>>, vector<32x256xf32>
    %c192 = arith.constant 192 : index
    %c0_12 = arith.constant 0 : index
    %39 = vector.load %arg7[%c192, %c0_12] : memref<384x256xf32, #tpu.memory_space<vmem>>, vector<32x256xf32>
    %c320 = arith.constant 320 : index
    %c0_13 = arith.constant 0 : index
    %40 = vector.load %arg7[%c320, %c0_13] : memref<384x256xf32, #tpu.memory_space<vmem>>, vector<32x256xf32>
    %cst_14 = arith.constant dense<0.000000e+00> : vector<256x256xf32>
    %41 = tpu.matmul %39, %38, %cst_14 {dimension_numbers = #tpu.dot_dimension_numbers<[0], [0], [1], [1], [0, 1, 1, 1], [], []>} : vector<32x256xf32>, vector<32x256xf32>, vector<256x256xf32> -> vector<256x256xf32>
    %cst_15 = arith.constant dense<0xFF800000> : vector<256xf32>
    %42 = vector.multi_reduction <maximumf>, %41, %cst_15 [0] : vector<256x256xf32> to vector<256xf32>
    %43 = vector.shape_cast %42 : vector<256xf32> to vector<1x256xf32>
    %44 = vector.broadcast %43 : vector<1x256xf32> to vector<256x256xf32>
    %45 = arith.subf %41, %44 : vector<256x256xf32>
    %46 = math.exp %45 : vector<256x256xf32>
    %cst_16 = arith.constant dense<0.000000e+00> : vector<256xf32>
    %47 = vector.multi_reduction <add>, %46, %cst_16 [0] : vector<256x256xf32> to vector<256xf32>
    %48 = vector.shape_cast %47 : vector<256xf32> to vector<1x256xf32>
    %cst_17 = arith.constant dense<0.000000e+00> : vector<32x256xf32>
    %49 = tpu.matmul %40, %46, %cst_17 {dimension_numbers = #tpu.dot_dimension_numbers<[1], [0], [0], [1], [0, 0, 1, 1], [], []>} : vector<32x256xf32>, vector<256x256xf32>, vector<32x256xf32> -> vector<32x256xf32>
    %50 = tpu.reciprocal %48 {approx = true} : vector<1x256xf32> -> vector<1x256xf32>
    %51 = vector.broadcast %50 : vector<1x256xf32> to vector<32x256xf32>
    %52 = arith.mulf %49, %51 : vector<32x256xf32>
    %c96 = arith.constant 96 : index
    %53 = arith.index_cast %4 : i32 to index
    %54 = vector.load %arg7[%c96, %53] : memref<384x256xf32, #tpu.memory_space<vmem>>, vector<32x256xf32>
    %c224 = arith.constant 224 : index
    %c0_18 = arith.constant 0 : index
    %55 = vector.load %arg7[%c224, %c0_18] : memref<384x256xf32, #tpu.memory_space<vmem>>, vector<32x256xf32>
    %c352 = arith.constant 352 : index
    %c0_19 = arith.constant 0 : index
    %56 = vector.load %arg7[%c352, %c0_19] : memref<384x256xf32, #tpu.memory_space<vmem>>, vector<32x256xf32>
    %cst_20 = arith.constant dense<0.000000e+00> : vector<256x256xf32>
    %57 = tpu.matmul %55, %54, %cst_20 {dimension_numbers = #tpu.dot_dimension_numbers<[0], [0], [1], [1], [0, 1, 1, 1], [], []>} : vector<32x256xf32>, vector<32x256xf32>, vector<256x256xf32> -> vector<256x256xf32>
    %cst_21 = arith.constant dense<0xFF800000> : vector<256xf32>
    %58 = vector.multi_reduction <maximumf>, %57, %cst_21 [0] : vector<256x256xf32> to vector<256xf32>
    %59 = vector.shape_cast %58 : vector<256xf32> to vector<1x256xf32>
    %60 = vector.broadcast %59 : vector<1x256xf32> to vector<256x256xf32>
    %61 = arith.subf %57, %60 : vector<256x256xf32>
    %62 = math.exp %61 : vector<256x256xf32>
    %cst_22 = arith.constant dense<0.000000e+00> : vector<256xf32>
    %63 = vector.multi_reduction <add>, %62, %cst_22 [0] : vector<256x256xf32> to vector<256xf32>
    %64 = vector.shape_cast %63 : vector<256xf32> to vector<1x256xf32>
    %cst_23 = arith.constant dense<0.000000e+00> : vector<32x256xf32>
    %65 = tpu.matmul %56, %62, %cst_23 {dimension_numbers = #tpu.dot_dimension_numbers<[1], [0], [0], [1], [0, 0, 1, 1], [], []>} : vector<32x256xf32>, vector<256x256xf32>, vector<32x256xf32> -> vector<32x256xf32>
    %66 = tpu.reciprocal %64 {approx = true} : vector<1x256xf32> -> vector<1x256xf32>
    %67 = vector.broadcast %66 : vector<1x256xf32> to vector<32x256xf32>
    %68 = arith.mulf %65, %67 : vector<32x256xf32>
    %69 = tpu.concatenate %20, %36, %52, %68 in 0 : vector<32x256xf32>, vector<32x256xf32>, vector<32x256xf32>, vector<32x256xf32> -> vector<128x256xf32>
    %c0_24 = arith.constant 0 : index
    %c0_25 = arith.constant 0 : index
    %70 = vector.load %arg4[%c0_24, %c0_25] : memref<4x128xf32, #tpu.memory_space<vmem>>, vector<4x128xf32>
    %cst_26 = arith.constant dense<0.000000e+00> : vector<4x256xf32>
    %71 = tpu.matmul %70, %69, %cst_26 {dimension_numbers = #tpu.dot_dimension_numbers<[1], [0], [0], [1], [0, 0, 1, 1], [], []>} : vector<4x128xf32>, vector<128x256xf32>, vector<4x256xf32> -> vector<4x256xf32>
    %c0_27 = arith.constant 0 : index
    %c0_28 = arith.constant 0 : index
    %72 = vector.load %arg5[%c0_27, %c0_28] : memref<4x1xf32, #tpu.memory_space<vmem>>, vector<4x1xf32>
    %73 = vector.broadcast %72 : vector<4x1xf32> to vector<4x256xf32>
    %74 = arith.addf %71, %73 : vector<4x256xf32>
    %c0_29 = arith.constant 0 : index
    %c0_30 = arith.constant 0 : index
    %c0_31 = arith.constant 0 : index
    %75 = vector.load %arg6[%c0_29, %c0_30, %c0_31] : memref<1x4x256xf32, #tpu.memory_space<vmem>>, vector<1x4x256xf32>
    %76 = vector.shape_cast %75 : vector<1x4x256xf32> to vector<4x256xf32>
    %77 = vector.shape_cast %74 : vector<4x256xf32> to vector<1x4x256xf32>
    tpu.vector_store %arg6[%c0_29, %c0_30, %c0_31], %77 {strides = array<i32>} : memref<1x4x256xf32, #tpu.memory_space<vmem>>, vector<1x4x256xf32>,
    return
  }
  func.func @transform_0(%arg0: i32, %arg1: i32) -> (i32, i32, i32) {
    %c0_i32 = arith.constant 0 : i32
    %c0_i32_0 = arith.constant 0 : i32
    %c0_i32_1 = arith.constant 0 : i32
    return %arg0, %c0_i32, %c0_i32_0 : i32, i32, i32
  }
  func.func @transform_1(%arg0: i32, %arg1: i32) -> (i32, i32) {
    %c0_i32 = arith.constant 0 : i32
    %c0_i32_0 = arith.constant 0 : i32
    %c0_i32_1 = arith.constant 0 : i32
    return %c0_i32, %c0_i32_0 : i32, i32
  }
  func.func @transform_2(%arg0: i32, %arg1: i32) -> (i32, i32) {
    %c0_i32 = arith.constant 0 : i32
    %c0_i32_0 = arith.constant 0 : i32
    %c0_i32_1 = arith.constant 0 : i32
    return %c0_i32, %c0_i32_0 : i32, i32
  }
  func.func @transform_3(%arg0: i32, %arg1: i32) -> (i32, i32) {
    %c0_i32 = arith.constant 0 : i32
    %c0_i32_0 = arith.constant 0 : i32
    %c0_i32_1 = arith.constant 0 : i32
    return %c0_i32, %c0_i32_0 : i32, i32
  }
  func.func @transform_4(%arg0: i32, %arg1: i32) -> (i32, i32, i32) {
    %c0_i32 = arith.constant 0 : i32
    %c0_i32_0 = arith.constant 0 : i32
    return %arg0, %c0_i32, %arg1 : i32, i32, i32
  }
}

</mosaic_0001>

<bundles_post_ra>
// kernel: tpu_custom_call.1
= control target key start
LH: loop header
LB: loop body
LE: loop exit
PB: predicated region body
PF: predicated region fallthrough
CT: control target
= control target key end

     0   :  { %9 = vsyncpa [#allocation4], 0  ;;  %s9403_s0 = inlined_call_operand.hbm [shape: f32[2,4,256], index: 0, kind: input, shape index: {}]   ;;  %s9404_s1 = inlined_call_operand.hbm [shape: f32[4,384], index: 1, kind: input, shape index: {}]   ;;  %s9405_s2 = inlined_call_operand.vmem [shape: f32[4,128], index: 2, kind: input, shape index: {}]   ;;  %s9406_s3 = inlined_call_operand.vmem [shape: f32[4,1], index: 3, kind: input, shape index: {}]   ;;  %s9407_s4 = inlined_call_operand.hbm [shape: f32[2,4,256], index: 4, kind: output, shape index: {}]  }
   0x1   :  { %11 = vsyncpa [#allocation4 + $0x1], 0 }
   0x2   :  { %12 = vsyncpa [#allocation7], 0 }
   0x3   :  { %13 = vsyncpa [#allocation5], 0 }
   0x4   :  { %15 = vsyncpa [#allocation5 + $0x1], 0  ;;  %s5968_s15 = smov 0   ;;  %s5970_s16 = smov 0  }
   0x5   :  { %s5972_s17 = smov 0   ;;  %s5974_s18 = smov 0  }
   0x6   :  { %s5976_s19 = smov 0   ;;  %s5978_s20 = smov 0  }
   0x7 LB: > { %s4668_s21 = sadd.s32 4294967295, %s5936_s20   ;;  %s4669_s22 = sadd.s32 4294967294, %s5936_s20   ;;  %s5936_s20 = sphi %s5978_s20, %s21_s20   ;;  %s5932_s19 = sphi %s5976_s19, %s10236_s19   ;;  %s5928_s18 = sphi %s5974_s18, %s10235_s18   ;;  %s5924_s17 = sphi %s5972_s17, %s10234_s17   ;;  %s5920_s16 = sphi %s5970_s16, %s10233_s16   ;;  %s5916_s15 = sphi %s5968_s15, %s10232_s15  }
   0x8   : > { %p53_p0 = scmp.ne.s32.totalorder %s5920_s16, %s5916_s15  ;;  %p6002_p1 = scmp.eq.s32.totalorder %s4668_s21, 0 }
   0x9   : > { %p6006_p2 = scmp.eq.s32.totalorder %s4668_s21, 1  ;;  %p148_p3 = scmp.eq.s32.totalorder %s4669_s22, 1 }
   0xa   : > { %s9629_s23 = scalar_select %p6002_p1, 1, 0 }
   0xb   : > { %s9630_s24 = scalar_select %p6006_p2, 1, 0 }
   0xc   : > { %p6012_p4 = por %p6002_p1, %p53_p0  ;;  %p4670_p5 = scmp.ge.s32.totalorder %s5936_s20, 1 }
   0xd   : > { %p6017_p6 = por %p148_p3, %p53_p0  ;;  %p155_p7 = scmp.lt.s32.totalorder %s5936_s20, 3 }
   0xe   : > { %s9631_s25 = scalar_select %p6012_p4, 1, 0 }
   0xf   : > { %s9632_s26 = scalar_select %p6017_p6, 1, 0 }
  0x10   : > { %p6022_p8 = pnand %p4670_p5, %p155_p7  ;;  %s5938_s28 = smov [#allocation6]  }
  0x11   : > { %s168_s29 = sshll.u32 %s5938_s28, 4  ;;  %s33_s5 = sadd.s32 1, %s5932_s19  ;;  %s169_s29 = int_to_ptr.vmem [resolvable:$true] %s168_s29 }
  0x12   : > { %s9633_s27 = scalar_select %p6022_p8, 1, 0 }
  0x13   : > { %p5193_p10 = pneg %p6022_p8  ;;  %s40_s6 = sadd.s32 1, %s5924_s17 }
  0x14   : > { %p6037_p12 = scmp.ge.s32.totalorder %s33_s5, 2  ;;  %s5792_s10 = scalar_lea.hbm %s9404_s1, 192 }
  0x15   : > { %p6031_p11 = pnand %p5193_p10, %p6002_p1  ;;  %p5793_p13 = scmp.ne.s32.totalorder %s9404_s1, %s5792_s10 }
  0x16   : > { %s9635_s7 = scalar_select %p6037_p12, 1, 0 }
  0x17   : > { %p5794_p0 = pneg %p6031_p11  ;;  %p5799_p7 = scmp.lt.u32.totalorder %s5792_s10, %s9404_s1 }
  0x19   : > { %p5795_p3 = pnand %p5794_p0, %p5793_p13 }
  0x1b   : > { %p5796_p5 = pneg %p5795_p3 }
  0x1d   : > { %p5801_p10 = pnand %p5799_p7, %p5796_p5 }
  0x1f   : > { %5804 = shalt.err (!%p5801_p10)
}
  0x20   : > { %s5805_s21 = scalar_lea.vmem %s169_s29, 192  ;;  %p5813_p4 = scmp.lt.s32.totalorder %s169_s29, %s169_s29 }
  0x21   : > { %p5806_p9 = scmp.ne.s32.totalorder %s169_s29, %s5805_s21  ;;  %p5814_p8 = scmp.lt.s32.totalorder %s5805_s21, %s5805_s21 }
  0x23   : > { %p5808_p6 = pnand %p5806_p9, %p5794_p0  ;;  %p5815_p2 = por %p5814_p8, %p5813_p4 }
  0x25   : > { %p5809_p1 = pneg %p5808_p6 }
  0x27   : > { %p5816_p12 = pnand %p5815_p2, %p5809_p1 }
  0x29   : > { %5819 = shalt.err (!%p5816_p12)
}
  0x2a   : > { %5196 = dma.hbm_to_vmem [thread:$0]  (!%p6031_p11), %s9404_s1, 192, %s169_s29, [#allocation7]  }
  0x2b   : > { %p9636_p4 = scmp.ne.s32.totalorder %s9635_s7, 0  ;;  %p47_p1 = scmp.ne.s32.totalorder %s5924_s17, %s5920_s16 }
  0x2c   : > { %p48_p2 = scmp.eq.s32.totalorder %s5936_s20, 0  ;;  %p5206_p6 = scmp.lt.s32.totalorder %s5936_s20, 2 }
  0x2d   : > { %s10238_s5 = smov (%p9636_p4, %s33_s5), 0  ;;  %p9637_p12 = scmp.ne.s32.totalorder %s9630_s24, 0 }
  0x2e   : > { %s37_s30 = ssub.s32 %s5932_s19, %s10238_s5  ;;  %p49_p9 = por %p48_p2, %p47_p1 }
  0x2f   : > { %p38_p8 = scmp.eq.s32.totalorder %s37_s30, 0  ;;  %p6069_p13 = por %p9637_p12, %p47_p1 }
  0x30   : > { %s185_s9 = sand.u32 1, %s5924_s17   ;;  %s4863_s7 = sshll.u32 %s5932_s19, 7 }
  0x31   : > { %s6077_s10 = scalar_select %p38_p8, %s5924_s17, %s40_s6  }
  0x32   : > { %s4673_s29 = sshll.u32 %s185_s9, 3  ;;  %s6083_s13 = scalar_lea.hbm %s9403_s0, %s4863_s7 }
  0x33   : > { %s189_s24 = scalar_lea.vmem [#allocation3], %s4673_s29  ;;  %p6087_p11 = pnand %p5206_p6, %p49_p9 }
  0x34   : > { %s197_s14 = sshll.u32 %s189_s24, 4  ;;  %s186_s6 = scalar_lea.sflag [#allocation4], %s185_s9  ;;  %s6085_s14 = int_to_ptr.vmem [resolvable:$true] %s197_s14 }
  0x35   : > { %s5820_s22 = scalar_lea.hbm %s6083_s13, 128  ;;  %p5822_p3 = pneg %p6087_p11 }
  0x36   : > { %p5821_p0 = scmp.ne.s32.totalorder %s6083_s13, %s5820_s22  ;;  %s5825_s29 = scalar_lea.hbm %s9403_s0, 256 }
  0x37   : > { %p5826_p10 = scmp.lt.u32.totalorder %s6083_s13, %s9403_s0  ;;  %p5827_p4 = scmp.lt.u32.totalorder %s5825_s29, %s5820_s22 }
  0x38   : > { %p5823_p5 = pnand %p5822_p3, %p5821_p0  ;;  %p5829_p2 = scmp.lt.u32.totalorder %s5820_s22, %s6083_s13 }
  0x39   : > { %p5828_p1 = por %p5827_p4, %p5826_p10 }
  0x3a   : > { %p5824_p7 = pneg %p5823_p5 }
  0x3b   : > { %p5830_p6 = por %p5829_p2, %p5828_p1 }
  0x3d   : > { %p5831_p8 = pnand %p5830_p6, %p5824_p7 }
  0x3f   : > { %5834 = shalt.err (!%p5831_p8)
}
  0x40   : > { %s5835_s9 = scalar_lea.vmem %s6085_s14, 128  ;;  %s5939_s12 = smov [#allocation3]  }
  0x41   : > { %p5836_p9 = scmp.ne.s32.totalorder %s6085_s14, %s5835_s9  ;;  %s5840_s24 = sshll.u32 %s5939_s12, 4  ;;  %s5841_s24 = int_to_ptr.vmem [resolvable:$false] %s5840_s24 }
  0x42   : > { %s5842_s28 = scalar_lea.vmem %s5841_s24, 256  ;;  %p5843_p5 = scmp.lt.s32.totalorder %s6085_s14, %s5841_s24 }
  0x43   : > { %p5838_p12 = pnand %p5836_p9, %p5822_p3  ;;  %p5844_p10 = scmp.lt.s32.totalorder %s5842_s28, %s5835_s9 }
  0x45   : > { %p5839_p0 = pneg %p5838_p12  ;;  %p5845_p4 = por %p5844_p10, %p5843_p5 }
  0x47   : > { %p5846_p1 = pnand %p5845_p4, %p5839_p0 }
  0x49   : > { %5849 = shalt.err (!%p5846_p1)
}
  0x4a   : > { %5200 = dma.hbm_to_vmem [thread:$0]  (!%p6087_p11), %s6083_s13, 128, %s6085_s14, %s186_s6  }
  0x4b   : > { %p9640_p7 = scmp.ne.s32.totalorder %s9633_s27, 0 }
  0x4d   : > { %206 = sbr.rel (%p9640_p7) target bundleno = 3031 (0xbd7), region = 36 }
  0x54   : > { %s6119_s22 = sand.u32 1, %s5920_s16   ;;  %p9641_p3 = scmp.ne.s32.totalorder %s9631_s25, 0 }
  0x55   : > { %s4677_s30 = sshll.u32 %s6119_s22, 3  ;;  %s209_s29 = scalar_lea.sflag [#allocation4], %s6119_s22 }
  0x56   : > { %s212_s7 = scalar_lea.vmem [#allocation3], %s4677_s30 }
  0x57   : > { %5903 = dma.done.wait (%p9641_p3), %s209_s29, 128  }
  0x58   : > { %5905 = vsyncadd (%p9641_p3), %s209_s29, 4294967168  ;;  %p9642_p11 = scmp.ne.s32.totalorder %s9629_s23, 0 }
  0x5a   : > { %5907 = dma.done.wait (%p9642_p11), [#allocation7], 192  }
  0x5b   : > { %5909 = vsyncadd (%p9642_p11), [#allocation7], 4294967104  ;;  %v9412_v0 = vmov 0.0   ;;  %v247_v1 = vld [vmem:[#allocation6] sm:$0xff]  ;;  %v246_v2 = vld [vmem:[%s212_s7] sm:$0xff]  ;;  %vm495_vm0 = vcmask 1043456  }
  0x5c   : > { %564 = vmatprep.mubr.f32.mxu0 %v9412_v0  ;;  %1203 = vmatprep.mubr.f32.mxu1 %v9412_v0  ;;  %v349_v3 = vcombine.high %v246_v2, %v246_v2  ;;  %v250_v4 = vcombine.high %v247_v1, %v247_v1  ;;  %vm350_vm1 = vcmask 31744   ;;  %vm1042_vm2 = vcmask 261120   ;;  %s4864_s14 = sshll.u32 %s5928_s18, 7  ;;  %s240_s21 = scalar_lea.vmem [#allocation8], %s4677_s30 }
  0x5d   : > { %252 = vxpose.xlu0.b32.start.end [1/1] (short) %v247_v1, 128  ;;  %s4575_s6 = sshll.u32 %s240_s21, 4  ;;  %s9354_s12 = scalar_lea.hbm %s9407_s4, %s4864_s14  ;;  %s9356_s6 = int_to_ptr.vmem [resolvable:$true] %s4575_s6 }
  0x5e   : > { %4680 = vmatprep.subr.msk.mxu0 %vm495_vm0, %v349_v3  ;;  %s4559_s24 = scalar_lea.sflag [#allocation5], %s6119_s22  ;;  %s5850_s28 = scalar_lea.vmem %s9356_s6, 128 }
  0x5f   : > { %4681 = vmatpush1.msk.msra.mxu0 %vm495_vm0, %v246_v2  ;;  %p5851_p2 = scmp.ne.s32.totalorder %s9356_s6, %s5850_s28  ;;  %s5942_s18 = smov [#allocation8]  }
  0x60   : > { %s5854_s30 = sshll.u32 %s5942_s18, 4  ;;  %s5855_s30 = int_to_ptr.vmem [resolvable:$false] %s5854_s30 }
  0x61   : > { %p5852_p6 = pnand %p5851_p2, %p6069_p13  ;;  %s5856_s29 = scalar_lea.vmem %s5855_s30, 256 }
  0x62   : > { %p5857_p9 = scmp.lt.s32.totalorder %s9356_s6, %s5855_s30  ;;  %p5858_p12 = scmp.lt.s32.totalorder %s5856_s29, %s5850_s28 }
  0x63   : > { %p5853_p8 = pneg %p5852_p6 }
  0x64   : > { %p5859_p0 = por %p5858_p12, %p5857_p9 }
  0x66   : > { %p5860_p5 = pnand %p5859_p0, %p5853_p8 }
  0x9a   : > { %284 = vxpose.xlu0.b32.start.end [1/1] (short) %v250_v4, 128 }
  0xdd   : > { %v268_v5 = vpop.trf.xlu0 }
  0xde   : > { %4682 = vmatmul.mubr.msk.f32.vlgmr.msra.gmra.mrb[0].mxu0 %vm350_vm1, %v268_v5 }
  0xdf   : > { %570 = vmatprep.mubr.f32.mxu0 %v9412_v0 }
  0xe1   : > { %v269_v6 = vpop.trf.xlu0 }
  0xe2   : > { %4683 = vmatmul.mubr.msk.f32.gmra.mrb[2].mxu0 %vm350_vm1, %v269_v6 }
  0xe3   : > { %576 = vmatprep.mubr.f32.mxu0 %v9412_v0 }
  0xe5   : > { %v270_v7 = vpop.trf.xlu0 }
  0xe6   : > { %4684 = vmatmul.mubr.msk.f32.gmra.mrb[4].mxu0 %vm350_vm1, %v270_v7 }
  0xe7   : > { %582 = vmatprep.mubr.f32.mxu0 %v9412_v0 }
  0xe9   : > { %v271_v8 = vpop.trf.xlu0 }
  0xea   : > { %4685 = vmatmul.mubr.msk.f32.gmra.mrb[6].mxu0 %vm350_vm1, %v271_v8 }
  0xeb   : > { %588 = vmatprep.mubr.f32.mxu0 %v9412_v0 }
  0xed   : > { %v272_v9 = vpop.trf.xlu0 }
  0xee   : > { %4686 = vmatmul.mubr.msk.f32.gmra.mrb[8].mxu0 %vm350_vm1, %v272_v9 }
  0xef   : > { %594 = vmatprep.mubr.f32.mxu0 %v9412_v0 }
  0xf1   : > { %v273_v10 = vpop.trf.xlu0 }
  0xf2   : > { %4687 = vmatmul.mubr.msk.f32.gmra.mrb[10].mxu0 %vm350_vm1, %v273_v10 }
  0xf3   : > { %600 = vmatprep.mubr.f32.mxu0 %v9412_v0 }
  0xf5   : > { %v274_v11 = vpop.trf.xlu0 }
  0xf6   : > { %4688 = vmatmul.mubr.msk.f32.gmra.mrb[12].mxu0 %vm350_vm1, %v274_v11 }
  0xf7   : > { %606 = vmatprep.mubr.f32.mxu0 %v9412_v0 }
  0xf9   : > { %v275_v12 = vpop.trf.xlu0 }
  0xfa   : > { %4689 = vmatmul.mubr.msk.f32.gmra.mrb[14].mxu0 %vm350_vm1, %v275_v12 }
  0xfb   : > { %612 = vmatprep.mubr.f32.mxu0 %v9412_v0 }
  0xfd   : > { %v276_v13 = vpop.trf.xlu0 }
  0xfe   : > { %4690 = vmatmul.mubr.msk.f32.gmra.mrb[16].mxu0 %vm350_vm1, %v276_v13 }
  0xff   : > { %618 = vmatprep.mubr.f32.mxu0 %v9412_v0 }
 0x101   : > { %v277_v14 = vpop.trf.xlu0 }
 0x102   : > { %4691 = vmatmul.mubr.msk.f32.gmra.mrb[18].mxu0 %vm350_vm1, %v277_v14 }
 0x103   : > { %624 = vmatprep.mubr.f32.mxu0 %v9412_v0 }
 0x105   : > { %v278_v15 = vpop.trf.xlu0 }
 0x106   : > { %4692 = vmatmul.mubr.msk.f32.gmra.mrb[20].mxu0 %vm350_vm1, %v278_v15 }
 0x107   : > { %630 = vmatprep.mubr.f32.mxu0 %v9412_v0 }
 0x109   : > { %v279_v16 = vpop.trf.xlu0 }
 0x10a   : > { %4693 = vmatmul.mubr.msk.f32.gmra.mrb[22].mxu0 %vm350_vm1, %v279_v16 }
 0x10b   : > { %636 = vmatprep.mubr.f32.mxu0 %v9412_v0 }
 0x10d   : > { %v280_v17 = vpop.trf.xlu0 }
 0x10e   : > { %4694 = vmatmul.mubr.msk.f32.gmra.mrb[24].mxu0 %vm350_vm1, %v280_v17 }
 0x10f   : > { %642 = vmatprep.mubr.f32.mxu0 %v9412_v0 }
 0x111   : > { %v281_v18 = vpop.trf.xlu0 }
 0x112   : > { %4695 = vmatmul.mubr.msk.f32.gmra.mrb[26].mxu0 %vm350_vm1, %v281_v18 }
 0x113   : > { %648 = vmatprep.mubr.f32.mxu0 %v9412_v0 }
 0x115   : > { %v282_v19 = vpop.trf.xlu0 }
 0x116   : > { %4696 = vmatmul.mubr.msk.f32.gmra.mrb[28].mxu0 %vm350_vm1, %v282_v19 }
 0x117   : > { %654 = vmatprep.mubr.f32.mxu0 %v9412_v0 }
 0x119   : > { %v283_v20 = vpop.trf.xlu0 }
 0x11a   : > { %4697 = vmatmul.mubr.msk.f32.gmra.mrb[30].mxu0 %vm350_vm1, %v283_v20 }
 0x11b   : > { %660 = vmatprep.mubr.f32.mxu0 %v9412_v0 }
 0x11d   : > { %v300_v21 = vpop.trf.xlu0 }
 0x11e   : > { %4698 = vmatmul.mubr.msk.f32.gmra.mrb[32].mxu0 %vm350_vm1, %v300_v21  ;;  %v248_v21 = vld [vmem:[#allocation6 + $0x8] sm:$0xf] }
 0x11f   : > { %666 = vmatprep.mubr.f32.mxu0 %v9412_v0  ;;  %316 = vxpose.xlu0.b32.start.end [1/1] (short) %v248_v21, 128 }
 0x121   : > { %v301_v22 = vpop.trf.xlu0 }
 0x122   : > { %4699 = vmatmul.mubr.msk.f32.gmra.mrb[34].mxu0 %vm350_vm1, %v301_v22 }
 0x123   : > { %672 = vmatprep.mubr.f32.mxu0 %v9412_v0 }
 0x125   : > { %v302_v23 = vpop.trf.xlu0 }
 0x126   : > { %4700 = vmatmul.mubr.msk.f32.gmra.mrb[36].mxu0 %vm350_vm1, %v302_v23 }
 0x127   : > { %678 = vmatprep.mubr.f32.mxu0 %v9412_v0 }
 0x129   : > { %v303_v24 = vpop.trf.xlu0 }
 0x12a   : > { %4701 = vmatmul.mubr.msk.f32.gmra.mrb[38].mxu0 %vm350_vm1, %v303_v24 }
 0x12b   : > { %684 = vmatprep.mubr.f32.mxu0 %v9412_v0 }
 0x12d   : > { %v304_v18 = vpop.trf.xlu0 }
 0x12e   : > { %4702 = vmatmul.mubr.msk.f32.gmra.mrb[40].mxu0 %vm350_vm1, %v304_v18 }
 0x12f   : > { %690 = vmatprep.mubr.f32.mxu0 %v9412_v0 }
 0x131   : > { %v305_v19 = vpop.trf.xlu0 }
 0x132   : > { %4703 = vmatmul.mubr.msk.f32.gmra.mrb[42].mxu0 %vm350_vm1, %v305_v19 }
 0x133   : > { %696 = vmatprep.mubr.f32.mxu0 %v9412_v0 }
 0x135   : > { %v306_v20 = vpop.trf.xlu0 }
 0x136   : > { %4704 = vmatmul.mubr.msk.f32.gmra.mrb[44].mxu0 %vm350_vm1, %v306_v20 }
 0x137   : > { %702 = vmatprep.mubr.f32.mxu0 %v9412_v0 }
 0x139   : > { %v307_v22 = vpop.trf.xlu0 }
 0x13a   : > { %4705 = vmatmul.mubr.msk.f32.gmra.mrb[46].mxu0 %vm350_vm1, %v307_v22 }
 0x13b   : > { %708 = vmatprep.mubr.f32.mxu0 %v9412_v0 }
 0x13d   : > { %v308_v23 = vpop.trf.xlu0 }
 0x13e   : > { %4706 = vmatmul.mubr.msk.f32.gmra.mrb[48].mxu0 %vm350_vm1, %v308_v23 }
 0x13f   : > { %714 = vmatprep.mubr.f32.mxu0 %v9412_v0 }
 0x1b1   : > { %v566_v25 = vpop.f32.mrb[0].mxu0 }
 0x1b2   : > { %v568_v26 = vpop.f32.mrb[1].mxu0 }
 0x1b5   : > { %v572_v27 = vpop.f32.mrb[2].mxu0 }
 0x1b6   : > { %v4867_v28 = vpack.c.bf16 %v572_v27, %v566_v25  ;;  %v574_v29 = vpop.f32.mrb[3].mxu0  ;;  %v309_v25 = vpop.trf.xlu0 }
 0x1b7   : > { %v4865_v30 = vpack.c.bf16 %v574_v29, %v568_v26  ;;  %4707 = vmatmul.mubr.msk.f32.gmra.mrb[50].mxu0 %vm350_vm1, %v309_v25 }
 0x1b8   : > { %720 = vmatprep.mubr.f32.mxu0 %v9412_v0 }
 0x1b9   : > { %v578_v31 = vpop.f32.mrb[4].mxu0  ;;  %4866 = vmatprep.subr.bf16.mxu1 %v4865_v30 }
 0x1ba   : > { %v580_v32 = vpop.f32.mrb[5].mxu0  ;;  %4868 = vmatpush1.bf16.msra.mxu1 %v4867_v28  ;;  %v310_v27 = vpop.trf.xlu0 }
 0x1bb   : > { %4708 = vmatmul.mubr.msk.f32.gmra.mrb[52].mxu0 %vm350_vm1, %v310_v27 }
 0x1bc   : > { %726 = vmatprep.mubr.f32.mxu0 %v9412_v0 }
 0x1bd   : > { %v584_v33 = vpop.f32.mrb[6].mxu0 }
 0x1be   : > { %v4871_v34 = vpack.c.bf16 %v584_v33, %v578_v31  ;;  %v586_v35 = vpop.f32.mrb[7].mxu0  ;;  %v311_v29 = vpop.trf.xlu0 }
 0x1bf   : > { %v4869_v36 = vpack.c.bf16 %v586_v35, %v580_v32  ;;  %4709 = vmatmul.mubr.msk.f32.gmra.mrb[54].mxu0 %vm350_vm1, %v311_v29 }
 0x1c0   : > { %732 = vmatprep.mubr.f32.mxu0 %v9412_v0 }
 0x1c1   : > { %v6175_v37 = vpop.f32.mrb[8].mxu0  ;;  %4870 = vmatprep.subr.bf16.mxu1 %v4869_v36 }
 0x1c2   : > { %9643 = vst [vmem:[#allocation12_spill] sm:$0xff] %v6175_v37  ;;  %v6177_v38 = vpop.f32.mrb[9].mxu0  ;;  %4872 = vmatpush1.bf16.msra.mxu1 %v4871_v34  ;;  %v312_v31 = vpop.trf.xlu0 }
 0x1c3   : > { %9644 = vst [vmem:[#allocation13_spill] sm:$0xff] %v6177_v38  ;;  %4710 = vmatmul.mubr.msk.f32.gmra.mrb[56].mxu0 %vm350_vm1, %v312_v31 }
 0x1c4   : > { %738 = vmatprep.mubr.f32.mxu0 %v9412_v0 }
 0x1c5   : > { %v6179_v39 = vpop.f32.mrb[10].mxu0 }
 0x1c6   : > { %9645 = vst [vmem:[#allocation14_spill] sm:$0xff] %v6179_v39  ;;  %v6183_v41 = vpop.f32.mrb[11].mxu0  ;;  %v313_v33 = vpop.trf.xlu0 }
 0x1c7   : > { %9646 = vst [vmem:[#allocation15_spill] sm:$0xff] %v6183_v41  ;;  %4711 = vmatmul.mubr.msk.f32.gmra.mrb[58].mxu0 %vm350_vm1, %v313_v33 }
 0x1c8   : > { %744 = vmatprep.mubr.f32.mxu0 %v9412_v0 }
 0x1c9   : > { %v6187_v43 = vpop.f32.mrb[12].mxu0 }
 0x1ca   : > { %9647 = vst [vmem:[#allocation16_spill] sm:$0xff] %v6187_v43  ;;  %v6189_v44 = vpop.f32.mrb[13].mxu0  ;;  %v314_v35 = vpop.trf.xlu0 }
 0x1cb   : > { %9648 = vst [vmem:[#allocation17_spill] sm:$0xff] %v6189_v44  ;;  %4712 = vmatmul.mubr.msk.f32.gmra.mrb[60].mxu0 %vm350_vm1, %v314_v35 }
 0x1cc   : > { %750 = vmatprep.mubr.f32.mxu0 %v9412_v0 }
 0x1cd   : > { %v6191_v45 = vpop.f32.mrb[14].mxu0 }
 0x1ce   : > { %9649 = vst [vmem:[#allocation18_spill] sm:$0xff] %v6191_v45  ;;  %v6195_v47 = vpop.f32.mrb[15].mxu0  ;;  %v315_v25 = vpop.trf.xlu0 }
 0x1cf   : > { %9650 = vst [vmem:[#allocation19_spill] sm:$0xff] %v6195_v47  ;;  %4713 = vmatmul.mubr.msk.f32.gmra.mrb[62].mxu0 %vm350_vm1, %v315_v25 }
 0x1d0   : > { %756 = vmatprep.mubr.f32.mxu0 %v9412_v0 }
 0x1d1   : > { %v6199_v49 = vpop.f32.mrb[16].mxu0 }
 0x1d2   : > { %9651 = vst [vmem:[#allocation20_spill] sm:$0xff] %v6199_v49  ;;  %v6201_v50 = vpop.f32.mrb[17].mxu0  ;;  %v332_v27 = vpop.trf.xlu0 }
 0x1d3   : > { %9652 = vst [vmem:[#allocation21_spill] sm:$0xff] %v6201_v50  ;;  %4714 = vmatmul.mubr.msk.f32.gmra.mrb[64].mxu0 %vm350_vm1, %v332_v27 }
 0x1d4   : > { %762 = vmatprep.mubr.f32.mxu0 %v9412_v0 }
 0x1d5   : > { %v6203_v51 = vpop.f32.mrb[18].mxu0 }
 0x1d6   : > { %9653 = vst [vmem:[#allocation22_spill] sm:$0xff] %v6203_v51  ;;  %v6207_v53 = vpop.f32.mrb[19].mxu0  ;;  %v333_v29 = vpop.trf.xlu0 }
 0x1d7   : > { %9654 = vst [vmem:[#allocation23_spill] sm:$0xff] %v6207_v53  ;;  %4715 = vmatmul.mubr.msk.f32.gmra.mrb[66].mxu0 %vm350_vm1, %v333_v29 }
 0x1d8   : > { %768 = vmatprep.mubr.f32.mxu0 %v9412_v0 }
 0x1d9   : > { %v6211_v55 = vpop.f32.mrb[20].mxu0 }
 0x1da   : > { %9655 = vst [vmem:[#allocation24_spill] sm:$0xff] %v6211_v55  ;;  %v6213_v56 = vpop.f32.mrb[21].mxu0  ;;  %v334_v31 = vpop.trf.xlu0 }
 0x1db   : > { %9656 = vst [vmem:[#allocation25_spill] sm:$0xff] %v6213_v56  ;;  %4716 = vmatmul.mubr.msk.f32.gmra.mrb[68].mxu0 %vm350_vm1, %v334_v31 }
 0x1dc   : > { %774 = vmatprep.mubr.f32.mxu0 %v9412_v0 }
 0x1dd   : > { %v6215_v57 = vpop.f32.mrb[22].mxu0 }
 0x1de   : > { %9657 = vst [vmem:[#allocation26_spill] sm:$0xff] %v6215_v57  ;;  %v6219_v59 = vpop.f32.mrb[23].mxu0  ;;  %v335_v33 = vpop.trf.xlu0 }
 0x1df   : > { %9658 = vst [vmem:[#allocation27_spill] sm:$0xff] %v6219_v59  ;;  %4717 = vmatmul.mubr.msk.f32.gmra.mrb[70].mxu0 %vm350_vm1, %v335_v33 }
 0x1e0   : > { %780 = vmatprep.mubr.f32.mxu0 %v9412_v0 }
 0x1e1   : > { %v6223_v61 = vpop.f32.mrb[24].mxu0 }
 0x1e2   : > { %9659 = vst [vmem:[#allocation28_spill] sm:$0xff] %v6223_v61  ;;  %v6225_v62 = vpop.f32.mrb[25].mxu0 }
 0x1e3   : > { %9660 = vst [vmem:[#allocation29_spill] sm:$0xff] %v6225_v62 }
 0x1e5   : > { %v6227_v63 = vpop.f32.mrb[26].mxu0 }
 0x1e6   : > { %9661 = vst [vmem:[#allocation30_spill] sm:$0xff] %v6227_v63  ;;  %v6231_v2 = vpop.f32.mrb[27].mxu0 }
 0x1e7   : > { %9662 = vst [vmem:[#allocation31_spill] sm:$0xff] %v6231_v2 }
 0x1e9   : > { %v6235_v4 = vpop.f32.mrb[28].mxu0 }
 0x1ea   : > { %9663 = vst [vmem:[#allocation32_spill] sm:$0xff] %v6235_v4  ;;  %v6237_v5 = vpop.f32.mrb[29].mxu0 }
 0x1eb   : > { %9664 = vst [vmem:[#allocation33_spill] sm:$0xff] %v6237_v5 }
 0x1ed   : > { %v6239_v6 = vpop.f32.mrb[30].mxu0 }
 0x1ee   : > { %9665 = vst [vmem:[#allocation34_spill] sm:$0xff] %v6239_v6  ;;  %v6243_v8 = vpop.f32.mrb[31].mxu0 }
 0x1ef   : > { %9666 = vst [vmem:[#allocation35_spill] sm:$0xff] %v6243_v8 }
 0x1f1   : > { %v662_v10 = vpop.f32.mrb[32].mxu0 }
 0x1f2   : > { %978 = vxpose.xlu1.b32.start [1/4] (short) %v662_v10, 128  ;;  %v664_v11 = vpop.f32.mrb[33].mxu0 }
 0x1f5   : > { %v668_v12 = vpop.f32.mrb[34].mxu0 }
 0x1f6   : > { %979 = vxpose.xlu1.b32.cont [2/4] (short) %v668_v12, 128  ;;  %v670_v13 = vpop.f32.mrb[35].mxu0 }
 0x1f9   : > { %v674_v14 = vpop.f32.mrb[36].mxu0 }
 0x1fa   : > { %980 = vxpose.xlu1.b32.cont [3/4] (short) %v674_v14, 128  ;;  %v676_v15 = vpop.f32.mrb[37].mxu0 }
 0x1fd   : > { %v680_v16 = vpop.f32.mrb[38].mxu0 }
 0x1fe   : > { %981 = vxpose.xlu1.b32.end [4/4] (short) %v680_v16, 128  ;;  %v682_v17 = vpop.f32.mrb[39].mxu0 }
 0x22f   : > { %1010 = vxpose.xlu1.b32.start [1/4] (short) %v664_v11, 128 }
 0x233   : > { %1011 = vxpose.xlu1.b32.cont [2/4] (short) %v670_v13, 128 }
 0x237   : > { %1012 = vxpose.xlu1.b32.cont [3/4] (short) %v676_v15, 128 }
 0x23b   : > { %1013 = vxpose.xlu1.b32.end [4/4] (short) %v682_v17, 128 }
 0x272   : > { %v994_v24 = vpop.trf.xlu1 }
 0x273   : > { %4730 = vmatmul.mubr.msk.f32.vlgmr.msra.gmra.mrb[0].mxu1 %vm1042_vm2, %v994_v24 }
 0x274   : > { %1209 = vmatprep.mubr.f32.mxu1 %v9412_v0 }
 0x276   : > { %v995_v26 = vpop.trf.xlu1 }
 0x277   : > { %4731 = vmatmul.mubr.msk.f32.gmra.mrb[2].mxu1 %vm1042_vm2, %v995_v26 }
 0x278   : > { %1215 = vmatprep.mubr.f32.mxu1 %v9412_v0 }
 0x27a   : > { %v996_v28 = vpop.trf.xlu1 }
 0x27b   : > { %4732 = vmatmul.mubr.msk.f32.gmra.mrb[4].mxu1 %vm1042_vm2, %v996_v28 }
 0x27c   : > { %1221 = vmatprep.mubr.f32.mxu1 %v9412_v0 }
 0x27e   : > { %v997_v30 = vpop.trf.xlu1 }
 0x27f   : > { %4733 = vmatmul.mubr.msk.f32.gmra.mrb[6].mxu1 %vm1042_vm2, %v997_v30 }
 0x280   : > { %1227 = vmatprep.mubr.f32.mxu1 %v9412_v0 }
 0x282   : > { %v998_v32 = vpop.trf.xlu1 }
 0x283   : > { %4734 = vmatmul.mubr.msk.f32.gmra.mrb[8].mxu1 %vm1042_vm2, %v998_v32 }
 0x284   : > { %1233 = vmatprep.mubr.f32.mxu1 %v9412_v0 }
 0x286   : > { %v999_v34 = vpop.trf.xlu1 }
 0x287   : > { %4735 = vmatmul.mubr.msk.f32.gmra.mrb[10].mxu1 %vm1042_vm2, %v999_v34 }
 0x288   : > { %1239 = vmatprep.mubr.f32.mxu1 %v9412_v0 }
 0x28a   : > { %v1000_v36 = vpop.trf.xlu1 }
 0x28b   : > { %4736 = vmatmul.mubr.msk.f32.gmra.mrb[12].mxu1 %vm1042_vm2, %v1000_v36 }
 0x28c   : > { %1245 = vmatprep.mubr.f32.mxu1 %v9412_v0 }
 0x28e   : > { %v1001_v10 = vpop.trf.xlu1 }
 0x28f   : > { %4737 = vmatmul.mubr.msk.f32.gmra.mrb[14].mxu1 %vm1042_vm2, %v1001_v10 }
 0x290   : > { %1251 = vmatprep.mubr.f32.mxu1 %v9412_v0 }
 0x292   : > { %v1002_v11 = vpop.trf.xlu1 }
 0x293   : > { %4738 = vmatmul.mubr.msk.f32.gmra.mrb[16].mxu1 %vm1042_vm2, %v1002_v11 }
 0x294   : > { %1257 = vmatprep.mubr.f32.mxu1 %v9412_v0 }
 0x296   : > { %v1003_v12 = vpop.trf.xlu1 }
 0x297   : > { %4739 = vmatmul.mubr.msk.f32.gmra.mrb[18].mxu1 %vm1042_vm2, %v1003_v12 }
 0x298   : > { %1263 = vmatprep.mubr.f32.mxu1 %v9412_v0 }
 0x29a   : > { %v1004_v13 = vpop.trf.xlu1 }
 0x29b   : > { %4740 = vmatmul.mubr.msk.f32.gmra.mrb[20].mxu1 %vm1042_vm2, %v1004_v13  ;;  %v686_v13 = vpop.f32.mrb[40].mxu0 }
 0x29c   : > { %1269 = vmatprep.mubr.f32.mxu1 %v9412_v0  ;;  %1859 = vxpose.xlu1.b32.start [1/4] (short) %v686_v13, 128 }
 0x29e   : > { %v1005_v14 = vpop.trf.xlu1 }
 0x29f   : > { %4741 = vmatmul.mubr.msk.f32.gmra.mrb[22].mxu1 %vm1042_vm2, %v1005_v14  ;;  %v688_v14 = vpop.f32.mrb[41].mxu0 }
 0x2a0   : > { %1275 = vmatprep.mubr.f32.mxu1 %v9412_v0  ;;  %1891 = vxpose.xlu0.b32.start [1/4] (short) %v688_v14, 128 }
 0x2a2   : > { %v1006_v15 = vpop.trf.xlu1 }
 0x2a3   : > { %4742 = vmatmul.mubr.msk.f32.gmra.mrb[24].mxu1 %vm1042_vm2, %v1006_v15  ;;  %v692_v15 = vpop.f32.mrb[42].mxu0 }
 0x2a4   : > { %1281 = vmatprep.mubr.f32.mxu1 %v9412_v0  ;;  %1860 = vxpose.xlu1.b32.cont [2/4] (short) %v692_v15, 128 }
 0x2a6   : > { %v1007_v16 = vpop.trf.xlu1 }
 0x2a7   : > { %4743 = vmatmul.mubr.msk.f32.gmra.mrb[26].mxu1 %vm1042_vm2, %v1007_v16  ;;  %v694_v16 = vpop.f32.mrb[43].mxu0 }
 0x2a8   : > { %1287 = vmatprep.mubr.f32.mxu1 %v9412_v0  ;;  %1892 = vxpose.xlu0.b32.cont [2/4] (short) %v694_v16, 128 }
 0x2aa   : > { %v1008_v17 = vpop.trf.xlu1 }
 0x2ab   : > { %4744 = vmatmul.mubr.msk.f32.gmra.mrb[28].mxu1 %vm1042_vm2, %v1008_v17  ;;  %v698_v17 = vpop.f32.mrb[44].mxu0 }
 0x2ac   : > { %1293 = vmatprep.mubr.f32.mxu1 %v9412_v0  ;;  %1861 = vxpose.xlu1.b32.cont [3/4] (short) %v698_v17, 128 }
 0x2ae   : > { %v1009_v18 = vpop.trf.xlu1 }
 0x2af   : > { %4745 = vmatmul.mubr.msk.f32.gmra.mrb[30].mxu1 %vm1042_vm2, %v1009_v18  ;;  %v700_v18 = vpop.f32.mrb[45].mxu0 }
 0x2b0   : > { %1299 = vmatprep.mubr.f32.mxu1 %v9412_v0  ;;  %1893 = vxpose.xlu0.b32.cont [3/4] (short) %v700_v18, 128 }
 0x2b2   : > { %v1026_v19 = vpop.trf.xlu1 }
 0x2b3   : > { %4746 = vmatmul.mubr.msk.f32.gmra.mrb[32].mxu1 %vm1042_vm2, %v1026_v19  ;;  %v704_v19 = vpop.f32.mrb[46].mxu0 }
 0x2b4   : > { %1305 = vmatprep.mubr.f32.mxu1 %v9412_v0  ;;  %1862 = vxpose.xlu1.b32.end [4/4] (short) %v704_v19, 128 }
 0x2b6   : > { %v1027_v20 = vpop.trf.xlu1 }
 0x2b7   : > { %4747 = vmatmul.mubr.msk.f32.gmra.mrb[34].mxu1 %vm1042_vm2, %v1027_v20  ;;  %v706_v20 = vpop.f32.mrb[47].mxu0 }
 0x2b8   : > { %1311 = vmatprep.mubr.f32.mxu1 %v9412_v0  ;;  %1894 = vxpose.xlu0.b32.end [4/4] (short) %v706_v20, 128  ;;  %v710_v59 = vpop.f32.mrb[48].mxu0 }
 0x2b9   : > { %v712_v49 = vpop.f32.mrb[49].mxu0 }
 0x2ba   : > { %v1028_v21 = vpop.trf.xlu1  ;;  %v716_v50 = vpop.f32.mrb[50].mxu0 }
 0x2bb   : > { %4748 = vmatmul.mubr.msk.f32.gmra.mrb[36].mxu1 %vm1042_vm2, %v1028_v21  ;;  %v718_v53 = vpop.f32.mrb[51].mxu0 }
 0x2bc   : > { %1317 = vmatprep.mubr.f32.mxu1 %v9412_v0  ;;  %v722_v45 = vpop.f32.mrb[52].mxu0 }
 0x2be   : > { %v1029_v22 = vpop.trf.xlu1 }
 0x2bf   : > { %4749 = vmatmul.mubr.msk.f32.gmra.mrb[38].mxu1 %vm1042_vm2, %v1029_v22 }
 0x2c0   : > { %1323 = vmatprep.mubr.f32.mxu1 %v9412_v0 }
 0x2c2   : > { %v1030_v23 = vpop.trf.xlu1 }
 0x2c3   : > { %4750 = vmatmul.mubr.msk.f32.gmra.mrb[40].mxu1 %vm1042_vm2, %v1030_v23 }
 0x2c4   : > { %1329 = vmatprep.mubr.f32.mxu1 %v9412_v0 }
 0x2c6   : > { %v1031_v24 = vpop.trf.xlu1 }
 0x2c7   : > { %4751 = vmatmul.mubr.msk.f32.gmra.mrb[42].mxu1 %vm1042_vm2, %v1031_v24 }
 0x2c8   : > { %1335 = vmatprep.mubr.f32.mxu1 %v9412_v0 }
 0x2ca   : > { %v1032_v26 = vpop.trf.xlu1 }
 0x2cb   : > { %4752 = vmatmul.mubr.msk.f32.gmra.mrb[44].mxu1 %vm1042_vm2, %v1032_v26 }
 0x2cc   : > { %1341 = vmatprep.mubr.f32.mxu1 %v9412_v0 }
 0x2ce   : > { %v1033_v28 = vpop.trf.xlu1 }
 0x2cf   : > { %4753 = vmatmul.mubr.msk.f32.gmra.mrb[46].mxu1 %vm1042_vm2, %v1033_v28 }
 0x2d0   : > { %1347 = vmatprep.mubr.f32.mxu1 %v9412_v0 }
 0x2d2   : > { %v1034_v30 = vpop.trf.xlu1 }
 0x2d3   : > { %4754 = vmatmul.mubr.msk.f32.gmra.mrb[48].mxu1 %vm1042_vm2, %v1034_v30 }
 0x2d4   : > { %1353 = vmatprep.mubr.f32.mxu1 %v9412_v0 }
 0x2d6   : > { %v1035_v32 = vpop.trf.xlu1 }
 0x2d7   : > { %4755 = vmatmul.mubr.msk.f32.gmra.mrb[50].mxu1 %vm1042_vm2, %v1035_v32 }
 0x2d8   : > { %1359 = vmatprep.mubr.f32.mxu1 %v9412_v0 }
 0x2da   : > { %v1036_v34 = vpop.trf.xlu1 }
 0x2db   : > { %4756 = vmatmul.mubr.msk.f32.gmra.mrb[52].mxu1 %vm1042_vm2, %v1036_v34 }
 0x2dc   : > { %1365 = vmatprep.mubr.f32.mxu1 %v9412_v0 }
 0x2de   : > { %v1037_v35 = vpop.trf.xlu1 }
 0x2df   : > { %4757 = vmatmul.mubr.msk.f32.gmra.mrb[54].mxu1 %vm1042_vm2, %v1037_v35 }
 0x2e0   : > { %1371 = vmatprep.mubr.f32.mxu1 %v9412_v0 }
 0x2e2   : > { %v1038_v36 = vpop.trf.xlu1 }
 0x2e3   : > { %4758 = vmatmul.mubr.msk.f32.gmra.mrb[56].mxu1 %vm1042_vm2, %v1038_v36 }
 0x2e4   : > { %1377 = vmatprep.mubr.f32.mxu1 %v9412_v0 }
 0x2e5   : > { %2739 = vxpose.xlu1.b32.start [1/4] (short) %v710_v59, 128 }
 0x2e6   : > { %v1039_v10 = vpop.trf.xlu1 }
 0x2e7   : > { %4759 = vmatmul.mubr.msk.f32.gmra.mrb[58].mxu1 %vm1042_vm2, %v1039_v10 }
 0x2e8   : > { %1383 = vmatprep.mubr.f32.mxu1 %v9412_v0 }
 0x2e9   : > { %2771 = vxpose.xlu0.b32.start [1/4] (short) %v712_v49, 128  ;;  %2740 = vxpose.xlu1.b32.cont [2/4] (short) %v716_v50, 128  ;;  %v724_v49 = vpop.f32.mrb[53].mxu0 }
 0x2ea   : > { %v1040_v11 = vpop.trf.xlu1  ;;  %v728_v47 = vpop.f32.mrb[54].mxu0 }
 0x2eb   : > { %4760 = vmatmul.mubr.msk.f32.gmra.mrb[60].mxu1 %vm1042_vm2, %v1040_v11 }
 0x2ec   : > { %1389 = vmatprep.mubr.f32.mxu1 %v9412_v0 }
 0x2ed   : > { %2772 = vxpose.xlu0.b32.cont [2/4] (short) %v718_v53, 128  ;;  %2741 = vxpose.xlu1.b32.cont [3/4] (short) %v722_v45, 128  ;;  %v730_v53 = vpop.f32.mrb[55].mxu0 }
 0x2ee   : > { %v1041_v12 = vpop.trf.xlu1 }
 0x2ef   : > { %4761 = vmatmul.mubr.msk.f32.gmra.mrb[62].mxu1 %vm1042_vm2, %v1041_v12 }
 0x2f1   : > { %2773 = vxpose.xlu0.b32.cont [3/4] (short) %v724_v49, 128  ;;  %2742 = vxpose.xlu1.b32.end [4/4] (short) %v728_v47, 128 }
 0x2f5   : > { %2774 = vxpose.xlu0.b32.end [4/4] (short) %v730_v53, 128  ;;  %v336_v53 = vpop.trf.xlu0 }
 0x2f6   : > { %4718 = vmatmul.mubr.msk.f32.gmra.mrb[72].mxu0 %vm350_vm1, %v336_v53 }
 0x346   : > { %v6342_v21 = vpop.f32.mrb[0].mxu1 }
 0x347   : > { %v6344_v22 = vpop.f32.mrb[1].mxu1 }
 0x348   : > { %9667 = vst [vmem:[#allocation36_spill] sm:$0xff] %v6344_v22 }
 0x34a   : > { %v6346_v23 = vpop.f32.mrb[2].mxu1 }
 0x34b   : > { %v6348_v24 = vpop.f32.mrb[3].mxu1 }
 0x34e   : > { %v6350_v25 = vpop.f32.mrb[4].mxu1 }
 0x34f   : > { %v1396_v26 = vmax.f32 %v6342_v21, %v6350_v25  ;;  %v6354_v27 = vpop.f32.mrb[5].mxu1 }
 0x350   : > { %v1433_v28 = vmax.f32 %v6344_v22, %v6354_v27 }
 0x352   : > { %v6358_v29 = vpop.f32.mrb[6].mxu1 }
 0x353   : > { %v1397_v30 = vmax.f32 %v6346_v23, %v6358_v29  ;;  %v6362_v31 = vpop.f32.mrb[7].mxu1 }
 0x354   : > { %v1434_v32 = vmax.f32 %v6348_v24, %v6362_v31 }
 0x356   : > { %v6366_v33 = vpop.f32.mrb[8].mxu1 }
 0x357   : > { %v1398_v34 = vmax.f32 %v1396_v26, %v6366_v33  ;;  %v6369_v35 = vpop.f32.mrb[9].mxu1 }
 0x358   : > { %v1435_v36 = vmax.f32 %v1433_v28, %v6369_v35 }
 0x35a   : > { %v6372_v10 = vpop.f32.mrb[10].mxu1 }
 0x35b   : > { %v1399_v11 = vmax.f32 %v1397_v30, %v6372_v10  ;;  %v6375_v12 = vpop.f32.mrb[11].mxu1 }
 0x35c   : > { %v1436_v13 = vmax.f32 %v1434_v32, %v6375_v12 }
 0x35e   : > { %v6378_v14 = vpop.f32.mrb[12].mxu1 }
 0x35f   : > { %v1400_v15 = vmax.f32 %v1398_v34, %v6378_v14  ;;  %v6381_v16 = vpop.f32.mrb[13].mxu1 }
 0x360   : > { %v1437_v17 = vmax.f32 %v1435_v36, %v6381_v16 }
 0x362   : > { %v6384_v18 = vpop.f32.mrb[14].mxu1 }
 0x363   : > { %v1401_v19 = vmax.f32 %v1399_v11, %v6384_v18  ;;  %v6387_v20 = vpop.f32.mrb[15].mxu1 }
 0x364   : > { %v1438_v26 = vmax.f32 %v1436_v13, %v6387_v20 }
 0x366   : > { %v6390_v28 = vpop.f32.mrb[16].mxu1 }
 0x367   : > { %v1402_v30 = vmax.f32 %v1400_v15, %v6390_v28  ;;  %v6393_v32 = vpop.f32.mrb[17].mxu1 }
 0x368   : > { %v1439_v34 = vmax.f32 %v1437_v17, %v6393_v32 }
 0x36a   : > { %v6396_v7 = vpop.f32.mrb[18].mxu1 }
 0x36b   : > { %v1403_v36 = vmax.f32 %v1401_v19, %v6396_v7  ;;  %v6399_v9 = vpop.f32.mrb[19].mxu1 }
 0x36c   : > { %v1440_v11 = vmax.f32 %v1438_v26, %v6399_v9 }
 0x36e   : > { %v6402_v1 = vpop.f32.mrb[20].mxu1 }
 0x36f   : > { %v1404_v13 = vmax.f32 %v1402_v30, %v6402_v1  ;;  %v6405_v3 = vpop.f32.mrb[21].mxu1 }
 0x370   : > { %v1441_v15 = vmax.f32 %v1439_v34, %v6405_v3 }
 0x372   : > { %v6408_v58 = vpop.f32.mrb[22].mxu1 }
 0x373   : > { %v1405_v17 = vmax.f32 %v1403_v36, %v6408_v58  ;;  %v6411_v60 = vpop.f32.mrb[23].mxu1 }
 0x374   : > { %v1442_v19 = vmax.f32 %v1440_v11, %v6411_v60 }
 0x376   : > { %v6414_v52 = vpop.f32.mrb[24].mxu1 }
 0x377   : > { %v1406_v26 = vmax.f32 %v1404_v13, %v6414_v52  ;;  %v6417_v54 = vpop.f32.mrb[25].mxu1 }
 0x378   : > { %v1443_v30 = vmax.f32 %v1441_v15, %v6417_v54 }
 0x37a   : > { %v6420_v46 = vpop.f32.mrb[26].mxu1 }
 0x37b   : > { %v1407_v34 = vmax.f32 %v1405_v17, %v6420_v46  ;;  %v6423_v48 = vpop.f32.mrb[27].mxu1 }
 0x37c   : > { %v1444_v36 = vmax.f32 %v1442_v19, %v6423_v48 }
 0x37e   : > { %v6426_v40 = vpop.f32.mrb[28].mxu1 }
 0x37f   : > { %v1408_v11 = vmax.f32 %v1406_v26, %v6426_v40  ;;  %v6429_v42 = vpop.f32.mrb[29].mxu1 }
 0x380   : > { %9668 = vst [vmem:[#allocation37_spill] sm:$0xff] %v6429_v42  ;;  %v1445_v13 = vmax.f32 %v1443_v30, %v6429_v42 }
 0x382   : > { %v6432_v0 = vpop.f32.mrb[30].mxu1 }
 0x383   : > { %v1409_v15 = vmax.f32 %v1407_v34, %v6432_v0  ;;  %v6435_v4 = vpop.f32.mrb[31].mxu1 }
 0x384   : > { %9669 = vst [vmem:[#allocation38_spill] sm:$0xff] %v6435_v4  ;;  %v1446_v17 = vmax.f32 %v1444_v36, %v6435_v4 }
 0x386   : > { %v6438_v6 = vpop.f32.mrb[32].mxu1 }
 0x387   : > { %v1410_v19 = vmax.f32 %v1408_v11, %v6438_v6  ;;  %v6441_v5 = vpop.f32.mrb[33].mxu1 }
 0x388   : > { %9670 = vst [vmem:[#allocation39_spill] sm:$0xff] %v6441_v5  ;;  %v1447_v26 = vmax.f32 %v1445_v13, %v6441_v5 }
 0x38a   : > { %v6444_v8 = vpop.f32.mrb[34].mxu1 }
 0x38b   : > { %v1411_v30 = vmax.f32 %v1409_v15, %v6444_v8  ;;  %v6447_v61 = vpop.f32.mrb[35].mxu1 }
 0x38c   : > { %9671 = vst [vmem:[#allocation40_spill] sm:$0xff] %v6447_v61  ;;  %v1448_v34 = vmax.f32 %v1446_v17, %v6447_v61 }
 0x38e   : > { %v6450_v63 = vpop.f32.mrb[36].mxu1 }
 0x38f   : > { %v1412_v36 = vmax.f32 %v1410_v19, %v6450_v63  ;;  %v6453_v62 = vpop.f32.mrb[37].mxu1 }
 0x390   : > { %9672 = vst [vmem:[#allocation41_spill] sm:$0xff] %v6453_v62  ;;  %v1449_v11 = vmax.f32 %v1447_v26, %v6453_v62 }
 0x392   : > { %v6456_v2 = vpop.f32.mrb[38].mxu1 }
 0x393   : > { %v1413_v13 = vmax.f32 %v1411_v30, %v6456_v2  ;;  %v6459_v55 = vpop.f32.mrb[39].mxu1 }
 0x394   : > { %9673 = vst [vmem:[#allocation42_spill] sm:$0xff] %v6459_v55  ;;  %v1450_v15 = vmax.f32 %v1448_v34, %v6459_v55 }
 0x396   : > { %v6462_v57 = vpop.f32.mrb[40].mxu1 }
 0x397   : > { %v1414_v17 = vmax.f32 %v1412_v36, %v6462_v57  ;;  %v6465_v56 = vpop.f32.mrb[41].mxu1 }
 0x398   : > { %9674 = vst [vmem:[#allocation43_spill] sm:$0xff] %v6465_v56  ;;  %v1451_v19 = vmax.f32 %v1449_v11, %v6465_v56 }
 0x39a   : > { %v6468_v26 = vpop.f32.mrb[42].mxu1 }
 0x39b   : > { %v1415_v30 = vmax.f32 %v1413_v13, %v6468_v26  ;;  %v6471_v51 = vpop.f32.mrb[43].mxu1 }
 0x39c   : > { %9675 = vst [vmem:[#allocation44_spill] sm:$0xff] %v6471_v51  ;;  %v1452_v34 = vmax.f32 %v1450_v15, %v6471_v51 }
 0x39e   : > { %v6474_v36 = vpop.f32.mrb[44].mxu1 }
 0x39f   : > { %v1416_v11 = vmax.f32 %v1414_v17, %v6474_v36  ;;  %v6477_v43 = vpop.f32.mrb[45].mxu1 }
 0x3a0   : > { %9676 = vst [vmem:[#allocation45_spill] sm:$0xff] %v6477_v43  ;;  %v1453_v59 = vmax.f32 %v1451_v19, %v6477_v43 }
 0x3a2   : > { %v6480_v13 = vpop.f32.mrb[46].mxu1 }
 0x3a3   : > { %v1417_v15 = vmax.f32 %v1415_v30, %v6480_v13  ;;  %v6483_v44 = vpop.f32.mrb[47].mxu1 }
 0x3a4   : > { %9677 = vst [vmem:[#allocation46_spill] sm:$0xff] %v6483_v44  ;;  %v1454_v50 = vmax.f32 %v1452_v34, %v6483_v44 }
 0x3a6   : > { %v6486_v17 = vpop.f32.mrb[48].mxu1 }
 0x3a7   : > { %v1418_v19 = vmax.f32 %v1416_v11, %v6486_v17  ;;  %v6489_v37 = vpop.f32.mrb[49].mxu1 }
 0x3a8   : > { %9678 = vst [vmem:[#allocation47_spill] sm:$0xff] %v6489_v37  ;;  %v1455_v45 = vmax.f32 %v1453_v59, %v6489_v37  ;;  %v9681_v59 = vmov 0.0  }
 0x3a9   : > { %786 = vmatprep.mubr.f32.mxu0 %v9681_v59 }
 0x3aa   : > { %v6492_v39 = vpop.f32.mrb[50].mxu1 }
 0x3ab   : > { %v1419_v30 = vmax.f32 %v1417_v15, %v6492_v39  ;;  %v6495_v49 = vpop.f32.mrb[51].mxu1 }
 0x3ac   : > { %9679 = vst [vmem:[#allocation48_spill] sm:$0xff] %v6495_v49  ;;  %v1456_v34 = vmax.f32 %v1454_v50, %v6495_v49  ;;  %v337_v50 = vpop.trf.xlu0 }
 0x3ad   : > { %4719 = vmatmul.mubr.msk.f32.gmra.mrb[74].mxu0 %vm350_vm1, %v337_v50 }
 0x3ae   : > { %v6498_v38 = vpop.f32.mrb[52].mxu1  ;;  %792 = vmatprep.mubr.f32.mxu0 %v9681_v59 }
 0x3af   : > { %v1420_v47 = vmax.f32 %v1418_v19, %v6498_v38  ;;  %v6501_v41 = vpop.f32.mrb[53].mxu1 }
 0x3b0   : > { %9680 = vst [vmem:[#allocation49_spill] sm:$0xff] %v6501_v41  ;;  %v1457_v11 = vmax.f32 %v1455_v45, %v6501_v41  ;;  %v338_v41 = vpop.trf.xlu0 }
 0x3b1   : > { %4720 = vmatmul.mubr.msk.f32.gmra.mrb[76].mxu0 %vm350_vm1, %v338_v41 }
 0x3b2   : > { %v6506_v37 = vpop.f32.mrb[54].mxu1  ;;  %798 = vmatprep.mubr.f32.mxu0 %v9681_v59 }
 0x3b3   : > { %v1421_v15 = vmax.f32 %v1419_v30, %v6506_v37  ;;  %v6509_v44 = vpop.f32.mrb[55].mxu1 }
 0x3b4   : > { %9682 = vst [vmem:[#allocation50_spill] sm:$0xff] %v6509_v44  ;;  %v1458_v49 = vmax.f32 %v1456_v34, %v6509_v44  ;;  %v339_v44 = vpop.trf.xlu0 }
 0x3b5   : > { %4721 = vmatmul.mubr.msk.f32.gmra.mrb[78].mxu0 %vm350_vm1, %v339_v44 }
 0x3b6   : > { %v6514_v19 = vpop.f32.mrb[56].mxu1  ;;  %804 = vmatprep.mubr.f32.mxu0 %v9681_v59 }
 0x3b7   : > { %v1422_v45 = vmax.f32 %v1420_v47, %v6514_v19  ;;  %v6517_v53 = vpop.f32.mrb[57].mxu1 }
 0x3b8   : > { %9683 = vst [vmem:[#allocation51_spill] sm:$0xff] %v6517_v53  ;;  %v1459_v43 = vmax.f32 %v1457_v11, %v6517_v53  ;;  %v340_v53 = vpop.trf.xlu0 }
 0x3b9   : > { %4722 = vmatmul.mubr.msk.f32.gmra.mrb[80].mxu0 %vm350_vm1, %v340_v53 }
 0x3ba   : > { %v6522_v30 = vpop.f32.mrb[58].mxu1  ;;  %810 = vmatprep.mubr.f32.mxu0 %v9681_v59 }
 0x3bb   : > { %v1423_v34 = vmax.f32 %v1421_v15, %v6522_v30  ;;  %v6525_v50 = vpop.f32.mrb[59].mxu1 }
 0x3bc   : > { %9684 = vst [vmem:[#allocation52_spill] sm:$0xff] %v6525_v50  ;;  %v1460_v51 = vmax.f32 %v1458_v49, %v6525_v50  ;;  %v341_v50 = vpop.trf.xlu0 }
 0x3bd   : > { %4723 = vmatmul.mubr.msk.f32.gmra.mrb[82].mxu0 %vm350_vm1, %v341_v50 }
 0x3be   : > { %v6530_v47 = vpop.f32.mrb[60].mxu1  ;;  %816 = vmatprep.mubr.f32.mxu0 %v9681_v59 }
 0x3bf   : > { %v1424_v11 = vmax.f32 %v1422_v45, %v6530_v47  ;;  %v6533_v41 = vpop.f32.mrb[61].mxu1 }
 0x3c0   : > { %9685 = vst [vmem:[#allocation53_spill] sm:$0xff] %v6533_v41  ;;  %v1461_v56 = vmax.f32 %v1459_v43, %v6533_v41  ;;  %v342_v41 = vpop.trf.xlu0 }
 0x3c1   : > { %4724 = vmatmul.mubr.msk.f32.gmra.mrb[84].mxu0 %vm350_vm1, %v342_v41 }
 0x3c2   : > { %v6538_v15 = vpop.f32.mrb[62].mxu1  ;;  %822 = vmatprep.mubr.f32.mxu0 %v9681_v59 }
 0x3c3   : > { %v1425_v49 = vmax.f32 %v1423_v34, %v6538_v15  ;;  %v6541_v44 = vpop.f32.mrb[63].mxu1 }
 0x3c4   : > { %9686 = vst [vmem:[#allocation54_spill] sm:$0xff] %v6541_v44  ;;  %v1462_v55 = vmax.f32 %v1460_v51, %v6541_v44  ;;  %v343_v4 = vpop.trf.xlu0 }
 0x3c5   : > { %v1426_v45 = vmax.f32 %v1424_v11, %v1425_v49  ;;  %4725 = vmatmul.mubr.msk.f32.gmra.mrb[86].mxu0 %vm350_vm1, %v343_v4 }
 0x3c6   : > { %v1463_v62 = vmax.f32 %v1461_v56, %v1462_v55  ;;  %828 = vmatprep.mubr.f32.mxu0 %v9681_v59 }
 0x3c7   : > { %v1427_v43 = vrot.slane %v1426_v45, 4 }
 0x3c8   : > { %v1464_v53 = vrot.slane %v1463_v62, 4  ;;  %v344_v55 = vpop.trf.xlu0 }
 0x3c9   : > { %v1428_v61 = vmax.f32 %v1426_v45, %v1427_v43  ;;  %4726 = vmatmul.mubr.msk.f32.gmra.mrb[88].mxu0 %vm350_vm1, %v344_v55  ;;  %v734_v45 = vpop.f32.mrb[56].mxu0 }
 0x3ca   : > { %v1465_v34 = vmax.f32 %v1463_v62, %v1464_v53  ;;  %834 = vmatprep.mubr.f32.mxu0 %v9681_v59  ;;  %3619 = vxpose.xlu1.b32.start [1/4] (short) %v734_v45, 128 }
 0x3cb   : > { %v1429_v5 = vrot.slane %v1428_v61, 2 }
 0x3cc   : > { %v1466_v42 = vrot.slane %v1465_v34, 2 }
 0x3cd   : > { %v1430_v51 = vmax.f32 %v1428_v61, %v1429_v5  ;;  %v345_v5 = vpop.trf.xlu0 }
 0x3ce   : > { %v1467_v50 = vmax.f32 %v1465_v34, %v1466_v42  ;;  %v736_v34 = vpop.f32.mrb[57].mxu0  ;;  %4727 = vmatmul.mubr.msk.f32.gmra.mrb[90].mxu0 %vm350_vm1, %v345_v5 }
 0x3cf   : > { %v1431_v11 = vrot.slane %v1430_v51, 1  ;;  %840 = vmatprep.mubr.f32.mxu0 %v9681_v59 }
 0x3d0   : > { %v1468_v56 = vrot.slane %v1467_v50, 1 }
 0x3d1   : > { %v6551_v49 = vmax.f32 %v1430_v51, %v1431_v11  ;;  %v740_v51 = vpop.f32.mrb[58].mxu0  ;;  %v346_v11 = vpop.trf.xlu0  ;;  %3651 = vxpose.xlu0.b32.start [1/4] (short) %v736_v34, 128 }
 0x3d2   : > { %v6554_v41 = vmax.f32 %v1467_v50, %v1468_v56  ;;  %4728 = vmatmul.mubr.msk.f32.gmra.mrb[92].mxu0 %vm350_vm1, %v346_v11  ;;  %3620 = vxpose.xlu1.b32.cont [2/4] (short) %v740_v51, 128 }
 0x3d3   : > { %v1470_v62 = vsub.f32 %v6342_v21, %v6551_v49  ;;  %v1472_v61 = vsub.f32 %v6346_v23, %v6551_v49  ;;  %v1474_v42 = vsub.f32 %v6350_v25, %v6551_v49  ;;  %v1476_v4 = vsub.f32 %v6358_v29, %v6551_v49  ;;  %846 = vmatprep.mubr.f32.mxu0 %v9681_v59 }
 0x3d4   : > { %v1478_v43 = vsub.f32 %v6366_v33, %v6551_v49  ;;  %v1480_v53 = vsub.f32 %v6372_v10, %v6551_v49  ;;  %v1482_v21 = vsub.f32 %v6378_v14, %v6551_v49  ;;  %v1484_v23 = vsub.f32 %v6384_v18, %v6551_v49 }
 0x3d5   : > { %v1486_v25 = vsub.f32 %v6390_v28, %v6551_v49  ;;  %v1488_v29 = vsub.f32 %v6396_v7, %v6551_v49  ;;  %v1490_v33 = vsub.f32 %v6402_v1, %v6551_v49  ;;  %v1492_v10 = vsub.f32 %v6408_v58, %v6551_v49  ;;  %v742_v1 = vpop.f32.mrb[59].mxu0 }
 0x3d6   : > { %v1494_v14 = vsub.f32 %v6414_v52, %v6551_v49  ;;  %v1496_v18 = vsub.f32 %v6420_v46, %v6551_v49  ;;  %v1498_v28 = vsub.f32 %v6426_v40, %v6551_v49  ;;  %v1500_v7 = vsub.f32 %v6432_v0, %v6551_v49  ;;  %v746_v40 = vpop.f32.mrb[60].mxu0  ;;  %3652 = vxpose.xlu0.b32.cont [2/4] (short) %v742_v1, 128 }
 0x3d7   : > { %v1502_v58 = vsub.f32 %v6438_v6, %v6551_v49  ;;  %v1504_v50 = vsub.f32 %v6444_v8, %v6551_v49  ;;  %v1506_v52 = vsub.f32 %v6450_v63, %v6551_v49  ;;  %v1508_v46 = vsub.f32 %v6456_v2, %v6551_v49  ;;  %v748_v56 = vpop.f32.mrb[61].mxu0  ;;  %3621 = vxpose.xlu1.b32.cont [3/4] (short) %v746_v40, 128 }
 0x3d8   : > { %v1510_v0 = vsub.f32 %v6462_v57, %v6551_v49  ;;  %v1512_v55 = vsub.f32 %v6468_v26, %v6551_v49  ;;  %v1514_v6 = vsub.f32 %v6474_v36, %v6551_v49  ;;  %v1516_v8 = vsub.f32 %v6480_v13, %v6551_v49  ;;  %v752_v5 = vpop.f32.mrb[62].mxu0 }
 0x3d9   : > { %v754_v11 = vpop.f32.mrb[63].mxu0  ;;  %v1534_v57 = vmul.f32 1.442695, %v1470_v62  ;;  %v1538_v2 = vmul.f32 1.442695, %v1472_v61 }
 0x3da   : > { %v1542_v26 = vmul.f32 1.442695, %v1474_v42  ;;  %v1546_v59 = vmul.f32 1.442695, %v1476_v4  ;;  %v1550_v13 = vmul.f32 1.442695, %v1478_v43  ;;  %3653 = vxpose.xlu0.b32.cont [3/4] (short) %v748_v56, 128 }
 0x3db   : > { %5264 = vpow2.f32 %v1534_v57  ;;  %v1554_v45 = vmul.f32 1.442695, %v1480_v53  ;;  %v1558_v34 = vmul.f32 1.442695, %v1482_v21  ;;  %v1562_v62 = vmul.f32 1.442695, %v1484_v23  ;;  %3622 = vxpose.xlu1.b32.end [4/4] (short) %v752_v5, 128 }
 0x3dc   : > { %5266 = vpow2.f32 %v1538_v2  ;;  %v1566_v61 = vmul.f32 1.442695, %v1486_v25  ;;  %v1570_v42 = vmul.f32 1.442695, %v1488_v29  ;;  %v1574_v51 = vmul.f32 1.442695, %v1490_v33 }
 0x3dd   : > { %5268 = vpow2.f32 %v1542_v26  ;;  %v1578_v63 = vmul.f32 1.442695, %v1492_v10  ;;  %v1582_v1 = vmul.f32 1.442695, %v1494_v14  ;;  %v1586_v4 = vmul.f32 1.442695, %v1496_v18 }
 0x3de   : > { %5270 = vpow2.f32 %v1546_v59  ;;  %v1590_v22 = vmul.f32 1.442695, %v1498_v28  ;;  %v1594_v36 = vmul.f32 1.442695, %v1500_v7  ;;  %v1598_v43 = vmul.f32 1.442695, %v1502_v58  ;;  %3654 = vxpose.xlu0.b32.end [4/4] (short) %v754_v11, 128 }
 0x3df   : > { %5272 = vpow2.f32 %v1550_v13  ;;  %v1602_v53 = vmul.f32 1.442695, %v1504_v50  ;;  %v6628_v40 = vmul.f32 1.442695, %v1506_v52  ;;  %v6630_v59 = vmul.f32 1.442695, %v1508_v46 }
 0x3e0   : > { %5274 = vpow2.f32 %v1554_v45  ;;  %v6632_v21 = vmul.f32 1.442695, %v1510_v0  ;;  %v6634_v23 = vmul.f32 1.442695, %v1512_v55  ;;  %v6636_v25 = vmul.f32 1.442695, %v1514_v6 }
 0x3e1   : > { %5276 = vpow2.f32 %v1558_v34  ;;  %v6638_v29 = vmul.f32 1.442695, %v1516_v8  ;;  %v6642_v10 = vpop.f32.mrb[64].mxu0  ;;  %v9691_v34 = vld [vmem:[#allocation37_spill] sm:$0xff]  ;;  %v9699_v46 = vld [vmem:[#allocation43_spill] sm:$0xff]  ;;  %v9707_v14 = vld [vmem:[#allocation50_spill] sm:$0xff] }
 0x3e2   : > { %5278 = vpow2.f32 %v1562_v62  ;;  %9687 = vst [vmem:[#allocation55_spill] sm:$0xff] %v6642_v10  ;;  %v760_v7 = vpop.f32.mrb[65].mxu0  ;;  %v9692_v62 = vld [vmem:[#allocation38_spill] sm:$0xff]  ;;  %v9702_v28 = vld [vmem:[#allocation45_spill] sm:$0xff]  ;;  %v9704_v52 = vld [vmem:[#allocation47_spill] sm:$0xff] }
 0x3e3   : > { %5280 = vpow2.f32 %v1566_v61  ;;  %1800 = vmatprep.mubr.f32.mxu1 %v760_v7  ;;  %v6658_v0 = vpop.f32.mrb[66].mxu0 }
 0x3e4   : > { %5282 = vpow2.f32 %v1570_v42  ;;  %9688 = vst [vmem:[#allocation56_spill] sm:$0xff] %v6658_v0  ;;  %v6668_v2 = vpop.f32.mrb[67].mxu0  ;;  %v9693_v42 = vld [vmem:[#allocation39_spill] sm:$0xff] }
 0x3e5   : > { %v6650_v58 = vpop.eup %5264  ;;  %5284 = vpow2.f32 %v1574_v51  ;;  %9689 = vst [vmem:[#allocation57_spill] sm:$0xff] %v6668_v2  ;;  %v6678_v13 = vpop.f32.mrb[68].mxu0  ;;  %v9698_v51 = vld [vmem:[#allocation42_spill] sm:$0xff]  ;;  %v9712_v2 = vsub.f32 %v6492_v39, %v6551_v49 }
 0x3e6   : > { %v6660_v55 = vpop.eup %5266  ;;  %5286 = vpow2.f32 %v1578_v63  ;;  %9690 = vst [vmem:[#allocation58_spill] sm:$0xff] %v6678_v13  ;;  %v9695_v63 = vld [vmem:[#allocation40_spill] sm:$0xff] }
 0x3e7   : > { %v6670_v57 = vpop.eup %5268  ;;  %5288 = vpow2.f32 %v1582_v1  ;;  %v1662_v26 = vadd.f32 %v6660_v55, %v6650_v58  ;;  %v6688_v1 = vpop.f32.mrb[69].mxu0  ;;  %v1634_v33 = vmul.f32 1.442695, %v9712_v2 }
 0x3e8   : > { %v6680_v45 = vpop.eup %5270  ;;  %5290 = vpow2.f32 %v1586_v4  ;;  %9694 = vst [vmem:[#allocation37_spill] sm:$0xff] %v6688_v1  ;;  %v9696_v4 = vld [vmem:[#allocation41_spill] sm:$0xff]  ;;  %v6697_v11 = vpop.f32.mrb[70].mxu0  ;;  %v9711_v1 = vsub.f32 %v6486_v17, %v6551_v49 }
 0x3e9   : > { %v6690_v7 = vpop.eup %5272  ;;  %5292 = vpow2.f32 %v1590_v22  ;;  %v1663_v5 = vadd.f32 %v6670_v57, %v1662_v26  ;;  %9697 = vst [vmem:[#allocation38_spill] sm:$0xff] %v6697_v11  ;;  %v9700_v22 = vld [vmem:[#allocation44_spill] sm:$0xff]  ;;  %v6707_v50 = vpop.f32.mrb[71].mxu0 }
 0x3ea   : > { %v6699_v6 = vpop.eup %5274  ;;  %5294 = vpow2.f32 %v1594_v36  ;;  %9701 = vst [vmem:[#allocation39_spill] sm:$0xff] %v6707_v50  ;;  %v9703_v36 = vld [vmem:[#allocation46_spill] sm:$0xff]  ;;  %v9705_v26 = vld [vmem:[#allocation48_spill] sm:$0xff]  ;;  %v9706_v50 = vld [vmem:[#allocation49_spill] sm:$0xff]  ;;  %v1630_v18 = vmul.f32 1.442695, %v9711_v1 }
 0x3eb   : > { %v6709_v56 = vpop.eup %5276  ;;  %5296 = vpow2.f32 %v1598_v43  ;;  %v1664_v8 = vadd.f32 %v6680_v45, %v1663_v5 }
 0x3ec   : > { %v6716_v61 = vpop.eup %5278  ;;  %5298 = vpow2.f32 %v1602_v53  ;;  %v9708_v53 = vld [vmem:[#allocation51_spill] sm:$0xff] }
 0x3ed   : > { %v6724_v13 = vpop.eup %5280  ;;  %5300 = vpow2.f32 %v6628_v40  ;;  %v1665_v5 = vadd.f32 %v6690_v7, %v1664_v8 }
 0x3ee   : > { %v6732_v0 = vpop.eup %5282  ;;  %5302 = vpow2.f32 %v6630_v59 }
 0x3ef   : > { %v6741_v8 = vpop.eup %5284  ;;  %5304 = vpow2.f32 %v6632_v21  ;;  %v1666_v10 = vadd.f32 %v6699_v6, %v1665_v5  ;;  %v9713_v21 = vsub.f32 %v6498_v38, %v6551_v49 }
 0x3f0   : > { %v6748_v59 = vpop.eup %5286  ;;  %5306 = vpow2.f32 %v6634_v23  ;;  %v9714_v23 = vsub.f32 %v6506_v37, %v6551_v49  ;;  %v9718_v37 = vsub.f32 %v6530_v47, %v6551_v49 }
 0x3f1   : > { %v6754_v43 = vpop.eup %5288  ;;  %5308 = vpow2.f32 %v6636_v25  ;;  %v1638_v40 = vmul.f32 1.442695, %v9713_v21  ;;  %v1667_v17 = vadd.f32 %v6709_v56, %v1666_v10  ;;  %v9715_v25 = vsub.f32 %v6514_v19, %v6551_v49 }
 0x3f2   : > { %v6761_v1 = vpop.eup %5290  ;;  %5310 = vpow2.f32 %v6638_v29  ;;  %v1642_v5 = vmul.f32 1.442695, %v9714_v23  ;;  %v9716_v10 = vsub.f32 %v6522_v30, %v6551_v49 }
 0x3f3   : > { %v6767_v39 = vpop.eup %5292  ;;  %5312 = vpow2.f32 %v1630_v18  ;;  %v1646_v2 = vmul.f32 1.442695, %v9715_v25  ;;  %v1668_v38 = vadd.f32 %v6716_v61, %v1667_v17  ;;  %v1654_v18 = vmul.f32 1.442695, %v9718_v37 }
 0x3f4   : > { %v6773_v21 = vpop.eup %5294  ;;  %5314 = vpow2.f32 %v1634_v33  ;;  %v1650_v29 = vmul.f32 1.442695, %v9716_v10  ;;  %v9719_v17 = vsub.f32 %v6538_v15, %v6551_v49  ;;  %v9720_v10 = vld [vmem:[#allocation36_spill] sm:$0xff]  ;;  %v9723_v15 = vsub.f32 %v6354_v27, %v6554_v41 }
 0x3f5   : > { %v6778_v44 = vpop.eup %5296  ;;  %5316 = vpow2.f32 %v1638_v40  ;;  %v1669_v23 = vadd.f32 %v6724_v13, %v1668_v38  ;;  %v9721_v40 = vsub.f32 %v9720_v10, %v6554_v41  ;;  %v9722_v38 = vsub.f32 %v6348_v24, %v6554_v41 }
 0x3f6   : > { %9717 = vst [vmem:[#allocation40_spill] sm:$0xff] %v6778_v44  ;;  %v6784_v19 = vpop.eup %5298  ;;  %5318 = vpow2.f32 %v1642_v5  ;;  %v1658_v33 = vmul.f32 1.442695, %v9719_v17  ;;  %v1544_v49 = vmul.f32 1.442695, %v9723_v15  ;;  %v9726_v24 = vsub.f32 %v6375_v12, %v6554_v41 }
 0x3f7   : > { %v6789_v25 = vpop.eup %5300  ;;  %5320 = vpow2.f32 %v1646_v2  ;;  %v1670_v30 = vadd.f32 %v6732_v0, %v1669_v23  ;;  %v1536_v11 = vmul.f32 1.442695, %v9721_v40  ;;  %v1540_v5 = vmul.f32 1.442695, %v9722_v38 }
 0x3f8   : > { %v6795_v47 = vpop.eup %5302  ;;  %5322 = vpow2.f32 %v1650_v29  ;;  %v9724_v23 = vsub.f32 %v6362_v31, %v6554_v41  ;;  %v9725_v29 = vsub.f32 %v6369_v35, %v6554_v41  ;;  %v1556_v27 = vmul.f32 1.442695, %v9726_v24 }
 0x3f9   : > { %v6803_v37 = vpop.eup %5304  ;;  %5324 = vpow2.f32 %v1654_v18  ;;  %v1671_v2 = vadd.f32 %v6741_v8, %v1670_v30  ;;  %v9727_v18 = vsub.f32 %v6381_v16, %v6554_v41  ;;  %v9728_v30 = vsub.f32 %v6387_v20, %v6554_v41 }
 0x3fa   : > { %v1548_v17 = vmul.f32 1.442695, %v9724_v23  ;;  %v1552_v10 = vmul.f32 1.442695, %v9725_v29  ;;  %v6812_v40 = vpop.eup %5306  ;;  %5326 = vpow2.f32 %v1658_v33  ;;  %v9729_v33 = vsub.f32 %v6393_v32, %v6554_v41 }
 0x3fb   : > { %v1560_v38 = vmul.f32 1.442695, %v9727_v18  ;;  %v1564_v31 = vmul.f32 1.442695, %v9728_v30  ;;  %v6823_v15 = vpop.eup %5308  ;;  %v1672_v35 = vadd.f32 %v6748_v59, %v1671_v2  ;;  %5328 = vpow2.f32 %v1536_v11 }
 0x3fc   : > { %v1568_v23 = vmul.f32 1.442695, %v9729_v33  ;;  %v9730_v12 = vsub.f32 %v6399_v9, %v6554_v41  ;;  %v6832_v24 = vpop.eup %5310  ;;  %5330 = vpow2.f32 %v1540_v5 }
 0x3fd   : > { %v6840_v2 = vpop.eup %5312  ;;  %v1673_v32 = vadd.f32 %v6754_v43, %v1672_v35  ;;  %5332 = vpow2.f32 %v1544_v49 }
 0x3fe   : > { %v1572_v29 = vmul.f32 1.442695, %v9730_v12  ;;  %v6847_v18 = vpop.eup %5314  ;;  %5334 = vpow2.f32 %v1548_v17  ;;  %v9731_v17 = vsub.f32 %v6405_v3, %v6554_v41  ;;  %v9732_v12 = vsub.f32 %v6411_v60, %v6554_v41 }
 0x3ff   : > { %v6855_v35 = vpop.eup %5316  ;;  %v1674_v49 = vadd.f32 %v6761_v1, %v1673_v32  ;;  %5336 = vpow2.f32 %v1552_v10 }
 0x400   : > { %v6862_v9 = vpop.eup %5318  ;;  %5338 = vpow2.f32 %v1556_v27  ;;  %v1576_v5 = vmul.f32 1.442695, %v9731_v17  ;;  %v1580_v33 = vmul.f32 1.442695, %v9732_v12 }
 0x401   : > { %v6870_v32 = vpop.eup %5320  ;;  %v1675_v10 = vadd.f32 %v6767_v39, %v1674_v49  ;;  %5340 = vpow2.f32 %v1560_v38  ;;  %v9733_v38 = vsub.f32 %v6417_v54, %v6554_v41  ;;  %v9738_v54 = vsub.f32 %v9695_v63, %v6554_v41 }
 0x402   : > { %v6878_v11 = vpop.eup %5322  ;;  %5342 = vpow2.f32 %v1564_v31  ;;  %v9734_v31 = vsub.f32 %v6423_v48, %v6554_v41  ;;  %v9737_v48 = vsub.f32 %v9693_v42, %v6554_v41  ;;  %v9741_v63 = vsub.f32 %v9699_v46, %v6554_v41 }
 0x403   : > { %v6883_v30 = vpop.eup %5324  ;;  %v1676_v20 = vadd.f32 %v6773_v21, %v1675_v10  ;;  %5344 = vpow2.f32 %v1568_v23  ;;  %v1584_v3 = vmul.f32 1.442695, %v9733_v38  ;;  %v9735_v23 = vsub.f32 %v9691_v34, %v6554_v41 }
 0x404   : > { %v6891_v17 = vpop.eup %5326  ;;  %5346 = vpow2.f32 %v1572_v29  ;;  %v1588_v60 = vmul.f32 1.442695, %v9734_v31  ;;  %v9736_v29 = vsub.f32 %v9692_v62, %v6554_v41  ;;  %v1600_v31 = vmul.f32 1.442695, %v9737_v48 }
 0x405   : > { %v5329_v12 = vpop.eup %5328  ;;  %v1677_v27 = vadd.f32 %v6778_v44, %v1676_v20  ;;  %5348 = vpow2.f32 %v1576_v5  ;;  %v1592_v10 = vmul.f32 1.442695, %v9735_v23  ;;  %v9739_v62 = vsub.f32 %v9696_v4, %v6554_v41 }
 0x406   : > { %v5331_v38 = vpop.eup %5330  ;;  %5350 = vpow2.f32 %v1580_v33  ;;  %v1596_v49 = vmul.f32 1.442695, %v9736_v29  ;;  %v1604_v33 = vmul.f32 1.442695, %v9738_v54  ;;  %v1616_v54 = vmul.f32 1.442695, %v9741_v63 }
 0x407   : > { %v5333_v16 = vpop.eup %5332  ;;  %v1678_v20 = vadd.f32 %v6784_v19, %v1677_v27  ;;  %5352 = vpow2.f32 %v1584_v3  ;;  %v1699_v5 = vadd.f32 %v5331_v38, %v5329_v12  ;;  %v4873_v34 = vpack.c.bf16 %v5331_v38, %v5329_v12 }
 0x408   : > { %v5335_v23 = vpop.eup %5334  ;;  %5354 = vpow2.f32 %v1588_v60  ;;  %v1608_v29 = vmul.f32 1.442695, %v9739_v62  ;;  %v9740_v60 = vsub.f32 %v9698_v51, %v6554_v41  ;;  %v9742_v4 = vpack.c.bf16 %v6660_v55, %v6650_v58 }
 0x409   : > { %v5337_v44 = vpop.eup %5336  ;;  %v1679_v42 = vadd.f32 %v6789_v25, %v1678_v20  ;;  %5356 = vpow2.f32 %v1592_v10  ;;  %v1700_v48 = vadd.f32 %v5333_v16, %v1699_v5  ;;  %4874 = vmatprep.subr.bf16.mxu1 %v4873_v34  ;;  %v4877_v27 = vpack.c.bf16 %v5335_v23, %v5333_v16 }
 0x40a   : > { %v5339_v3 = vpop.eup %5338  ;;  %5358 = vpow2.f32 %v1596_v49  ;;  %v1612_v12 = vmul.f32 1.442695, %v9740_v60  ;;  %4876 = vmatpush1.bf16.msra.mxu1 %v9742_v4  ;;  %v9743_v51 = vsub.f32 %v9700_v22, %v6554_v41  ;;  %v9744_v46 = vsub.f32 %v9702_v28, %v6554_v41 }
 0x40b   : > { %v5341_v38 = vpop.eup %5340  ;;  %v1680_v10 = vadd.f32 %v6795_v47, %v1679_v42  ;;  %5360 = vpow2.f32 %v1600_v31  ;;  %v1701_v20 = vadd.f32 %v5335_v23, %v1700_v48  ;;  %4878 = vmatprep.subr.bf16.mxu1 %v4877_v27  ;;  %v4881_v16 = vpack.c.bf16 %v5339_v3, %v5337_v44 }
 0x40c   : > { %v5343_v49 = vpop.eup %5342  ;;  %5362 = vpow2.f32 %v1604_v33  ;;  %v1620_v5 = vmul.f32 1.442695, %v9743_v51  ;;  %v1624_v34 = vmul.f32 1.442695, %v9744_v46  ;;  %v9745_v23 = vsub.f32 %v9703_v36, %v6554_v41 }
 0x40d   : > { %v5345_v62 = vpop.eup %5344  ;;  %v1681_v58 = vadd.f32 %v6803_v37, %v1680_v10  ;;  %5364 = vpow2.f32 %v1608_v29  ;;  %v1702_v55 = vadd.f32 %v5337_v44, %v1701_v20  ;;  %v4885_v42 = vpack.c.bf16 %v5343_v49, %v5341_v38 }
 0x40e   : > { %v5347_v31 = vpop.eup %5346  ;;  %5366 = vpow2.f32 %v1612_v12  ;;  %v1628_v33 = vmul.f32 1.442695, %v9745_v23  ;;  %v9746_v22 = vsub.f32 %v9704_v52, %v6554_v41  ;;  %v9747_v28 = vpack.c.bf16 %v6680_v45, %v6670_v57 }
 0x40f   : > { %v5349_v27 = vpop.eup %5348  ;;  %v1682_v60 = vadd.f32 %v6812_v40, %v1681_v58  ;;  %5368 = vpow2.f32 %v1616_v54  ;;  %v1703_v44 = vadd.f32 %v5339_v3, %v1702_v55  ;;  %v4889_v29 = vpack.c.bf16 %v5347_v31, %v5345_v62  ;;  %v347_v54 = vpop.trf.xlu0 }
 0x410   : > { %v1632_v48 = vmul.f32 1.442695, %v9746_v22  ;;  %4880 = vmatpush1.bf16.msra.mxu1 %v9747_v28  ;;  %v5351_v12 = vpop.eup %5350  ;;  %5370 = vpow2.f32 %v1620_v5  ;;  %v9748_v36 = vsub.f32 %v9705_v26, %v6554_v41  ;;  %v9749_v52 = vsub.f32 %v9706_v50, %v6554_v41  ;;  %4729 = vmatmul.mubr.msk.f32.gmra.mrb[94].mxu0 %vm350_vm1, %v347_v54 }
 0x411   : > { %4882 = vmatprep.subr.bf16.mxu1 %v4881_v16  ;;  %v5353_v10 = vpop.eup %5352  ;;  %v1683_v57 = vadd.f32 %v6823_v15, %v1682_v60  ;;  %5372 = vpow2.f32 %v1624_v34  ;;  %v1704_v45 = vadd.f32 %v5341_v38, %v1703_v44  ;;  %v4893_v20 = vpack.c.bf16 %v5351_v12, %v5349_v27 }
 0x412   : > { %v1636_v63 = vmul.f32 1.442695, %v9748_v36  ;;  %v1640_v4 = vmul.f32 1.442695, %v9749_v52  ;;  %v5355_v3 = vpop.eup %5354  ;;  %5374 = vpow2.f32 %v1628_v33  ;;  %v9750_v16 = vsub.f32 %v9707_v14, %v6554_v41  ;;  %v9753_v14 = vld [vmem:[#allocation52_spill] sm:$0xff]  ;;  %v9755_v33 = vld [vmem:[#allocation53_spill] sm:$0xff] }
 0x413   : > { %v9751_v26 = vsub.f32 %v9708_v53, %v6554_v41  ;;  %v9752_v50 = vpack.c.bf16 %v6699_v6, %v6690_v7  ;;  %v5357_v46 = vpop.eup %5356  ;;  %v1684_v38 = vadd.f32 %v6832_v24, %v1683_v57  ;;  %5376 = vpow2.f32 %v1632_v48 }
 0x414   : > { %v1644_v51 = vmul.f32 1.442695, %v9750_v16  ;;  %v1705_v34 = vadd.f32 %v5343_v49, %v1704_v45  ;;  %v4897_v58 = vpack.c.bf16 %v5355_v3, %v5353_v10  ;;  %v5359_v55 = vpop.eup %5358  ;;  %5378 = vpow2.f32 %v1636_v63  ;;  %v9757_v49 = vld [vmem:[#allocation54_spill] sm:$0xff] }
 0x415   : > { %v1648_v5 = vmul.f32 1.442695, %v9751_v26  ;;  %4884 = vmatpush1.bf16.msra.mxu1 %v9752_v50  ;;  %v9754_v23 = vsub.f32 %v9753_v14, %v6554_v41  ;;  %v9756_v22 = vsub.f32 %v9755_v33, %v6554_v41  ;;  %v5361_v7 = vpop.eup %5360  ;;  %v1685_v28 = vadd.f32 %v6840_v2, %v1684_v38 }
 0x416   : > { %4886 = vmatprep.subr.bf16.mxu1 %v4885_v42  ;;  %5380 = vpow2.f32 %v1640_v4  ;;  %v1706_v60 = vadd.f32 %v5345_v62, %v1705_v34  ;;  %v4901_v44 = vpack.c.bf16 %v5359_v55, %v5357_v46  ;;  %v5363_v48 = vpop.eup %5362  ;;  %v9758_v42 = vsub.f32 %v9757_v49, %v6554_v41 }
 0x417   : > { %v1652_v53 = vmul.f32 1.442695, %v9754_v23  ;;  %v1656_v6 = vmul.f32 1.442695, %v9756_v22  ;;  %5382 = vpow2.f32 %v1644_v51  ;;  %v9759_v63 = vpack.c.bf16 %v6716_v61, %v6709_v56  ;;  %v5365_v52 = vpop.eup %5364 }
 0x418   : > { %v1660_v36 = vmul.f32 1.442695, %v9758_v42  ;;  %v1686_v57 = vadd.f32 %v6847_v18, %v1685_v28  ;;  %5384 = vpow2.f32 %v1648_v5  ;;  %v1707_v45 = vadd.f32 %v5347_v31, %v1706_v60  ;;  %v5367_v4 = vpop.eup %5366 }
 0x419   : > { %4888 = vmatpush1.bf16.msra.mxu1 %v9759_v63  ;;  %v4905_v54 = vpack.c.bf16 %v5363_v48, %v5361_v7  ;;  %5386 = vpow2.f32 %v1652_v53  ;;  %v5369_v62 = vpop.eup %5368  ;;  %v4909_v41 = vpack.c.bf16 %v5367_v4, %v5365_v52  ;;  %v9760_v56 = vpack.c.bf16 %v6732_v0, %v6724_v13 }
 0x41a   : > { %4890 = vmatprep.subr.bf16.mxu1 %v4889_v29  ;;  %v1687_v16 = vadd.f32 %v6855_v35, %v1686_v57  ;;  %5388 = vpow2.f32 %v1656_v6  ;;  %v1708_v51 = vadd.f32 %v5349_v27, %v1707_v45  ;;  %v5371_v26 = vpop.eup %5370  ;;  %v9761_v53 = vpack.c.bf16 %v6748_v59, %v6741_v8 }
 0x41b   : > { %5390 = vpow2.f32 %v1660_v36  ;;  %v5373_v61 = vpop.eup %5372  ;;  %v4913_v29 = vpack.c.bf16 %v5371_v26, %v5369_v62  ;;  %v9763_v57 = vpack.c.bf16 %v6773_v21, %v6767_v39  ;;  %v9767_v39 = vpack.c.bf16 %v6812_v40, %v6803_v37 }
 0x41c   : > { %v1688_v5 = vadd.f32 %v6862_v9, %v1687_v16  ;;  %v1709_v31 = vadd.f32 %v5351_v12, %v1708_v51  ;;  %v5375_v50 = vpop.eup %5374  ;;  %v9770_v37 = vpack.c.bf16 %v6862_v9, %v6855_v35  ;;  %v9776_v35 = vld [vmem:[#allocation55_spill] sm:$0xff] }
 0x41d   : > { %4892 = vmatpush1.bf16.msra.mxu1 %v9760_v56  ;;  %v5377_v38 = vpop.eup %5376  ;;  %v4917_v23 = vpack.c.bf16 %v5375_v50, %v5373_v61  ;;  %v9773_v56 = vld [vmem:[#allocation15_spill] sm:$0xff] }
 0x41e   : > { %4894 = vmatprep.subr.bf16.mxu1 %v4893_v20  ;;  %v1689_v34 = vadd.f32 %v6870_v32, %v1688_v5  ;;  %v1710_v14 = vadd.f32 %v5353_v10, %v1709_v31  ;;  %v5379_v27 = vpop.eup %5378  ;;  %v9762_v10 = vpack.c.bf16 %v6761_v1, %v6754_v43  ;;  %v9764_v43 = vld [vmem:[#allocation40_spill] sm:$0xff]  ;;  %v9777_v5 = vld [vmem:[#allocation14_spill] sm:$0xff] }
 0x41f   : > { %v4921_v22 = vpack.c.bf16 %v5379_v27, %v5377_v38  ;;  %v9765_v1 = vpack.c.bf16 %v6784_v19, %v9764_v43  ;;  %v9768_v19 = vpack.c.bf16 %v6832_v24, %v6823_v15  ;;  %v9771_v24 = vpack.c.bf16 %v6878_v11, %v6870_v32  ;;  %v9778_v31 = vld [vmem:[#allocation12_spill] sm:$0xff] }
 0x420   : > { %v5381_v33 = vpop.eup %5380  ;;  %v1690_v0 = vadd.f32 %v6878_v11, %v1689_v34  ;;  %v1711_v13 = vadd.f32 %v5355_v3, %v1710_v14  ;;  %v9780_v11 = vld [vmem:[#allocation57_spill] sm:$0xff]  ;;  %v9784_v14 = vld [vmem:[#allocation56_spill] sm:$0xff] }
 0x421   : > { %4896 = vmatpush1.bf16.msra.mxu1 %v9761_v53  ;;  %v5383_v12 = vpop.eup %5382 }
 0x422   : > { %4898 = vmatprep.subr.bf16.mxu1 %v4897_v58  ;;  %v5385_v20 = vpop.eup %5384  ;;  %v1691_v6 = vadd.f32 %v6883_v30, %v1690_v0  ;;  %v1712_v28 = vadd.f32 %v5357_v46, %v1711_v13  ;;  %v4925_v60 = vpack.c.bf16 %v5383_v12, %v5381_v33  ;;  %v9790_v0 = vld [vmem:[#allocation39_spill] sm:$0xff]  ;;  %v9791_v13 = vld [vmem:[#allocation38_spill] sm:$0xff] }
 0x423   : > { %v5387_v49 = vpop.eup %5386 }
 0x424   : > { %v5389_v42 = vpop.eup %5388  ;;  %v6990_v8 = vadd.f32 %v6891_v17, %v1691_v6  ;;  %v1713_v59 = vadd.f32 %v5359_v55, %v1712_v28  ;;  %v4929_v3 = vpack.c.bf16 %v5387_v49, %v5385_v20  ;;  %v9766_v55 = vpack.c.bf16 %v6795_v47, %v6789_v25 }
 0x425   : > { %4900 = vmatpush1.bf16.msra.mxu1 %v9762_v10  ;;  %v5391_v58 = vpop.eup %5390  ;;  %v9769_v25 = vpack.c.bf16 %v6847_v18, %v6840_v2  ;;  %v9772_v18 = vpack.c.bf16 %v6891_v17, %v6883_v30  ;;  %v9785_v30 = vld [vmem:[#allocation18_spill] sm:$0xff]  ;;  %v9786_v17 = vld [vmem:[#allocation16_spill] sm:$0xff]  ;;  %v1907_v10 = vpop.trf.xlu0 }
 0x426   : > { %4902 = vmatprep.subr.bf16.mxu1 %v4901_v44  ;;  %v1714_v36 = vadd.f32 %v5361_v7, %v1713_v59  ;;  %v4933_v63 = vpack.c.bf16 %v5391_v58, %v5389_v42 }
 0x428   : > { %v1715_v46 = vadd.f32 %v5363_v48, %v1714_v36 }
 0x429   : > { %4904 = vmatpush1.bf16.msra.mxu1 %v9763_v57  ;;  %v1908_v59 = vpop.trf.xlu0 }
 0x42a   : > { %4906 = vmatprep.subr.bf16.mxu1 %v4905_v54  ;;  %v1716_v45 = vadd.f32 %v5365_v52, %v1715_v46  ;;  %v1875_v54 = vpop.trf.xlu1 }
 0x42c   : > { %v1717_v16 = vadd.f32 %v5367_v4, %v1716_v45 }
 0x42d   : > { %4908 = vmatpush1.bf16.msra.mxu1 %v9765_v1 }
 0x42e   : > { %4910 = vmatprep.subr.bf16.mxu1 %v4909_v41  ;;  %v1718_v51 = vadd.f32 %v5369_v62, %v1717_v16  ;;  %v1876_v40 = vpop.trf.xlu1 }
 0x430   : > { %v1719_v7 = vadd.f32 %v5371_v26, %v1718_v51 }
 0x431   : > { %4912 = vmatpush1.bf16.msra.mxu1 %v9766_v55 }
 0x432   : > { %4914 = vmatprep.subr.bf16.mxu1 %v4913_v29  ;;  %v1720_v44 = vadd.f32 %v5373_v61, %v1719_v7  ;;  %v1877_v2 = vpop.trf.xlu1  ;;  %v9774_v61 = vld [vmem:[#allocation13_spill] sm:$0xff]  ;;  %v9779_v29 = vpack.c.bf16 %v9777_v5, %v9778_v31 }
 0x433   : > { %v9775_v9 = vpack.c.bf16 %v9773_v56, %v9774_v61 }
 0x434   : > { %v1721_v21 = vadd.f32 %v5375_v50, %v1720_v44  ;;  %v9781_v50 = vld [vmem:[#allocation19_spill] sm:$0xff] }
 0x435   : > { %4916 = vmatpush1.bf16.msra.mxu1 %v9767_v39  ;;  %v7091_v39 = vpop.f32.mrb[72].mxu0 }
 0x436   : > { %4918 = vmatprep.subr.bf16.mxu1 %v4917_v23  ;;  %v1722_v48 = vadd.f32 %v5377_v38, %v1721_v21  ;;  %v1878_v32 = vpop.trf.xlu1  ;;  %v9782_v38 = vld [vmem:[#allocation17_spill] sm:$0xff]  ;;  %v9787_v23 = vpack.c.bf16 %v9785_v30, %v9786_v17  ;;  %9793 = vst [vmem:[#allocation41_spill] sm:$0xff] %v7091_v39  ;;  %v784_v21 = vpop.f32.mrb[73].mxu0 }
 0x437   : > { %v9783_v34 = vpack.c.bf16 %v9781_v50, %v9782_v38  ;;  %2680 = vmatprep.mubr.f32.mxu0 %v784_v21 }
 0x438   : > { %v1723_v52 = vadd.f32 %v5379_v27, %v1722_v48  ;;  %v9788_v27 = vld [vmem:[#allocation37_spill] sm:$0xff] }
 0x439   : > { %4920 = vmatpush1.bf16.msra.mxu1 %v9768_v19 }
 0x43a   : > { %4922 = vmatprep.subr.bf16.mxu1 %v4921_v22  ;;  %v1724_v4 = vadd.f32 %v5381_v33, %v1723_v52  ;;  %v1879_v53 = vpop.trf.xlu1  ;;  %v9789_v33 = vld [vmem:[#allocation58_spill] sm:$0xff]  ;;  %v9792_v22 = vmov 0.0  }
 0x43c   : > { %v1725_v47 = vadd.f32 %v5383_v12, %v1724_v4 }
 0x43d   : > { %4924 = vmatpush1.bf16.msra.mxu1 %v9769_v25 }
 0x43e   : > { %4926 = vmatprep.subr.bf16.mxu1 %v4925_v60  ;;  %v1726_v62 = vadd.f32 %v5385_v20, %v1725_v47  ;;  %v1880_v12 = vpop.trf.xlu1 }
 0x440   : > { %v1727_v41 = vadd.f32 %v5387_v49, %v1726_v62 }
 0x441   : > { %4928 = vmatpush1.bf16.msra.mxu1 %v9770_v37 }
 0x442   : > { %4930 = vmatprep.subr.bf16.mxu1 %v4929_v3  ;;  %v1728_v15 = vadd.f32 %v5389_v42, %v1727_v41  ;;  %v1881_v20 = vpop.trf.xlu1 }
 0x444   : > { %v7016_v26 = vadd.f32 %v5391_v58, %v1728_v15  ;;  %v1909_v58 = vpop.trf.xlu0 }
 0x445   : > { %4932 = vmatpush1.bf16.msra.mxu1 %v9771_v24 }
 0x446   : > { %4934 = vmatprep.subr.bf16.mxu1 %v4933_v63  ;;  %v1882_v6 = vpop.trf.xlu1 }
 0x448   : > { %v1910_v63 = vpop.trf.xlu0 }
 0x449   : > { %4936 = vmatpush1.bf16.msra.mxu1 %v9772_v18 }
 0x44a   : > { %4938 = vmatprep.subr.bf16.mxu1 %v9775_v9  ;;  %v1883_v28 = vpop.trf.xlu1 }
 0x44c   : > { %1801 = vmatmul.mubr.f32.vlgmr.msra.gmra.mrb[64].mxu1 %v9776_v35  ;;  %v1911_v46 = vpop.trf.xlu0 }
 0x44d   : > { %4940 = vmatpush1.bf16.msra.mxu1 %v9779_v29  ;;  %1806 = vmatprep.mubr.f32.mxu1 %v9780_v11 }
 0x44e   : > { %4942 = vmatprep.subr.bf16.mxu1 %v9783_v34  ;;  %v1884_v60 = vpop.trf.xlu1  ;;  %v1693_v34 = vrot.slane %v6990_v8, 4 }
 0x450   : > { %1807 = vmatmul.mubr.f32.gmra.mrb[66].mxu1 %v9784_v14  ;;  %v1912_v43 = vpop.trf.xlu0  ;;  %v1730_v14 = vrot.slane %v7016_v26, 4  ;;  %v1694_v30 = vadd.f32 %v1693_v34, %v6990_v8 }
 0x451   : > { %4944 = vmatpush1.bf16.msra.mxu1 %v9787_v23  ;;  %1812 = vmatprep.mubr.f32.mxu1 %v9788_v27 }
 0x452   : > { %v1885_v49 = vpop.trf.xlu1  ;;  %v1731_v17 = vadd.f32 %v1730_v14, %v7016_v26  ;;  %v1695_v23 = vrot.slane %v1694_v30, 2 }
 0x454   : > { %1813 = vmatmul.mubr.f32.gmra.mrb[68].mxu1 %v9789_v33  ;;  %v1913_v1 = vpop.trf.xlu0  ;;  %v1732_v27 = vrot.slane %v1731_v17, 2 }
 0x455   : > { %1818 = vmatprep.mubr.f32.mxu1 %v9790_v0 }
 0x456   : > { %v1886_v42 = vpop.trf.xlu1  ;;  %v1733_v33 = vadd.f32 %v1732_v27, %v1731_v17 }
 0x458   : > { %1819 = vmatmul.mubr.f32.gmra.mrb[70].mxu1 %v9791_v13  ;;  %v1914_v16 = vpop.trf.xlu0  ;;  %v1734_v13 = vrot.slane %v1733_v33, 1 }
 0x459   : > { %2083 = vmatprep.mubr.f32.mxu1 %v9792_v22 }
 0x45a   : > { %v1887_v3 = vpop.trf.xlu1 }
 0x45c   : > { %4762 = vmatmul.mubr.msk.f32.vlgmr.msra.gmra.mrb[72].mxu1 %vm1042_vm2, %v1875_v54  ;;  %v1915_v51 = vpop.trf.xlu0 }
 0x45d   : > { %2089 = vmatprep.mubr.f32.mxu1 %v9792_v22 }
 0x45e   : > { %v1888_v36 = vpop.trf.xlu1 }
 0x460   : > { %4763 = vmatmul.mubr.msk.f32.gmra.mrb[74].mxu1 %vm1042_vm2, %v1876_v40  ;;  %v1916_v55 = vpop.trf.xlu0 }
 0x461   : > { %2095 = vmatprep.mubr.f32.mxu1 %v9792_v22 }
 0x462   : > { %v1889_v57 = vpop.trf.xlu1 }
 0x464   : > { %4764 = vmatmul.mubr.msk.f32.gmra.mrb[76].mxu1 %vm1042_vm2, %v1877_v2  ;;  %v1917_v7 = vpop.trf.xlu0 }
 0x465   : > { %2101 = vmatprep.mubr.f32.mxu1 %v9792_v22 }
 0x466   : > { %v1890_v45 = vpop.trf.xlu1 }
 0x468   : > { %4765 = vmatmul.mubr.msk.f32.gmra.mrb[78].mxu1 %vm1042_vm2, %v1878_v32  ;;  %v1918_v44 = vpop.trf.xlu0 }
 0x469   : > { %2107 = vmatprep.mubr.f32.mxu1 %v9792_v22 }
 0x46c   : > { %4766 = vmatmul.mubr.msk.f32.gmra.mrb[80].mxu1 %vm1042_vm2, %v1879_v53  ;;  %v1919_v52 = vpop.trf.xlu0  ;;  %v1696_v53 = vadd.f32 %v1695_v23, %v1694_v30 }
 0x46d   : > { %2113 = vmatprep.mubr.f32.mxu1 %v9792_v22 }
 0x46e   : > { %v1697_v0 = vrot.slane %v1696_v53, 1 }
 0x470   : > { %4767 = vmatmul.mubr.msk.f32.gmra.mrb[82].mxu1 %vm1042_vm2, %v1880_v12  ;;  %v1920_v25 = vpop.trf.xlu0  ;;  %v1698_v12 = vadd.f32 %v1697_v0, %v1696_v53 }
 0x471   : > { %2119 = vmatprep.mubr.f32.mxu1 %v9792_v22 }
 0x472   : > { %5392 = vrcp.f32 %v1698_v12 }
 0x474   : > { %4768 = vmatmul.mubr.msk.f32.gmra.mrb[84].mxu1 %vm1042_vm2, %v1881_v20  ;;  %v1921_v41 = vpop.trf.xlu0  ;;  %v1735_v20 = vadd.f32 %v1734_v13, %v1733_v33 }
 0x475   : > { %2125 = vmatprep.mubr.f32.mxu1 %v9792_v22 }
 0x476   : > { %5394 = vrcp.f32 %v1735_v20 }
 0x478   : > { %4769 = vmatmul.mubr.msk.f32.gmra.mrb[86].mxu1 %vm1042_vm2, %v1882_v6  ;;  %v1922_v2 = vpop.trf.xlu0 }
 0x479   : > { %2131 = vmatprep.mubr.f32.mxu1 %v9792_v22 }
 0x47c   : > { %4770 = vmatmul.mubr.msk.f32.gmra.mrb[88].mxu1 %vm1042_vm2, %v1883_v28  ;;  %v5393_v6 = vpop.eup %5392 }
 0x47d   : > { %2137 = vmatprep.mubr.f32.mxu1 %v9792_v22 }
 0x480   : > { %4771 = vmatmul.mubr.msk.f32.gmra.mrb[90].mxu1 %vm1042_vm2, %v1884_v60  ;;  %v7095_v48 = vpop.f32.mrb[74].mxu0  ;;  %v5395_v60 = vpop.eup %5394 }
 0x481   : > { %2143 = vmatprep.mubr.f32.mxu1 %v9792_v22  ;;  %9794 = vst [vmem:[#allocation42_spill] sm:$0xff] %v7095_v48  ;;  %v7097_v19 = vpop.f32.mrb[75].mxu0 }
 0x482   : > { %9795 = vst [vmem:[#allocation43_spill] sm:$0xff] %v7097_v19 }
 0x484   : > { %4772 = vmatmul.mubr.msk.f32.gmra.mrb[92].mxu1 %vm1042_vm2, %v1885_v49  ;;  %v7101_v54 = vpop.f32.mrb[76].mxu0 }
 0x485   : > { %2149 = vmatprep.mubr.f32.mxu1 %v9792_v22  ;;  %9796 = vst [vmem:[#allocation44_spill] sm:$0xff] %v7101_v54  ;;  %v7103_v4 = vpop.f32.mrb[77].mxu0 }
 0x486   : > { %9797 = vst [vmem:[#allocation45_spill] sm:$0xff] %v7103_v4 }
 0x488   : > { %4773 = vmatmul.mubr.msk.f32.gmra.mrb[94].mxu1 %vm1042_vm2, %v1886_v42  ;;  %v7107_v47 = vpop.f32.mrb[78].mxu0 }
 0x489   : > { %2155 = vmatprep.mubr.f32.mxu1 %v9792_v22  ;;  %9798 = vst [vmem:[#allocation46_spill] sm:$0xff] %v7107_v47  ;;  %v7109_v62 = vpop.f32.mrb[79].mxu0 }
 0x48a   : > { %9799 = vst [vmem:[#allocation47_spill] sm:$0xff] %v7109_v62 }
 0x48c   : > { %4774 = vmatmul.mubr.msk.f32.gmra.mrb[96].mxu1 %vm1042_vm2, %v1887_v3  ;;  %v7113_v37 = vpop.f32.mrb[80].mxu0 }
 0x48d   : > { %2161 = vmatprep.mubr.f32.mxu1 %v9792_v22  ;;  %9800 = vst [vmem:[#allocation48_spill] sm:$0xff] %v7113_v37  ;;  %v808_v40 = vpop.f32.mrb[81].mxu0 }
 0x490   : > { %4775 = vmatmul.mubr.msk.f32.gmra.mrb[98].mxu1 %vm1042_vm2, %v1888_v36  ;;  %v7117_v15 = vpop.f32.mrb[82].mxu0 }
 0x491   : > { %2167 = vmatprep.mubr.f32.mxu1 %v9792_v22  ;;  %9801 = vst [vmem:[#allocation49_spill] sm:$0xff] %v7117_v15  ;;  %v7119_v24 = vpop.f32.mrb[83].mxu0 }
 0x492   : > { %9802 = vst [vmem:[#allocation50_spill] sm:$0xff] %v7119_v24 }
 0x494   : > { %4776 = vmatmul.mubr.msk.f32.gmra.mrb[100].mxu1 %vm1042_vm2, %v1889_v57  ;;  %v7123_v18 = vpop.f32.mrb[84].mxu0 }
 0x495   : > { %2173 = vmatprep.mubr.f32.mxu1 %v9792_v22  ;;  %9803 = vst [vmem:[#allocation51_spill] sm:$0xff] %v7123_v18  ;;  %v7125_v56 = vpop.f32.mrb[85].mxu0 }
 0x496   : > { %9804 = vst [vmem:[#allocation36_spill] sm:$0xff] %v7125_v56 }
 0x498   : > { %4777 = vmatmul.mubr.msk.f32.gmra.mrb[102].mxu1 %vm1042_vm2, %v1890_v45  ;;  %v7128_v61 = vpop.f32.mrb[86].mxu0 }
 0x499   : > { %2179 = vmatprep.mubr.f32.mxu1 %v9792_v22  ;;  %9805 = vst [vmem:[#allocation52_spill] sm:$0xff] %v7128_v61  ;;  %v7130_v9 = vpop.f32.mrb[87].mxu0 }
 0x49a   : > { %9806 = vst [vmem:[#allocation53_spill] sm:$0xff] %v7130_v9 }
 0x49c   : > { %4778 = vmatmul.mubr.msk.f32.gmra.mrb[104].mxu1 %vm1042_vm2, %v1907_v10  ;;  %v7132_v35 = vpop.f32.mrb[88].mxu0 }
 0x49d   : > { %2185 = vmatprep.mubr.f32.mxu1 %v9792_v22  ;;  %9807 = vst [vmem:[#allocation54_spill] sm:$0xff] %v7132_v35  ;;  %v7134_v5 = vpop.f32.mrb[89].mxu0 }
 0x49e   : > { %9808 = vst [vmem:[#allocation40_spill] sm:$0xff] %v7134_v5 }
 0x4a0   : > { %4779 = vmatmul.mubr.msk.f32.gmra.mrb[106].mxu1 %vm1042_vm2, %v1908_v59 }
 0x4a1   : > { %2191 = vmatprep.mubr.f32.mxu1 %v9792_v22  ;;  %v7136_v31 = vpop.f32.mrb[90].mxu0 }
 0x4a2   : > { %9809 = vst [vmem:[#allocation15_spill] sm:$0xff] %v7136_v31  ;;  %v7138_v29 = vpop.f32.mrb[91].mxu0 }
 0x4a3   : > { %9810 = vst [vmem:[#allocation13_spill] sm:$0xff] %v7138_v29 }
 0x4a4   : > { %4780 = vmatmul.mubr.msk.f32.gmra.mrb[108].mxu1 %vm1042_vm2, %v1909_v58 }
 0x4a5   : > { %2197 = vmatprep.mubr.f32.mxu1 %v9792_v22  ;;  %v7140_v11 = vpop.f32.mrb[92].mxu0 }
 0x4a6   : > { %9811 = vst [vmem:[#allocation55_spill] sm:$0xff] %v7140_v11  ;;  %v7142_v32 = vpop.f32.mrb[93].mxu0 }
 0x4a7   : > { %9812 = vst [vmem:[#allocation14_spill] sm:$0xff] %v7142_v32 }
 0x4a8   : > { %4781 = vmatmul.mubr.msk.f32.gmra.mrb[110].mxu1 %vm1042_vm2, %v1910_v63 }
 0x4a9   : > { %2203 = vmatprep.mubr.f32.mxu1 %v9792_v22 }
 0x4ac   : > { %4782 = vmatmul.mubr.msk.f32.gmra.mrb[112].mxu1 %vm1042_vm2, %v1911_v46 }
 0x4ad   : > { %2209 = vmatprep.mubr.f32.mxu1 %v9792_v22 }
 0x4b0   : > { %4783 = vmatmul.mubr.msk.f32.gmra.mrb[114].mxu1 %vm1042_vm2, %v1912_v43 }
 0x4b1   : > { %2215 = vmatprep.mubr.f32.mxu1 %v9792_v22 }
 0x4b4   : > { %4784 = vmatmul.mubr.msk.f32.gmra.mrb[116].mxu1 %vm1042_vm2, %v1913_v1 }
 0x4b5   : > { %2221 = vmatprep.mubr.f32.mxu1 %v9792_v22 }
 0x4b8   : > { %4785 = vmatmul.mubr.msk.f32.gmra.mrb[118].mxu1 %vm1042_vm2, %v1914_v16 }
 0x4b9   : > { %2227 = vmatprep.mubr.f32.mxu1 %v9792_v22 }
 0x4bc   : > { %4786 = vmatmul.mubr.msk.f32.gmra.mrb[120].mxu1 %vm1042_vm2, %v1915_v51 }
 0x4bd   : > { %2233 = vmatprep.mubr.f32.mxu1 %v9792_v22 }
 0x4c0   : > { %4787 = vmatmul.mubr.msk.f32.gmra.mrb[122].mxu1 %vm1042_vm2, %v1916_v55 }
 0x4c1   : > { %2239 = vmatprep.mubr.f32.mxu1 %v9792_v22 }
 0x4c4   : > { %4788 = vmatmul.mubr.msk.f32.gmra.mrb[124].mxu1 %vm1042_vm2, %v1917_v7 }
 0x4c5   : > { %2245 = vmatprep.mubr.f32.mxu1 %v9792_v22 }
 0x4c8   : > { %4789 = vmatmul.mubr.msk.f32.gmra.mrb[126].mxu1 %vm1042_vm2, %v1918_v44 }
 0x4c9   : > { %2251 = vmatprep.mubr.f32.mxu1 %v9792_v22 }
 0x4cc   : > { %4790 = vmatmul.mubr.msk.f32.gmra.mrb[128].mxu1 %vm1042_vm2, %v1919_v52 }
 0x4cd   : > { %2257 = vmatprep.mubr.f32.mxu1 %v9792_v22 }
 0x4d0   : > { %4791 = vmatmul.mubr.msk.f32.gmra.mrb[130].mxu1 %vm1042_vm2, %v1920_v25 }
 0x4d1   : > { %2263 = vmatprep.mubr.f32.mxu1 %v9792_v22 }
 0x4d4   : > { %4792 = vmatmul.mubr.msk.f32.gmra.mrb[132].mxu1 %vm1042_vm2, %v1921_v41 }
 0x4d5   : > { %2269 = vmatprep.mubr.f32.mxu1 %v9792_v22 }
 0x4d8   : > { %4793 = vmatmul.mubr.msk.f32.gmra.mrb[134].mxu1 %vm1042_vm2, %v1922_v2 }
 0x4d9   : > { %3560 = vmatprep.mubr.f32.mxu1 %v808_v40 }
 0x4e3   : > { %v7144_v50 = vpop.f32.mrb[94].mxu0 }
 0x4e4   : > { %9813 = vst [vmem:[#allocation12_spill] sm:$0xff] %v7144_v50  ;;  %v7146_v38 = vpop.f32.mrb[95].mxu0 }
 0x4e5   : > { %9814 = vst [vmem:[#allocation57_spill] sm:$0xff] %v7146_v38 }
 0x51f   : > { %v1802_v28 = vpop.f32.mrb[64].mxu1 }
 0x520   : > { %v7152_v49 = vmul.f32 %v5393_v6, %v1802_v28  ;;  %v1804_v10 = vpop.f32.mrb[65].mxu1 }
 0x521   : > { %v7154_v42 = vmul.f32 %v5395_v60, %v1804_v10 }
 0x522   : > { %9815 = vst [vmem:[#allocation19_spill] sm:$0xff] %v7152_v49 }
 0x523   : > { %9816 = vst [vmem:[#allocation17_spill] sm:$0xff] %v7154_v42  ;;  %v1808_v8 = vpop.f32.mrb[66].mxu1 }
 0x524   : > { %v7156_v26 = vmul.f32 %v5393_v6, %v1808_v8  ;;  %v1810_v59 = vpop.f32.mrb[67].mxu1 }
 0x525   : > { %v7158_v3 = vmul.f32 %v5395_v60, %v1810_v59 }
 0x526   : > { %9817 = vst [vmem:[#allocation56_spill] sm:$0xff] %v7156_v26 }
 0x527   : > { %9818 = vst [vmem:[#allocation18_spill] sm:$0xff] %v7158_v3  ;;  %v1814_v63 = vpop.f32.mrb[68].mxu1 }
 0x528   : > { %v7164_v57 = vmul.f32 %v5393_v6, %v1814_v63  ;;  %v1816_v46 = vpop.f32.mrb[69].mxu1 }
 0x529   : > { %v7166_v45 = vmul.f32 %v5395_v60, %v1816_v46 }
 0x52a   : > { %9819 = vst [vmem:[#allocation16_spill] sm:$0xff] %v7164_v57 }
 0x52b   : > { %9820 = vst [vmem:[#allocation37_spill] sm:$0xff] %v7166_v45  ;;  %v1820_v43 = vpop.f32.mrb[70].mxu1 }
 0x52c   : > { %v7168_v1 = vmul.f32 %v5393_v6, %v1820_v43  ;;  %v1822_v16 = vpop.f32.mrb[71].mxu1 }
 0x52d   : > { %v7170_v51 = vmul.f32 %v5395_v60, %v1822_v16 }
 0x52e   : > { %9821 = vst [vmem:[#allocation58_spill] sm:$0xff] %v7168_v1 }
 0x52f   : > { %9822 = vst [vmem:[#allocation39_spill] sm:$0xff] %v7170_v51  ;;  %v7176_v44 = vpop.f32.mrb[72].mxu1 }
 0x530   : > { %v7178_v21 = vpop.f32.mrb[73].mxu1 }
 0x533   : > { %v7180_v52 = vpop.f32.mrb[74].mxu1 }
 0x534   : > { %v7182_v25 = vpop.f32.mrb[75].mxu1 }
 0x537   : > { %v7184_v40 = vpop.f32.mrb[76].mxu1 }
 0x538   : > { %v2276_v41 = vmax.f32 %v7176_v44, %v7184_v40  ;;  %v7188_v2 = vpop.f32.mrb[77].mxu1 }
 0x539   : > { %v2313_v34 = vmax.f32 %v7178_v21, %v7188_v2 }
 0x53b   : > { %v7192_v14 = vpop.f32.mrb[78].mxu1 }
 0x53c   : > { %v2277_v30 = vmax.f32 %v7180_v52, %v7192_v14  ;;  %v7196_v17 = vpop.f32.mrb[79].mxu1 }
 0x53d   : > { %v2314_v23 = vmax.f32 %v7182_v25, %v7196_v17 }
 0x53f   : > { %v7200_v27 = vpop.f32.mrb[80].mxu1 }
 0x540   : > { %v2278_v53 = vmax.f32 %v2276_v41, %v7200_v27  ;;  %v7203_v33 = vpop.f32.mrb[81].mxu1 }
 0x541   : > { %v2315_v0 = vmax.f32 %v2313_v34, %v7203_v33 }
 0x543   : > { %v7206_v13 = vpop.f32.mrb[82].mxu1 }
 0x544   : > { %v2279_v12 = vmax.f32 %v2277_v30, %v7206_v13  ;;  %v7209_v20 = vpop.f32.mrb[83].mxu1 }
 0x545   : > { %v2316_v6 = vmax.f32 %v2314_v23, %v7209_v20 }
 0x547   : > { %v7212_v28 = vpop.f32.mrb[84].mxu1 }
 0x548   : > { %v2280_v60 = vmax.f32 %v2278_v53, %v7212_v28  ;;  %v7215_v10 = vpop.f32.mrb[85].mxu1 }
 0x549   : > { %v2317_v8 = vmax.f32 %v2315_v0, %v7215_v10 }
 0x54b   : > { %v7218_v59 = vpop.f32.mrb[86].mxu1 }
 0x54c   : > { %v2281_v63 = vmax.f32 %v2279_v12, %v7218_v59  ;;  %v7221_v46 = vpop.f32.mrb[87].mxu1 }
 0x54d   : > { %v2318_v43 = vmax.f32 %v2316_v6, %v7221_v46 }
 0x54f   : > { %v7224_v16 = vpop.f32.mrb[88].mxu1 }
 0x550   : > { %v2282_v41 = vmax.f32 %v2280_v60, %v7224_v16  ;;  %v7227_v34 = vpop.f32.mrb[89].mxu1 }
 0x551   : > { %v2319_v30 = vmax.f32 %v2317_v8, %v7227_v34 }
 0x553   : > { %v7230_v23 = vpop.f32.mrb[90].mxu1 }
 0x554   : > { %v2283_v53 = vmax.f32 %v2281_v63, %v7230_v23  ;;  %v7233_v0 = vpop.f32.mrb[91].mxu1 }
 0x555   : > { %v2320_v12 = vmax.f32 %v2318_v43, %v7233_v0 }
 0x557   : > { %v7236_v55 = vpop.f32.mrb[92].mxu1 }
 0x558   : > { %v2284_v6 = vmax.f32 %v2282_v41, %v7236_v55  ;;  %v7239_v7 = vpop.f32.mrb[93].mxu1 }
 0x559   : > { %v2321_v60 = vmax.f32 %v2319_v30, %v7239_v7 }
 0x55b   : > { %v7242_v58 = vpop.f32.mrb[94].mxu1 }
 0x55c   : > { %v2285_v8 = vmax.f32 %v2283_v53, %v7242_v58  ;;  %v7245_v36 = vpop.f32.mrb[95].mxu1 }
 0x55d   : > { %9823 = vst [vmem:[#allocation38_spill] sm:$0xff] %v7245_v36  ;;  %v2322_v63 = vmax.f32 %v2320_v12, %v7245_v36 }
 0x55f   : > { %v7248_v50 = vpop.f32.mrb[96].mxu1 }
 0x560   : > { %v2286_v43 = vmax.f32 %v2284_v6, %v7248_v50  ;;  %v7251_v38 = vpop.f32.mrb[97].mxu1 }
 0x561   : > { %9824 = vst [vmem:[#allocation59_spill] sm:$0xff] %v7251_v38  ;;  %v2323_v41 = vmax.f32 %v2321_v60, %v7251_v38 }
 0x563   : > { %v7254_v11 = vpop.f32.mrb[98].mxu1 }
 0x564   : > { %v2287_v30 = vmax.f32 %v2285_v8, %v7254_v11  ;;  %v7257_v57 = vpop.f32.mrb[99].mxu1 }
 0x565   : > { %9825 = vst [vmem:[#allocation60_spill] sm:$0xff] %v7257_v57  ;;  %v2324_v53 = vmax.f32 %v2322_v63, %v7257_v57 }
 0x567   : > { %v7260_v1 = vpop.f32.mrb[100].mxu1 }
 0x568   : > { %v2288_v12 = vmax.f32 %v2286_v43, %v7260_v1  ;;  %v7263_v32 = vpop.f32.mrb[101].mxu1 }
 0x569   : > { %9826 = vst [vmem:[#allocation61_spill] sm:$0xff] %v7263_v32  ;;  %v2325_v6 = vmax.f32 %v2323_v41, %v7263_v32 }
 0x56b   : > { %v7266_v31 = vpop.f32.mrb[102].mxu1 }
 0x56c   : > { %v2289_v60 = vmax.f32 %v2287_v30, %v7266_v31  ;;  %v7269_v45 = vpop.f32.mrb[103].mxu1 }
 0x56d   : > { %9827 = vst [vmem:[#allocation62_spill] sm:$0xff] %v7269_v45  ;;  %v2326_v8 = vmax.f32 %v2324_v53, %v7269_v45 }
 0x56f   : > { %v7272_v51 = vpop.f32.mrb[104].mxu1 }
 0x570   : > { %v2290_v63 = vmax.f32 %v2288_v12, %v7272_v51  ;;  %v7275_v49 = vpop.f32.mrb[105].mxu1 }
 0x571   : > { %9828 = vst [vmem:[#allocation63_spill] sm:$0xff] %v7275_v49  ;;  %v2327_v43 = vmax.f32 %v2325_v6, %v7275_v49 }
 0x573   : > { %v7278_v26 = vpop.f32.mrb[106].mxu1 }
 0x574   : > { %v2291_v41 = vmax.f32 %v2289_v60, %v7278_v26  ;;  %v7281_v29 = vpop.f32.mrb[107].mxu1 }
 0x575   : > { %9829 = vst [vmem:[#allocation64_spill] sm:$0xff] %v7281_v29  ;;  %v2328_v30 = vmax.f32 %v2326_v8, %v7281_v29 }
 0x577   : > { %v7284_v35 = vpop.f32.mrb[108].mxu1 }
 0x578   : > { %v2292_v53 = vmax.f32 %v2290_v63, %v7284_v35  ;;  %v7287_v42 = vpop.f32.mrb[109].mxu1 }
 0x579   : > { %9830 = vst [vmem:[#allocation65_spill] sm:$0xff] %v7287_v42  ;;  %v2329_v12 = vmax.f32 %v2327_v43, %v7287_v42 }
 0x57b   : > { %v7290_v3 = vpop.f32.mrb[110].mxu1 }
 0x57c   : > { %v2293_v6 = vmax.f32 %v2291_v41, %v7290_v3  ;;  %v7293_v61 = vpop.f32.mrb[111].mxu1 }
 0x57d   : > { %9831 = vst [vmem:[#allocation66_spill] sm:$0xff] %v7293_v61  ;;  %v2330_v60 = vmax.f32 %v2328_v30, %v7293_v61 }
 0x57f   : > { %v7296_v9 = vpop.f32.mrb[112].mxu1 }
 0x580   : > { %v2294_v8 = vmax.f32 %v2292_v53, %v7296_v9  ;;  %v7299_v18 = vpop.f32.mrb[113].mxu1 }
 0x581   : > { %9832 = vst [vmem:[#allocation67_spill] sm:$0xff] %v7299_v18  ;;  %v2331_v63 = vmax.f32 %v2329_v12, %v7299_v18 }
 0x583   : > { %v7302_v56 = vpop.f32.mrb[114].mxu1 }
 0x584   : > { %v2295_v43 = vmax.f32 %v2293_v6, %v7302_v56  ;;  %v7305_v15 = vpop.f32.mrb[115].mxu1 }
 0x585   : > { %9833 = vst [vmem:[#allocation68_spill] sm:$0xff] %v7305_v15  ;;  %v2332_v41 = vmax.f32 %v2330_v60, %v7305_v15 }
 0x587   : > { %v7308_v24 = vpop.f32.mrb[116].mxu1 }
 0x588   : > { %v2296_v30 = vmax.f32 %v2294_v8, %v7308_v24  ;;  %v7311_v37 = vpop.f32.mrb[117].mxu1 }
 0x589   : > { %9834 = vst [vmem:[#allocation69_spill] sm:$0xff] %v7311_v37  ;;  %v2333_v53 = vmax.f32 %v2331_v63, %v7311_v37 }
 0x58b   : > { %v7314_v5 = vpop.f32.mrb[118].mxu1 }
 0x58c   : > { %v2297_v12 = vmax.f32 %v2295_v43, %v7314_v5  ;;  %v7317_v22 = vpop.f32.mrb[119].mxu1 }
 0x58d   : > { %9835 = vst [vmem:[#allocation70_spill] sm:$0xff] %v7317_v22  ;;  %v2334_v6 = vmax.f32 %v2332_v41, %v7317_v22 }
 0x58f   : > { %v7320_v47 = vpop.f32.mrb[120].mxu1 }
 0x590   : > { %v2298_v60 = vmax.f32 %v2296_v30, %v7320_v47  ;;  %v7323_v62 = vpop.f32.mrb[121].mxu1 }
 0x591   : > { %9836 = vst [vmem:[#allocation71_spill] sm:$0xff] %v7323_v62  ;;  %v2335_v8 = vmax.f32 %v2333_v53, %v7323_v62 }
 0x593   : > { %v7326_v54 = vpop.f32.mrb[122].mxu1 }
 0x594   : > { %v2299_v63 = vmax.f32 %v2297_v12, %v7326_v54  ;;  %v7329_v4 = vpop.f32.mrb[123].mxu1 }
 0x595   : > { %9837 = vst [vmem:[#allocation72_spill] sm:$0xff] %v7329_v4  ;;  %v2336_v43 = vmax.f32 %v2334_v6, %v7329_v4 }
 0x597   : > { %v7332_v48 = vpop.f32.mrb[124].mxu1 }
 0x598   : > { %v2300_v41 = vmax.f32 %v2298_v60, %v7332_v48  ;;  %v7335_v19 = vpop.f32.mrb[125].mxu1 }
 0x599   : > { %9838 = vst [vmem:[#allocation73_spill] sm:$0xff] %v7335_v19  ;;  %v2337_v30 = vmax.f32 %v2335_v8, %v7335_v19 }
 0x59b   : > { %v7338_v39 = vpop.f32.mrb[126].mxu1 }
 0x59c   : > { %v2301_v53 = vmax.f32 %v2299_v63, %v7338_v39  ;;  %v7341_v62 = vpop.f32.mrb[127].mxu1 }
 0x59d   : > { %9839 = vst [vmem:[#allocation74_spill] sm:$0xff] %v7341_v62  ;;  %v2338_v12 = vmax.f32 %v2336_v43, %v7341_v62 }
 0x59f   : > { %v7344_v22 = vpop.f32.mrb[128].mxu1 }
 0x5a0   : > { %v2302_v6 = vmax.f32 %v2300_v41, %v7344_v22  ;;  %v7347_v4 = vpop.f32.mrb[129].mxu1 }
 0x5a1   : > { %9840 = vst [vmem:[#allocation75_spill] sm:$0xff] %v7347_v4  ;;  %v2339_v60 = vmax.f32 %v2337_v30, %v7347_v4 }
 0x5a3   : > { %v7350_v37 = vpop.f32.mrb[130].mxu1 }
 0x5a4   : > { %v2303_v8 = vmax.f32 %v2301_v53, %v7350_v37  ;;  %v7353_v19 = vpop.f32.mrb[131].mxu1 }
 0x5a5   : > { %9841 = vst [vmem:[#allocation76_spill] sm:$0xff] %v7353_v19  ;;  %v2340_v63 = vmax.f32 %v2338_v12, %v7353_v19 }
 0x5a7   : > { %v7356_v15 = vpop.f32.mrb[132].mxu1 }
 0x5a8   : > { %v2304_v43 = vmax.f32 %v2302_v6, %v7356_v15  ;;  %v7359_v62 = vpop.f32.mrb[133].mxu1 }
 0x5a9   : > { %9842 = vst [vmem:[#allocation77_spill] sm:$0xff] %v7359_v62  ;;  %v2341_v41 = vmax.f32 %v2339_v60, %v7359_v62 }
 0x5ab   : > { %v7362_v18 = vpop.f32.mrb[134].mxu1 }
 0x5ac   : > { %v2305_v30 = vmax.f32 %v2303_v8, %v7362_v18  ;;  %v7365_v4 = vpop.f32.mrb[135].mxu1 }
 0x5ad   : > { %9843 = vst [vmem:[#allocation78_spill] sm:$0xff] %v7365_v4  ;;  %v2342_v53 = vmax.f32 %v2340_v63, %v7365_v4 }
 0x5ae   : > { %v2306_v61 = vmax.f32 %v2304_v43, %v2305_v30 }
 0x5af   : > { %v2343_v42 = vmax.f32 %v2341_v41, %v2342_v53 }
 0x5b0   : > { %v2307_v29 = vrot.slane %v2306_v61, 4 }
 0x5b1   : > { %v2344_v12 = vrot.slane %v2343_v42, 4 }
 0x5b2   : > { %v2308_v19 = vmax.f32 %v2306_v61, %v2307_v29 }
 0x5b3   : > { %v2345_v49 = vmax.f32 %v2343_v42, %v2344_v12 }
 0x5b4   : > { %v2309_v45 = vrot.slane %v2308_v19, 2 }
 0x5b5   : > { %v2346_v6 = vrot.slane %v2345_v49, 2 }
 0x5b6   : > { %v2310_v32 = vmax.f32 %v2308_v19, %v2309_v45 }
 0x5b7   : > { %v2347_v57 = vmax.f32 %v2345_v49, %v2346_v6 }
 0x5b8   : > { %v2311_v38 = vrot.slane %v2310_v32, 1 }
 0x5b9   : > { %v2348_v60 = vrot.slane %v2347_v57, 1 }
 0x5ba   : > { %v7368_v62 = vmax.f32 %v2310_v32, %v2311_v38 }
 0x5bb   : > { %v7370_v36 = vmax.f32 %v2347_v57, %v2348_v60 }
 0x5bc   : > { %v2350_v8 = vsub.f32 %v7176_v44, %v7368_v62  ;;  %v2352_v63 = vsub.f32 %v7180_v52, %v7368_v62  ;;  %v2354_v61 = vsub.f32 %v7184_v40, %v7368_v62  ;;  %v2356_v29 = vsub.f32 %v7192_v14, %v7368_v62 }
 0x5bd   : > { %v2358_v19 = vsub.f32 %v7200_v27, %v7368_v62  ;;  %v2360_v32 = vsub.f32 %v7206_v13, %v7368_v62  ;;  %v2362_v38 = vsub.f32 %v7212_v28, %v7368_v62  ;;  %v2364_v49 = vsub.f32 %v7218_v59, %v7368_v62 }
 0x5be   : > { %v2366_v42 = vsub.f32 %v7224_v16, %v7368_v62  ;;  %v2368_v57 = vsub.f32 %v7230_v23, %v7368_v62  ;;  %v2370_v45 = vsub.f32 %v7236_v55, %v7368_v62  ;;  %v2372_v44 = vsub.f32 %v7242_v58, %v7368_v62 }
 0x5bf   : > { %v2374_v52 = vsub.f32 %v7248_v50, %v7368_v62  ;;  %v2376_v40 = vsub.f32 %v7254_v11, %v7368_v62  ;;  %v2378_v14 = vsub.f32 %v7260_v1, %v7368_v62  ;;  %v2380_v27 = vsub.f32 %v7266_v31, %v7368_v62 }
 0x5c0   : > { %v2382_v13 = vsub.f32 %v7272_v51, %v7368_v62  ;;  %v2384_v55 = vsub.f32 %v7278_v26, %v7368_v62  ;;  %v2386_v58 = vsub.f32 %v7284_v35, %v7368_v62  ;;  %v2388_v50 = vsub.f32 %v7290_v3, %v7368_v62  ;;  %v9863_v26 = vld [vmem:[#allocation77_spill] sm:$0xff] }
 0x5c1   : > { %v2390_v11 = vsub.f32 %v7296_v9, %v7368_v62  ;;  %v2392_v1 = vsub.f32 %v7302_v56, %v7368_v62  ;;  %v2394_v31 = vsub.f32 %v7308_v24, %v7368_v62  ;;  %v2396_v51 = vsub.f32 %v7314_v5, %v7368_v62 }
 0x5c2   : > { %v2414_v59 = vmul.f32 1.442695, %v2350_v8  ;;  %v2418_v16 = vmul.f32 1.442695, %v2352_v63  ;;  %v2422_v23 = vmul.f32 1.442695, %v2354_v61 }
 0x5c3   : > { %v2426_v41 = vmul.f32 1.442695, %v2356_v29  ;;  %v2430_v53 = vmul.f32 1.442695, %v2358_v19  ;;  %v2434_v12 = vmul.f32 1.442695, %v2360_v32 }
 0x5c4   : > { %5396 = vpow2.f32 %v2414_v59  ;;  %v2438_v6 = vmul.f32 1.442695, %v2362_v38  ;;  %v2442_v60 = vmul.f32 1.442695, %v2364_v49  ;;  %v2446_v5 = vmul.f32 1.442695, %v2366_v42 }
 0x5c5   : > { %5398 = vpow2.f32 %v2418_v16  ;;  %v2450_v28 = vmul.f32 1.442695, %v2368_v57  ;;  %v2454_v8 = vmul.f32 1.442695, %v2370_v45  ;;  %v2458_v63 = vmul.f32 1.442695, %v2372_v44 }
 0x5c6   : > { %5400 = vpow2.f32 %v2422_v23  ;;  %v2462_v61 = vmul.f32 1.442695, %v2374_v52  ;;  %v2466_v43 = vmul.f32 1.442695, %v2376_v40  ;;  %v2470_v29 = vmul.f32 1.442695, %v2378_v14 }
 0x5c7   : > { %5402 = vpow2.f32 %v2426_v41  ;;  %v2474_v24 = vmul.f32 1.442695, %v2380_v27  ;;  %v2478_v30 = vmul.f32 1.442695, %v2382_v13  ;;  %v2482_v59 = vmul.f32 1.442695, %v2384_v55 }
 0x5c8   : > { %5404 = vpow2.f32 %v2430_v53  ;;  %v2486_v19 = vmul.f32 1.442695, %v2386_v58  ;;  %v2490_v32 = vmul.f32 1.442695, %v2388_v50  ;;  %v2494_v16 = vmul.f32 1.442695, %v2390_v11 }
 0x5c9   : > { %5406 = vpow2.f32 %v2434_v12  ;;  %v7440_v38 = vmul.f32 1.442695, %v2392_v1  ;;  %v7442_v49 = vmul.f32 1.442695, %v2394_v31  ;;  %v7444_v42 = vmul.f32 1.442695, %v2396_v51 }
 0x5ca   : > { %5408 = vpow2.f32 %v2438_v6  ;;  %v9844_v11 = vld [vmem:[#allocation38_spill] sm:$0xff]  ;;  %v9846_v23 = vld [vmem:[#allocation60_spill] sm:$0xff]  ;;  %v9847_v12 = vld [vmem:[#allocation61_spill] sm:$0xff] }
 0x5cb   : > { %5410 = vpow2.f32 %v2442_v60  ;;  %v9848_v60 = vld [vmem:[#allocation62_spill] sm:$0xff]  ;;  %v9850_v50 = vld [vmem:[#allocation64_spill] sm:$0xff]  ;;  %v9851_v58 = vld [vmem:[#allocation65_spill] sm:$0xff] }
 0x5cc   : > { %5412 = vpow2.f32 %v2446_v5  ;;  %v9845_v5 = vld [vmem:[#allocation59_spill] sm:$0xff]  ;;  %v9852_v6 = vld [vmem:[#allocation66_spill] sm:$0xff]  ;;  %v9854_v14 = vld [vmem:[#allocation68_spill] sm:$0xff] }
 0x5cd   : > { %5414 = vpow2.f32 %v2450_v28  ;;  %v9853_v27 = vld [vmem:[#allocation67_spill] sm:$0xff]  ;;  %v9855_v41 = vld [vmem:[#allocation69_spill] sm:$0xff]  ;;  %v9856_v44 = vld [vmem:[#allocation70_spill] sm:$0xff] }
 0x5ce   : > { %v7454_v40 = vpop.eup %5396  ;;  %5416 = vpow2.f32 %v2454_v8  ;;  %v9857_v8 = vld [vmem:[#allocation71_spill] sm:$0xff]  ;;  %v9858_v57 = vld [vmem:[#allocation72_spill] sm:$0xff] }
 0x5cf   : > { %v7462_v55 = vpop.eup %5398  ;;  %5418 = vpow2.f32 %v2458_v63  ;;  %v9849_v63 = vld [vmem:[#allocation63_spill] sm:$0xff] }
 0x5d0   : > { %v7470_v31 = vpop.eup %5400  ;;  %5420 = vpow2.f32 %v2462_v61  ;;  %v2542_v51 = vadd.f32 %v7462_v55, %v7454_v40  ;;  %v9862_v61 = vld [vmem:[#allocation76_spill] sm:$0xff] }
 0x5d1   : > { %v7478_v53 = vpop.eup %5402  ;;  %5422 = vpow2.f32 %v2466_v43  ;;  %v9860_v43 = vld [vmem:[#allocation74_spill] sm:$0xff] }
 0x5d2   : > { %v7486_v1 = vpop.eup %5404  ;;  %5424 = vpow2.f32 %v2470_v29  ;;  %v2543_v28 = vadd.f32 %v7470_v31, %v2542_v51 }
 0x5d3   : > { %v7493_v13 = vpop.eup %5406  ;;  %5426 = vpow2.f32 %v2474_v24 }
 0x5d4   : > { %v7501_v52 = vpop.eup %5408  ;;  %5428 = vpow2.f32 %v2478_v30  ;;  %v2544_v51 = vadd.f32 %v7478_v53, %v2543_v28 }
 0x5d5   : > { %v7508_v45 = vpop.eup %5410  ;;  %5430 = vpow2.f32 %v2482_v59 }
 0x5d6   : > { %v7516_v9 = vpop.eup %5412  ;;  %5432 = vpow2.f32 %v2486_v19  ;;  %v2545_v28 = vadd.f32 %v7486_v1, %v2544_v51  ;;  %v9864_v51 = vsub.f32 %v7320_v47, %v7368_v62 }
 0x5d7   : > { %v7523_v35 = vpop.eup %5414  ;;  %5434 = vpow2.f32 %v2490_v32  ;;  %v9865_v32 = vsub.f32 %v7326_v54, %v7368_v62 }
 0x5d8   : > { %v7531_v56 = vpop.eup %5416  ;;  %5436 = vpow2.f32 %v2494_v16  ;;  %v2510_v24 = vmul.f32 1.442695, %v9864_v51  ;;  %v2546_v59 = vadd.f32 %v7493_v13, %v2545_v28  ;;  %v9866_v16 = vsub.f32 %v7332_v48, %v7368_v62 }
 0x5d9   : > { %v7537_v3 = vpop.eup %5418  ;;  %5438 = vpow2.f32 %v7440_v38  ;;  %v2514_v30 = vmul.f32 1.442695, %v9865_v32  ;;  %v9867_v38 = vsub.f32 %v7338_v39, %v7368_v62  ;;  %v9871_v39 = vsub.f32 %v7356_v15, %v7368_v62 }
 0x5da   : > { %v7543_v29 = vpop.eup %5420  ;;  %5440 = vpow2.f32 %v7442_v49  ;;  %v2518_v19 = vmul.f32 1.442695, %v9866_v16  ;;  %v2547_v47 = vadd.f32 %v7501_v52, %v2546_v59  ;;  %v9868_v49 = vsub.f32 %v7344_v22, %v7368_v62 }
 0x5db   : > { %v7550_v51 = vpop.eup %5422  ;;  %5442 = vpow2.f32 %v7444_v42  ;;  %v2522_v28 = vmul.f32 1.442695, %v9867_v38  ;;  %v9869_v59 = vsub.f32 %v7350_v37, %v7368_v62 }
 0x5dc   : > { %v7556_v54 = vpop.eup %5424  ;;  %5444 = vpow2.f32 %v2510_v24  ;;  %v2526_v32 = vmul.f32 1.442695, %v9868_v49  ;;  %v2548_v48 = vadd.f32 %v7508_v45, %v2547_v47  ;;  %v2534_v24 = vmul.f32 1.442695, %v9871_v39 }
 0x5dd   : > { %v7562_v16 = vpop.eup %5426  ;;  %5446 = vpow2.f32 %v2514_v30  ;;  %v2530_v42 = vmul.f32 1.442695, %v9869_v59  ;;  %v9872_v47 = vsub.f32 %v7362_v18, %v7368_v62  ;;  %v9875_v62 = vsub.f32 %v7188_v2, %v7370_v36 }
 0x5de   : > { %v7567_v4 = vpop.eup %5428  ;;  %5448 = vpow2.f32 %v2518_v19  ;;  %v2549_v38 = vadd.f32 %v7516_v9, %v2548_v48  ;;  %v9873_v19 = vsub.f32 %v7178_v21, %v7370_v36  ;;  %v9874_v48 = vsub.f32 %v7182_v25, %v7370_v36 }
 0x5df   : > { %9870 = vst [vmem:[#allocation38_spill] sm:$0xff] %v7567_v4  ;;  %v7573_v22 = vpop.eup %5430  ;;  %5450 = vpow2.f32 %v2522_v28  ;;  %v2538_v30 = vmul.f32 1.442695, %v9872_v47  ;;  %v2424_v18 = vmul.f32 1.442695, %v9875_v62  ;;  %v9876_v21 = vsub.f32 %v7196_v17, %v7370_v36 }
 0x5e0   : > { %v7578_v49 = vpop.eup %5432  ;;  %5452 = vpow2.f32 %v2526_v32  ;;  %v2550_v37 = vadd.f32 %v7523_v35, %v2549_v38  ;;  %v2416_v59 = vmul.f32 1.442695, %v9873_v19  ;;  %v2420_v28 = vmul.f32 1.442695, %v9874_v48 }
 0x5e1   : > { %v7584_v15 = vpop.eup %5434  ;;  %5454 = vpow2.f32 %v2530_v42  ;;  %v2428_v38 = vmul.f32 1.442695, %v9876_v21  ;;  %v9877_v42 = vsub.f32 %v7203_v33, %v7370_v36  ;;  %v9878_v25 = vsub.f32 %v7209_v20, %v7370_v36 }
 0x5e2   : > { %v7592_v39 = vpop.eup %5436  ;;  %5456 = vpow2.f32 %v2534_v24  ;;  %v2551_v32 = vadd.f32 %v7531_v56, %v2550_v37  ;;  %v9879_v24 = vsub.f32 %v7215_v10, %v7370_v36  ;;  %v9880_v37 = vsub.f32 %v7221_v46, %v7370_v36 }
 0x5e3   : > { %v2432_v47 = vmul.f32 1.442695, %v9877_v42  ;;  %v7601_v19 = vpop.eup %5438  ;;  %5458 = vpow2.f32 %v2538_v30  ;;  %v2436_v2 = vmul.f32 1.442695, %v9878_v25  ;;  %v9881_v30 = vsub.f32 %v7227_v34, %v7370_v36 }
 0x5e4   : > { %v2440_v48 = vmul.f32 1.442695, %v9879_v24  ;;  %v2444_v17 = vmul.f32 1.442695, %v9880_v37  ;;  %v7612_v62 = vpop.eup %5440  ;;  %v2552_v33 = vadd.f32 %v7537_v3, %v2551_v32  ;;  %5460 = vpow2.f32 %v2416_v59 }
 0x5e5   : > { %v2448_v21 = vmul.f32 1.442695, %v9881_v30  ;;  %v9882_v20 = vsub.f32 %v7233_v0, %v7370_v36  ;;  %v7621_v25 = vpop.eup %5442  ;;  %5462 = vpow2.f32 %v2420_v28 }
 0x5e6   : > { %v7629_v32 = vpop.eup %5444  ;;  %v2553_v34 = vadd.f32 %v7543_v29, %v2552_v33  ;;  %5464 = vpow2.f32 %v2424_v18 }
 0x5e7   : > { %v2452_v42 = vmul.f32 1.442695, %v9882_v20  ;;  %v7636_v24 = vpop.eup %5446  ;;  %5466 = vpow2.f32 %v2428_v38  ;;  %v9883_v38 = vsub.f32 %v7239_v7, %v7370_v36  ;;  %v9884_v20 = vsub.f32 %v9844_v11, %v7370_v36 }
 0x5e8   : > { %v7644_v33 = vpop.eup %5448  ;;  %v2554_v18 = vadd.f32 %v7550_v51, %v2553_v34  ;;  %5468 = vpow2.f32 %v2432_v47 }
 0x5e9   : > { %v7651_v0 = vpop.eup %5450  ;;  %5470 = vpow2.f32 %v2436_v2  ;;  %v2456_v28 = vmul.f32 1.442695, %v9883_v38  ;;  %v2460_v30 = vmul.f32 1.442695, %v9884_v20 }
 0x5ea   : > { %v7659_v34 = vpop.eup %5452  ;;  %v2555_v47 = vadd.f32 %v7556_v54, %v2554_v18  ;;  %5472 = vpow2.f32 %v2440_v48  ;;  %v9885_v48 = vsub.f32 %v9845_v5, %v7370_v36  ;;  %v9890_v5 = vsub.f32 %v9850_v50, %v7370_v36 }
 0x5eb   : > { %v7667_v59 = vpop.eup %5454  ;;  %5474 = vpow2.f32 %v2444_v17  ;;  %v9886_v17 = vsub.f32 %v9846_v23, %v7370_v36  ;;  %v9889_v23 = vsub.f32 %v9849_v63, %v7370_v36  ;;  %v9893_v50 = vsub.f32 %v9853_v27, %v7370_v36 }
 0x5ec   : > { %v7672_v37 = vpop.eup %5456  ;;  %v2556_v46 = vadd.f32 %v7562_v16, %v2555_v47  ;;  %5476 = vpow2.f32 %v2448_v21  ;;  %v2464_v7 = vmul.f32 1.442695, %v9885_v48  ;;  %v9887_v21 = vsub.f32 %v9847_v12, %v7370_v36 }
 0x5ed   : > { %v7680_v38 = vpop.eup %5458  ;;  %5478 = vpow2.f32 %v2452_v42  ;;  %v2468_v11 = vmul.f32 1.442695, %v9886_v17  ;;  %v9888_v42 = vsub.f32 %v9848_v60, %v7370_v36  ;;  %v2480_v17 = vmul.f32 1.442695, %v9889_v23 }
 0x5ee   : > { %v5461_v20 = vpop.eup %5460  ;;  %v2557_v2 = vadd.f32 %v7567_v4, %v2556_v46  ;;  %5480 = vpow2.f32 %v2456_v28  ;;  %v2472_v47 = vmul.f32 1.442695, %v9887_v21  ;;  %v9891_v60 = vsub.f32 %v9851_v58, %v7370_v36 }
 0x5ef   : > { %v5463_v48 = vpop.eup %5462  ;;  %5482 = vpow2.f32 %v2460_v30  ;;  %v2476_v18 = vmul.f32 1.442695, %v9888_v42  ;;  %v2484_v30 = vmul.f32 1.442695, %v9890_v5  ;;  %v2496_v5 = vmul.f32 1.442695, %v9893_v50 }
 0x5f0   : > { %v5465_v10 = vpop.eup %5464  ;;  %v2558_v46 = vadd.f32 %v7573_v22, %v2557_v2  ;;  %5484 = vpow2.f32 %v2464_v7  ;;  %v2579_v28 = vadd.f32 %v5463_v48, %v5461_v20  ;;  %v4945_v12 = vpack.c.bf16 %v5463_v48, %v5461_v20 }
 0x5f1   : > { %v5467_v21 = vpop.eup %5466  ;;  %5486 = vpow2.f32 %v2468_v11  ;;  %v2488_v42 = vmul.f32 1.442695, %v9891_v60  ;;  %v9892_v11 = vsub.f32 %v9852_v6, %v7370_v36  ;;  %v9894_v58 = vpack.c.bf16 %v7462_v55, %v7454_v40 }
 0x5f2   : > { %v5469_v4 = vpop.eup %5468  ;;  %v2559_v63 = vadd.f32 %v7578_v49, %v2558_v46  ;;  %5488 = vpow2.f32 %v2472_v47  ;;  %v2580_v23 = vadd.f32 %v5465_v10, %v2579_v28  ;;  %4946 = vmatprep.subr.bf16.mxu0 %v4945_v12  ;;  %v4949_v2 = vpack.c.bf16 %v5467_v21, %v5465_v10 }
 0x5f3   : > { %v5471_v7 = vpop.eup %5470  ;;  %5490 = vpow2.f32 %v2476_v18  ;;  %v2492_v20 = vmul.f32 1.442695, %v9892_v11  ;;  %4948 = vmatpush1.bf16.msra.mxu0 %v9894_v58  ;;  %v9895_v6 = vsub.f32 %v9854_v14, %v7370_v36  ;;  %v9896_v27 = vsub.f32 %v9855_v41, %v7370_v36  ;;  %v9901_v58 = vld [vmem:[#allocation73_spill] sm:$0xff] }
 0x5f4   : > { %v5473_v48 = vpop.eup %5472  ;;  %v2560_v47 = vadd.f32 %v7584_v15, %v2559_v63  ;;  %5492 = vpow2.f32 %v2480_v17  ;;  %v2581_v46 = vadd.f32 %v5467_v21, %v2580_v23  ;;  %4950 = vmatprep.subr.bf16.mxu0 %v4949_v2  ;;  %v4953_v10 = vpack.c.bf16 %v5471_v7, %v5469_v4 }
 0x5f5   : > { %v5475_v18 = vpop.eup %5474  ;;  %5494 = vpow2.f32 %v2484_v30  ;;  %v2500_v28 = vmul.f32 1.442695, %v9895_v6  ;;  %v2504_v12 = vmul.f32 1.442695, %v9896_v27  ;;  %v9897_v21 = vsub.f32 %v9856_v44, %v7370_v36 }
 0x5f6   : > { %v5477_v60 = vpop.eup %5476  ;;  %v2561_v40 = vadd.f32 %v7592_v39, %v2560_v47  ;;  %5496 = vpow2.f32 %v2488_v42  ;;  %v2582_v55 = vadd.f32 %v5469_v4, %v2581_v46  ;;  %v4957_v63 = vpack.c.bf16 %v5475_v18, %v5473_v48 }
 0x5f7   : > { %v5479_v17 = vpop.eup %5478  ;;  %5498 = vpow2.f32 %v2492_v20  ;;  %v2508_v30 = vmul.f32 1.442695, %v9897_v21  ;;  %v9898_v14 = vsub.f32 %v9857_v8, %v7370_v36  ;;  %v9899_v41 = vpack.c.bf16 %v7478_v53, %v7470_v31 }
 0x5f8   : > { %v5481_v2 = vpop.eup %5480  ;;  %v2562_v11 = vadd.f32 %v7601_v19, %v2561_v40  ;;  %5500 = vpow2.f32 %v2496_v5  ;;  %v2583_v4 = vadd.f32 %v5471_v7, %v2582_v55  ;;  %v4961_v42 = vpack.c.bf16 %v5479_v17, %v5477_v60 }
 0x5f9   : > { %v2512_v23 = vmul.f32 1.442695, %v9898_v14  ;;  %4952 = vmatpush1.bf16.msra.mxu0 %v9899_v41  ;;  %v5483_v20 = vpop.eup %5482  ;;  %5502 = vpow2.f32 %v2500_v28  ;;  %v9900_v44 = vsub.f32 %v9858_v57, %v7370_v36  ;;  %v9902_v8 = vsub.f32 %v9901_v58, %v7370_v36  ;;  %v9904_v28 = vld [vmem:[#allocation75_spill] sm:$0xff] }
 0x5fa   : > { %4954 = vmatprep.subr.bf16.mxu0 %v4953_v10  ;;  %v5485_v46 = vpop.eup %5484  ;;  %v2563_v31 = vadd.f32 %v7612_v62, %v2562_v11  ;;  %5504 = vpow2.f32 %v2504_v12  ;;  %v2584_v53 = vadd.f32 %v5473_v48, %v2583_v4  ;;  %v4965_v6 = vpack.c.bf16 %v5483_v20, %v5481_v2 }
 0x5fb   : > { %v2516_v50 = vmul.f32 1.442695, %v9900_v44  ;;  %v2520_v47 = vmul.f32 1.442695, %v9902_v8  ;;  %v5487_v5 = vpop.eup %5486  ;;  %5506 = vpow2.f32 %v2508_v30  ;;  %v9903_v7 = vsub.f32 %v9860_v43, %v7370_v36 }
 0x5fc   : > { %v9905_v57 = vsub.f32 %v9904_v28, %v7370_v36  ;;  %v9906_v40 = vpack.c.bf16 %v7493_v13, %v7486_v1  ;;  %v5489_v55 = vpop.eup %5488  ;;  %v2564_v21 = vadd.f32 %v7621_v25, %v2563_v31  ;;  %5508 = vpow2.f32 %v2512_v23 }
 0x5fd   : > { %v2524_v10 = vmul.f32 1.442695, %v9903_v7  ;;  %v2585_v48 = vadd.f32 %v5475_v18, %v2584_v53  ;;  %v4969_v12 = vpack.c.bf16 %v5487_v5, %v5485_v46  ;;  %v5491_v30 = vpop.eup %5490  ;;  %5510 = vpow2.f32 %v2516_v50  ;;  %v9909_v18 = vld [vmem:[#allocation78_spill] sm:$0xff] }
 0x5fe   : > { %v2528_v27 = vmul.f32 1.442695, %v9905_v57  ;;  %4956 = vmatpush1.bf16.msra.mxu0 %v9906_v40  ;;  %v9907_v43 = vsub.f32 %v9862_v61, %v7370_v36  ;;  %v9908_v41 = vsub.f32 %v9863_v26, %v7370_v36  ;;  %v5493_v4 = vpop.eup %5492  ;;  %v2565_v13 = vadd.f32 %v7629_v32, %v2564_v21 }
 0x5ff   : > { %4958 = vmatprep.subr.bf16.mxu0 %v4957_v63  ;;  %5512 = vpow2.f32 %v2520_v47  ;;  %v2586_v1 = vadd.f32 %v5477_v60, %v2585_v48  ;;  %v4973_v44 = vpack.c.bf16 %v5491_v30, %v5489_v55  ;;  %v5495_v23 = vpop.eup %5494  ;;  %v9910_v63 = vsub.f32 %v9909_v18, %v7370_v36 }
 0x600   : > { %v2532_v14 = vmul.f32 1.442695, %v9907_v43  ;;  %v2536_v11 = vmul.f32 1.442695, %v9908_v41  ;;  %5514 = vpow2.f32 %v2524_v10  ;;  %v9911_v61 = vpack.c.bf16 %v7508_v45, %v7501_v52  ;;  %v5497_v58 = vpop.eup %5496 }
 0x601   : > { %v2540_v50 = vmul.f32 1.442695, %v9910_v63  ;;  %v2566_v26 = vadd.f32 %v7636_v24, %v2565_v13  ;;  %5516 = vpow2.f32 %v2528_v27  ;;  %v2587_v8 = vadd.f32 %v5479_v17, %v2586_v1  ;;  %v5499_v47 = vpop.eup %5498 }
 0x602   : > { %4960 = vmatpush1.bf16.msra.mxu0 %v9911_v61  ;;  %v4977_v31 = vpack.c.bf16 %v5495_v23, %v5493_v4  ;;  %5518 = vpow2.f32 %v2532_v14  ;;  %v5501_v60 = vpop.eup %5500  ;;  %v4981_v36 = vpack.c.bf16 %v5499_v47, %v5497_v58  ;;  %v9912_v45 = vpack.c.bf16 %v7523_v35, %v7516_v9 }
 0x603   : > { %4962 = vmatprep.subr.bf16.mxu0 %v4961_v42  ;;  %v2567_v53 = vadd.f32 %v7644_v33, %v2566_v26  ;;  %5520 = vpow2.f32 %v2536_v11  ;;  %v2588_v7 = vadd.f32 %v5481_v2, %v2587_v8  ;;  %v5503_v10 = vpop.eup %5502  ;;  %v9913_v43 = vpack.c.bf16 %v7537_v3, %v7531_v56 }
 0x604   : > { %5522 = vpow2.f32 %v2540_v50  ;;  %v5505_v52 = vpop.eup %5504  ;;  %v4985_v42 = vpack.c.bf16 %v5503_v10, %v5501_v60  ;;  %v9915_v26 = vpack.c.bf16 %v7562_v16, %v7556_v54  ;;  %v9919_v54 = vpack.c.bf16 %v7601_v19, %v7592_v39 }
 0x605   : > { %v2568_v28 = vadd.f32 %v7651_v0, %v2567_v53  ;;  %v2589_v17 = vadd.f32 %v5483_v20, %v2588_v7  ;;  %v5507_v57 = vpop.eup %5506  ;;  %v9922_v39 = vpack.c.bf16 %v7651_v0, %v7644_v33  ;;  %v9928_v33 = vld [vmem:[#allocation41_spill] sm:$0xff] }
 0x606   : > { %4964 = vmatpush1.bf16.msra.mxu0 %v9912_v45  ;;  %v5509_v27 = vpop.eup %5508  ;;  %v4989_v48 = vpack.c.bf16 %v5507_v57, %v5505_v52  ;;  %v9925_v45 = vld [vmem:[#allocation23_spill] sm:$0xff] }
 0x607   : > { %4966 = vmatprep.subr.bf16.mxu0 %v4965_v6  ;;  %v2569_v40 = vadd.f32 %v7659_v34, %v2568_v28  ;;  %v2590_v21 = vadd.f32 %v5485_v46, %v2589_v17  ;;  %v5511_v2 = vpop.eup %5510  ;;  %v9914_v46 = vpack.c.bf16 %v7550_v51, %v7543_v29  ;;  %v9916_v29 = vld [vmem:[#allocation38_spill] sm:$0xff]  ;;  %v9929_v28 = vld [vmem:[#allocation43_spill] sm:$0xff] }
 0x608   : > { %v4993_v41 = vpack.c.bf16 %v5511_v2, %v5509_v27  ;;  %v9917_v51 = vpack.c.bf16 %v7573_v22, %v9916_v29  ;;  %v9920_v22 = vpack.c.bf16 %v7621_v25, %v7612_v62  ;;  %v9923_v25 = vpack.c.bf16 %v7667_v59, %v7659_v34  ;;  %v9930_v17 = vld [vmem:[#allocation22_spill] sm:$0xff] }
 0x609   : > { %v5513_v14 = vpop.eup %5512  ;;  %v2570_v35 = vadd.f32 %v7667_v59, %v2569_v40  ;;  %v2591_v9 = vadd.f32 %v5487_v5, %v2590_v21  ;;  %v9936_v21 = vld [vmem:[#allocation42_spill] sm:$0xff] }
 0x60a   : > { %4968 = vmatpush1.bf16.msra.mxu0 %v9913_v43  ;;  %v5515_v20 = vpop.eup %5514 }
 0x60b   : > { %4970 = vmatprep.subr.bf16.mxu0 %v4969_v12  ;;  %v5517_v6 = vpop.eup %5516  ;;  %v2571_v11 = vadd.f32 %v7672_v37, %v2570_v35  ;;  %v2592_v13 = vadd.f32 %v5489_v55, %v2591_v9  ;;  %v4997_v1 = vpack.c.bf16 %v5515_v20, %v5513_v14  ;;  %v9942_v35 = vld [vmem:[#allocation47_spill] sm:$0xff]  ;;  %v9943_v9 = vld [vmem:[#allocation46_spill] sm:$0xff] }
 0x60c   : > { %v5519_v18 = vpop.eup %5518 }
 0x60d   : > { %v5521_v63 = vpop.eup %5520  ;;  %v7778_v3 = vadd.f32 %v7680_v38, %v2571_v11  ;;  %v2593_v56 = vadd.f32 %v5491_v30, %v2592_v13  ;;  %v5001_v5 = vpack.c.bf16 %v5519_v18, %v5517_v6  ;;  %v9918_v30 = vpack.c.bf16 %v7584_v15, %v7578_v49 }
 0x60e   : > { %4972 = vmatpush1.bf16.msra.mxu0 %v9914_v46  ;;  %v5523_v12 = vpop.eup %5522  ;;  %v9921_v49 = vpack.c.bf16 %v7636_v24, %v7629_v32  ;;  %v9924_v24 = vpack.c.bf16 %v7680_v38, %v7672_v37  ;;  %v9937_v37 = vld [vmem:[#allocation45_spill] sm:$0xff]  ;;  %v9938_v38 = vld [vmem:[#allocation26_spill] sm:$0xff]  ;;  %v2787_v46 = vpop.trf.xlu0 }
 0x60f   : > { %4974 = vmatprep.subr.bf16.mxu0 %v4973_v44  ;;  %v2594_v50 = vadd.f32 %v5493_v4, %v2593_v56  ;;  %v5005_v61 = vpack.c.bf16 %v5523_v12, %v5521_v63 }
 0x611   : > { %v2595_v55 = vadd.f32 %v5495_v23, %v2594_v50 }
 0x612   : > { %4976 = vmatpush1.bf16.msra.mxu0 %v9915_v26  ;;  %v2788_v56 = vpop.trf.xlu0 }
 0x613   : > { %4978 = vmatprep.subr.bf16.mxu0 %v4977_v31  ;;  %v2596_v8 = vadd.f32 %v5497_v58, %v2595_v55  ;;  %v2755_v31 = vpop.trf.xlu1 }
 0x615   : > { %v2597_v53 = vadd.f32 %v5499_v47, %v2596_v8 }
 0x616   : > { %4980 = vmatpush1.bf16.msra.mxu0 %v9917_v51 }
 0x617   : > { %4982 = vmatprep.subr.bf16.mxu0 %v4981_v36  ;;  %v2598_v7 = vadd.f32 %v5501_v60, %v2597_v53  ;;  %v2756_v19 = vpop.trf.xlu1 }
 0x619   : > { %v2599_v4 = vadd.f32 %v5503_v10, %v2598_v7 }
 0x61a   : > { %4984 = vmatpush1.bf16.msra.mxu0 %v9918_v30 }
 0x61b   : > { %4986 = vmatprep.subr.bf16.mxu0 %v4985_v42  ;;  %v2600_v44 = vadd.f32 %v5505_v52, %v2599_v4  ;;  %v2757_v32 = vpop.trf.xlu1  ;;  %v9926_v52 = vld [vmem:[#allocation21_spill] sm:$0xff]  ;;  %v9931_v42 = vld [vmem:[#allocation20_spill] sm:$0xff] }
 0x61c   : > { %v9927_v0 = vpack.c.bf16 %v9925_v45, %v9926_v52  ;;  %v9932_v59 = vpack.c.bf16 %v9930_v17, %v9931_v42 }
 0x61d   : > { %v2601_v16 = vadd.f32 %v5507_v57, %v2600_v44  ;;  %v9933_v57 = vld [vmem:[#allocation27_spill] sm:$0xff] }
 0x61e   : > { %4988 = vmatpush1.bf16.msra.mxu0 %v9919_v54 }
 0x61f   : > { %4990 = vmatprep.subr.bf16.mxu0 %v4989_v48  ;;  %v2602_v23 = vadd.f32 %v5509_v27, %v2601_v16  ;;  %v2758_v34 = vpop.trf.xlu1  ;;  %v9934_v27 = vld [vmem:[#allocation25_spill] sm:$0xff]  ;;  %v9939_v48 = vld [vmem:[#allocation24_spill] sm:$0xff] }
 0x620   : > { %v9935_v40 = vpack.c.bf16 %v9933_v57, %v9934_v27 }
 0x621   : > { %v2603_v58 = vadd.f32 %v5511_v2, %v2602_v23  ;;  %v9940_v2 = vpack.c.bf16 %v9938_v38, %v9939_v48 }
 0x622   : > { %4992 = vmatpush1.bf16.msra.mxu0 %v9920_v22 }
 0x623   : > { %4994 = vmatprep.subr.bf16.mxu0 %v4993_v41  ;;  %v2604_v47 = vadd.f32 %v5513_v14, %v2603_v58  ;;  %v2759_v43 = vpop.trf.xlu1  ;;  %v9941_v14 = vld [vmem:[#allocation44_spill] sm:$0xff]  ;;  %v9944_v41 = vmov 0.0  }
 0x624   : > { %v9945_v58 = vld [vmem:[#allocation40_spill] sm:$0xff] }
 0x625   : > { %v2605_v15 = vadd.f32 %v5515_v20, %v2604_v47 }
 0x626   : > { %4996 = vmatpush1.bf16.msra.mxu0 %v9921_v49 }
 0x627   : > { %4998 = vmatprep.subr.bf16.mxu0 %v4997_v1  ;;  %v2606_v60 = vadd.f32 %v5517_v6, %v2605_v15  ;;  %v2760_v20 = vpop.trf.xlu1 }
 0x629   : > { %v2607_v36 = vadd.f32 %v5519_v18, %v2606_v60 }
 0x62a   : > { %5000 = vmatpush1.bf16.msra.mxu0 %v9922_v39 }
 0x62b   : > { %5002 = vmatprep.subr.bf16.mxu0 %v5001_v5  ;;  %v2608_v62 = vadd.f32 %v5521_v63, %v2607_v36  ;;  %v2761_v6 = vpop.trf.xlu1 }
 0x62d   : > { %v7804_v10 = vadd.f32 %v5523_v12, %v2608_v62  ;;  %v2789_v12 = vpop.trf.xlu0 }
 0x62e   : > { %5004 = vmatpush1.bf16.msra.mxu0 %v9923_v25 }
 0x62f   : > { %5006 = vmatprep.subr.bf16.mxu0 %v5005_v61  ;;  %v2762_v11 = vpop.trf.xlu1  ;;  %v2610_v47 = vrot.slane %v7804_v10, 4 }
 0x631   : > { %v2790_v61 = vpop.trf.xlu0  ;;  %v2611_v15 = vadd.f32 %v2610_v47, %v7804_v10 }
 0x632   : > { %5008 = vmatpush1.bf16.msra.mxu0 %v9924_v24 }
 0x633   : > { %5010 = vmatprep.subr.bf16.mxu0 %v9927_v0  ;;  %v2763_v13 = vpop.trf.xlu1  ;;  %v2612_v39 = vrot.slane %v2611_v15, 2 }
 0x635   : > { %2681 = vmatmul.mubr.f32.vlgmr.msra.gmra.mrb[96].mxu0 %v9928_v33  ;;  %v2791_v55 = vpop.trf.xlu0  ;;  %v2613_v36 = vadd.f32 %v2612_v39, %v2611_v15 }
 0x636   : > { %2686 = vmatprep.mubr.f32.mxu0 %v9929_v28  ;;  %5012 = vmatpush1.bf16.msra.mxu0 %v9932_v59 }
 0x637   : > { %5014 = vmatprep.subr.bf16.mxu0 %v9935_v40  ;;  %v2764_v1 = vpop.trf.xlu1  ;;  %v2614_v25 = vrot.slane %v2613_v36, 1 }
 0x639   : > { %2687 = vmatmul.mubr.f32.gmra.mrb[98].mxu0 %v9936_v21  ;;  %v2792_v29 = vpop.trf.xlu0  ;;  %v2615_v24 = vadd.f32 %v2614_v25, %v2613_v36 }
 0x63a   : > { %2692 = vmatprep.mubr.f32.mxu0 %v9937_v37  ;;  %5016 = vmatpush1.bf16.msra.mxu0 %v9940_v2 }
 0x63b   : > { %v2765_v18 = vpop.trf.xlu1 }
 0x63d   : > { %2693 = vmatmul.mubr.f32.gmra.mrb[100].mxu0 %v9941_v14  ;;  %v2793_v51 = vpop.trf.xlu0 }
 0x63e   : > { %2698 = vmatprep.mubr.f32.mxu0 %v9942_v35 }
 0x63f   : > { %v2766_v63 = vpop.trf.xlu1 }
 0x641   : > { %2699 = vmatmul.mubr.f32.gmra.mrb[102].mxu0 %v9943_v9  ;;  %v2794_v53 = vpop.trf.xlu0 }
 0x642   : > { %2963 = vmatprep.mubr.f32.mxu0 %v9944_v41 }
 0x643   : > { %v2767_v5 = vpop.trf.xlu1 }
 0x645   : > { %4794 = vmatmul.mubr.msk.f32.vlgmr.msra.gmra.mrb[104].mxu0 %vm1042_vm2, %v2755_v31  ;;  %v2795_v7 = vpop.trf.xlu0  ;;  %v2573_v31 = vrot.slane %v7778_v3, 4 }
 0x646   : > { %2969 = vmatprep.mubr.f32.mxu0 %v9944_v41 }
 0x647   : > { %v2768_v50 = vpop.trf.xlu1  ;;  %v2574_v49 = vadd.f32 %v2573_v31, %v7778_v3 }
 0x649   : > { %4795 = vmatmul.mubr.msk.f32.gmra.mrb[106].mxu0 %vm1042_vm2, %v2756_v19  ;;  %v2796_v30 = vpop.trf.xlu0  ;;  %v2575_v60 = vrot.slane %v2574_v49, 2 }
 0x64a   : > { %2975 = vmatprep.mubr.f32.mxu0 %v9944_v41 }
 0x64b   : > { %v2769_v26 = vpop.trf.xlu1  ;;  %v2576_v19 = vadd.f32 %v2575_v60, %v2574_v49 }
 0x64d   : > { %4796 = vmatmul.mubr.msk.f32.gmra.mrb[108].mxu0 %vm1042_vm2, %v2757_v32  ;;  %v2797_v4 = vpop.trf.xlu0  ;;  %v2577_v62 = vrot.slane %v2576_v19, 1 }
 0x64e   : > { %2981 = vmatprep.mubr.f32.mxu0 %v9944_v41 }
 0x64f   : > { %v2770_v8 = vpop.trf.xlu1  ;;  %v2578_v32 = vadd.f32 %v2577_v62, %v2576_v19 }
 0x651   : > { %4797 = vmatmul.mubr.msk.f32.gmra.mrb[110].mxu0 %vm1042_vm2, %v2758_v34  ;;  %v2798_v44 = vpop.trf.xlu0  ;;  %5524 = vrcp.f32 %v2578_v32 }
 0x652   : > { %2987 = vmatprep.mubr.f32.mxu0 %v9944_v41  ;;  %5526 = vrcp.f32 %v2615_v24 }
 0x655   : > { %4798 = vmatmul.mubr.msk.f32.gmra.mrb[112].mxu0 %vm1042_vm2, %v2759_v43  ;;  %v2799_v54 = vpop.trf.xlu0 }
 0x656   : > { %2993 = vmatprep.mubr.f32.mxu0 %v9944_v41 }
 0x659   : > { %4799 = vmatmul.mubr.msk.f32.gmra.mrb[114].mxu0 %vm1042_vm2, %v2760_v20  ;;  %v2800_v16 = vpop.trf.xlu0 }
 0x65a   : > { %2999 = vmatprep.mubr.f32.mxu0 %v9944_v41 }
 0x65b   : > { %v5525_v45 = vpop.eup %5524 }
 0x65c   : > { %v5527_v0 = vpop.eup %5526 }
 0x65d   : > { %4800 = vmatmul.mubr.msk.f32.gmra.mrb[116].mxu0 %vm1042_vm2, %v2761_v6  ;;  %v2801_v23 = vpop.trf.xlu0 }
 0x65e   : > { %3005 = vmatprep.mubr.f32.mxu0 %v9944_v41 }
 0x661   : > { %4801 = vmatmul.mubr.msk.f32.gmra.mrb[118].mxu0 %vm1042_vm2, %v2762_v11  ;;  %v2802_v22 = vpop.trf.xlu0 }
 0x662   : > { %3011 = vmatprep.mubr.f32.mxu0 %v9944_v41 }
 0x665   : > { %4802 = vmatmul.mubr.msk.f32.gmra.mrb[120].mxu0 %vm1042_vm2, %v2763_v13 }
 0x666   : > { %3017 = vmatprep.mubr.f32.mxu0 %v9944_v41 }
 0x669   : > { %4803 = vmatmul.mubr.msk.f32.gmra.mrb[122].mxu0 %vm1042_vm2, %v2764_v1 }
 0x66a   : > { %3023 = vmatprep.mubr.f32.mxu0 %v9944_v41 }
 0x66d   : > { %4804 = vmatmul.mubr.msk.f32.gmra.mrb[124].mxu0 %vm1042_vm2, %v2765_v18 }
 0x66e   : > { %3029 = vmatprep.mubr.f32.mxu0 %v9944_v41 }
 0x671   : > { %4805 = vmatmul.mubr.msk.f32.gmra.mrb[126].mxu0 %vm1042_vm2, %v2766_v63 }
 0x672   : > { %3035 = vmatprep.mubr.f32.mxu0 %v9944_v41 }
 0x675   : > { %4806 = vmatmul.mubr.msk.f32.gmra.mrb[128].mxu0 %vm1042_vm2, %v2767_v5 }
 0x676   : > { %3041 = vmatprep.mubr.f32.mxu0 %v9944_v41 }
 0x679   : > { %4807 = vmatmul.mubr.msk.f32.gmra.mrb[130].mxu0 %vm1042_vm2, %v2768_v50 }
 0x67a   : > { %3047 = vmatprep.mubr.f32.mxu0 %v9944_v41 }
 0x67d   : > { %4808 = vmatmul.mubr.msk.f32.gmra.mrb[132].mxu0 %vm1042_vm2, %v2769_v26 }
 0x67e   : > { %3053 = vmatprep.mubr.f32.mxu0 %v9944_v41 }
 0x681   : > { %4809 = vmatmul.mubr.msk.f32.gmra.mrb[134].mxu0 %vm1042_vm2, %v2770_v8 }
 0x682   : > { %3059 = vmatprep.mubr.f32.mxu0 %v9944_v41 }
 0x685   : > { %4810 = vmatmul.mubr.msk.f32.gmra.mrb[136].mxu0 %vm1042_vm2, %v2787_v46 }
 0x686   : > { %3065 = vmatprep.mubr.f32.mxu0 %v9944_v41 }
 0x689   : > { %4811 = vmatmul.mubr.msk.f32.gmra.mrb[138].mxu0 %vm1042_vm2, %v2788_v56 }
 0x68a   : > { %3071 = vmatprep.mubr.f32.mxu0 %v9944_v41 }
 0x68d   : > { %4812 = vmatmul.mubr.msk.f32.gmra.mrb[140].mxu0 %vm1042_vm2, %v2789_v12 }
 0x68e   : > { %3077 = vmatprep.mubr.f32.mxu0 %v9944_v41 }
 0x691   : > { %4813 = vmatmul.mubr.msk.f32.gmra.mrb[142].mxu0 %vm1042_vm2, %v2790_v61 }
 0x692   : > { %3083 = vmatprep.mubr.f32.mxu0 %v9944_v41 }
 0x695   : > { %4814 = vmatmul.mubr.msk.f32.gmra.mrb[144].mxu0 %vm1042_vm2, %v2791_v55 }
 0x696   : > { %3089 = vmatprep.mubr.f32.mxu0 %v9944_v41 }
 0x699   : > { %4815 = vmatmul.mubr.msk.f32.gmra.mrb[146].mxu0 %vm1042_vm2, %v2792_v29 }
 0x69a   : > { %3095 = vmatprep.mubr.f32.mxu0 %v9944_v41 }
 0x69d   : > { %4816 = vmatmul.mubr.msk.f32.gmra.mrb[148].mxu0 %vm1042_vm2, %v2793_v51 }
 0x69e   : > { %3101 = vmatprep.mubr.f32.mxu0 %v9944_v41 }
 0x6a1   : > { %4817 = vmatmul.mubr.msk.f32.gmra.mrb[150].mxu0 %vm1042_vm2, %v2794_v53 }
 0x6a2   : > { %3107 = vmatprep.mubr.f32.mxu0 %v9944_v41 }
 0x6a5   : > { %4818 = vmatmul.mubr.msk.f32.gmra.mrb[152].mxu0 %vm1042_vm2, %v2795_v7 }
 0x6a6   : > { %3113 = vmatprep.mubr.f32.mxu0 %v9944_v41 }
 0x6a9   : > { %4819 = vmatmul.mubr.msk.f32.gmra.mrb[154].mxu0 %vm1042_vm2, %v2796_v30 }
 0x6aa   : > { %3119 = vmatprep.mubr.f32.mxu0 %v9944_v41 }
 0x6ad   : > { %4820 = vmatmul.mubr.msk.f32.gmra.mrb[156].mxu0 %vm1042_vm2, %v2797_v4 }
 0x6ae   : > { %3125 = vmatprep.mubr.f32.mxu0 %v9944_v41 }
 0x6b1   : > { %4821 = vmatmul.mubr.msk.f32.gmra.mrb[158].mxu0 %vm1042_vm2, %v2798_v44 }
 0x6b2   : > { %3131 = vmatprep.mubr.f32.mxu0 %v9944_v41 }
 0x6b5   : > { %4822 = vmatmul.mubr.msk.f32.gmra.mrb[160].mxu0 %vm1042_vm2, %v2799_v54 }
 0x6b6   : > { %3137 = vmatprep.mubr.f32.mxu0 %v9944_v41 }
 0x6b9   : > { %4823 = vmatmul.mubr.msk.f32.gmra.mrb[162].mxu0 %vm1042_vm2, %v2800_v16 }
 0x6ba   : > { %3143 = vmatprep.mubr.f32.mxu0 %v9944_v41 }
 0x6bd   : > { %4824 = vmatmul.mubr.msk.f32.gmra.mrb[164].mxu0 %vm1042_vm2, %v2801_v23 }
 0x6be   : > { %3149 = vmatprep.mubr.f32.mxu0 %v9944_v41 }
 0x6c1   : > { %4825 = vmatmul.mubr.msk.f32.gmra.mrb[166].mxu0 %vm1042_vm2, %v2802_v22 }
 0x6c2   : > { %4440 = vmatprep.mubr.f32.mxu0 %v9945_v58 }
 0x708   : > { %v2682_v52 = vpop.f32.mrb[96].mxu0 }
 0x709   : > { %v7897_v33 = vmul.f32 %v5525_v45, %v2682_v52  ;;  %v2684_v28 = vpop.f32.mrb[97].mxu0 }
 0x70a   : > { %v7899_v17 = vmul.f32 %v5527_v0, %v2684_v28 }
 0x70b   : > { %9946 = vst [vmem:[#allocation59_spill] sm:$0xff] %v7897_v33 }
 0x70c   : > { %9947 = vst [vmem:[#allocation60_spill] sm:$0xff] %v7899_v17  ;;  %v2688_v3 = vpop.f32.mrb[98].mxu0 }
 0x70d   : > { %v7901_v10 = vmul.f32 %v5525_v45, %v2688_v3  ;;  %v2690_v42 = vpop.f32.mrb[99].mxu0 }
 0x70e   : > { %v7903_v59 = vmul.f32 %v5527_v0, %v2690_v42 }
 0x70f   : > { %9948 = vst [vmem:[#allocation61_spill] sm:$0xff] %v7901_v10 }
 0x710   : > { %9949 = vst [vmem:[#allocation62_spill] sm:$0xff] %v7903_v59  ;;  %v2694_v27 = vpop.f32.mrb[100].mxu0 }
 0x711   : > { %v7909_v40 = vmul.f32 %v5525_v45, %v2694_v27  ;;  %v2696_v21 = vpop.f32.mrb[101].mxu0 }
 0x712   : > { %v7911_v37 = vmul.f32 %v5527_v0, %v2696_v21 }
 0x713   : > { %9950 = vst [vmem:[#allocation63_spill] sm:$0xff] %v7909_v40 }
 0x714   : > { %9951 = vst [vmem:[#allocation64_spill] sm:$0xff] %v7911_v37  ;;  %v2700_v38 = vpop.f32.mrb[102].mxu0 }
 0x715   : > { %v7913_v48 = vmul.f32 %v5525_v45, %v2700_v38  ;;  %v2702_v2 = vpop.f32.mrb[103].mxu0 }
 0x716   : > { %v7915_v43 = vmul.f32 %v5527_v0, %v2702_v2 }
 0x717   : > { %9952 = vst [vmem:[#allocation65_spill] sm:$0xff] %v7913_v48 }
 0x718   : > { %9953 = vst [vmem:[#allocation66_spill] sm:$0xff] %v7915_v43  ;;  %v7921_v9 = vpop.f32.mrb[104].mxu0 }
 0x719   : > { %v7923_v20 = vpop.f32.mrb[105].mxu0 }
 0x71c   : > { %v7925_v6 = vpop.f32.mrb[106].mxu0 }
 0x71d   : > { %v7927_v11 = vpop.f32.mrb[107].mxu0 }
 0x720   : > { %v7929_v13 = vpop.f32.mrb[108].mxu0 }
 0x721   : > { %v3156_v1 = vmax.f32 %v7921_v9, %v7929_v13  ;;  %v7933_v18 = vpop.f32.mrb[109].mxu0 }
 0x722   : > { %v3193_v46 = vmax.f32 %v7923_v20, %v7933_v18 }
 0x724   : > { %v7937_v63 = vpop.f32.mrb[110].mxu0 }
 0x725   : > { %v3157_v56 = vmax.f32 %v7925_v6, %v7937_v63  ;;  %v7941_v5 = vpop.f32.mrb[111].mxu0 }
 0x726   : > { %v3194_v12 = vmax.f32 %v7927_v11, %v7941_v5 }
 0x728   : > { %v7945_v50 = vpop.f32.mrb[112].mxu0 }
 0x729   : > { %v3158_v61 = vmax.f32 %v3156_v1, %v7945_v50  ;;  %v7948_v26 = vpop.f32.mrb[113].mxu0 }
 0x72a   : > { %v3195_v55 = vmax.f32 %v3193_v46, %v7948_v26 }
 0x72c   : > { %v7951_v8 = vpop.f32.mrb[114].mxu0 }
 0x72d   : > { %v3159_v29 = vmax.f32 %v3157_v56, %v7951_v8  ;;  %v7954_v51 = vpop.f32.mrb[115].mxu0 }
 0x72e   : > { %v3196_v53 = vmax.f32 %v3194_v12, %v7954_v51 }
 0x730   : > { %v7957_v7 = vpop.f32.mrb[116].mxu0 }
 0x731   : > { %v3160_v30 = vmax.f32 %v3158_v61, %v7957_v7  ;;  %v7960_v4 = vpop.f32.mrb[117].mxu0 }
 0x732   : > { %v3197_v44 = vmax.f32 %v3195_v55, %v7960_v4 }
 0x734   : > { %v7963_v54 = vpop.f32.mrb[118].mxu0 }
 0x735   : > { %v3161_v16 = vmax.f32 %v3159_v29, %v7963_v54  ;;  %v7966_v23 = vpop.f32.mrb[119].mxu0 }
 0x736   : > { %v3198_v22 = vmax.f32 %v3196_v53, %v7966_v23 }
 0x738   : > { %v7969_v58 = vpop.f32.mrb[120].mxu0 }
 0x739   : > { %v3162_v31 = vmax.f32 %v3160_v30, %v7969_v58  ;;  %v7972_v47 = vpop.f32.mrb[121].mxu0 }
 0x73a   : > { %v3199_v49 = vmax.f32 %v3197_v44, %v7972_v47 }
 0x73c   : > { %v7975_v15 = vpop.f32.mrb[122].mxu0 }
 0x73d   : > { %v3163_v60 = vmax.f32 %v3161_v16, %v7975_v15  ;;  %v7978_v39 = vpop.f32.mrb[123].mxu0 }
 0x73e   : > { %v3200_v19 = vmax.f32 %v3198_v22, %v7978_v39 }
 0x740   : > { %v7981_v36 = vpop.f32.mrb[124].mxu0 }
 0x741   : > { %v3164_v62 = vmax.f32 %v3162_v31, %v7981_v36  ;;  %v7984_v25 = vpop.f32.mrb[125].mxu0 }
 0x742   : > { %v3201_v32 = vmax.f32 %v3199_v49, %v7984_v25 }
 0x744   : > { %v7987_v24 = vpop.f32.mrb[126].mxu0 }
 0x745   : > { %v3165_v45 = vmax.f32 %v3163_v60, %v7987_v24  ;;  %v7990_v52 = vpop.f32.mrb[127].mxu0 }
 0x746   : > { %9954 = vst [vmem:[#allocation67_spill] sm:$0xff] %v7990_v52  ;;  %v3202_v0 = vmax.f32 %v3200_v19, %v7990_v52 }
 0x748   : > { %v7993_v28 = vpop.f32.mrb[128].mxu0 }
 0x749   : > { %v3166_v3 = vmax.f32 %v3164_v62, %v7993_v28  ;;  %v7996_v42 = vpop.f32.mrb[129].mxu0 }
 0x74a   : > { %9955 = vst [vmem:[#allocation68_spill] sm:$0xff] %v7996_v42  ;;  %v3203_v27 = vmax.f32 %v3201_v32, %v7996_v42 }
 0x74c   : > { %v7999_v21 = vpop.f32.mrb[130].mxu0 }
 0x74d   : > { %v3167_v38 = vmax.f32 %v3165_v45, %v7999_v21  ;;  %v8002_v2 = vpop.f32.mrb[131].mxu0 }
 0x74e   : > { %9956 = vst [vmem:[#allocation69_spill] sm:$0xff] %v8002_v2  ;;  %v3204_v1 = vmax.f32 %v3202_v0, %v8002_v2 }
 0x750   : > { %v8005_v46 = vpop.f32.mrb[132].mxu0 }
 0x751   : > { %v3168_v56 = vmax.f32 %v3166_v3, %v8005_v46  ;;  %v8008_v12 = vpop.f32.mrb[133].mxu0 }
 0x752   : > { %9957 = vst [vmem:[#allocation70_spill] sm:$0xff] %v8008_v12  ;;  %v3205_v61 = vmax.f32 %v3203_v27, %v8008_v12 }
 0x754   : > { %v8011_v55 = vpop.f32.mrb[134].mxu0 }
 0x755   : > { %v3169_v29 = vmax.f32 %v3167_v38, %v8011_v55  ;;  %v8014_v53 = vpop.f32.mrb[135].mxu0 }
 0x756   : > { %9958 = vst [vmem:[#allocation71_spill] sm:$0xff] %v8014_v53  ;;  %v3206_v30 = vmax.f32 %v3204_v1, %v8014_v53 }
 0x758   : > { %v8017_v44 = vpop.f32.mrb[136].mxu0 }
 0x759   : > { %v3170_v16 = vmax.f32 %v3168_v56, %v8017_v44  ;;  %v8020_v22 = vpop.f32.mrb[137].mxu0 }
 0x75a   : > { %9959 = vst [vmem:[#allocation72_spill] sm:$0xff] %v8020_v22  ;;  %v3207_v31 = vmax.f32 %v3205_v61, %v8020_v22 }
 0x75c   : > { %v8023_v49 = vpop.f32.mrb[138].mxu0 }
 0x75d   : > { %v3171_v60 = vmax.f32 %v3169_v29, %v8023_v49  ;;  %v8026_v19 = vpop.f32.mrb[139].mxu0 }
 0x75e   : > { %9960 = vst [vmem:[#allocation74_spill] sm:$0xff] %v8026_v19  ;;  %v3208_v62 = vmax.f32 %v3206_v30, %v8026_v19 }
 0x760   : > { %v8029_v32 = vpop.f32.mrb[140].mxu0 }
 0x761   : > { %v3172_v45 = vmax.f32 %v3170_v16, %v8029_v32  ;;  %v8032_v0 = vpop.f32.mrb[141].mxu0 }
 0x762   : > { %9961 = vst [vmem:[#allocation76_spill] sm:$0xff] %v8032_v0  ;;  %v3209_v3 = vmax.f32 %v3207_v31, %v8032_v0 }
 0x764   : > { %v8035_v27 = vpop.f32.mrb[142].mxu0 }
 0x765   : > { %v3173_v38 = vmax.f32 %v3171_v60, %v8035_v27  ;;  %v8038_v1 = vpop.f32.mrb[143].mxu0 }
 0x766   : > { %9962 = vst [vmem:[#allocation77_spill] sm:$0xff] %v8038_v1  ;;  %v3210_v56 = vmax.f32 %v3208_v62, %v8038_v1 }
 0x768   : > { %v8041_v61 = vpop.f32.mrb[144].mxu0 }
 0x769   : > { %v3174_v29 = vmax.f32 %v3172_v45, %v8041_v61  ;;  %v8044_v30 = vpop.f32.mrb[145].mxu0 }
 0x76a   : > { %9963 = vst [vmem:[#allocation73_spill] sm:$0xff] %v8044_v30  ;;  %v3211_v16 = vmax.f32 %v3209_v3, %v8044_v30 }
 0x76c   : > { %v8047_v14 = vpop.f32.mrb[146].mxu0 }
 0x76d   : > { %v3175_v31 = vmax.f32 %v3173_v38, %v8047_v14  ;;  %v8050_v35 = vpop.f32.mrb[147].mxu0 }
 0x76e   : > { %9964 = vst [vmem:[#allocation75_spill] sm:$0xff] %v8050_v35  ;;  %v3212_v60 = vmax.f32 %v3210_v56, %v8050_v35 }
 0x770   : > { %v8053_v34 = vpop.f32.mrb[148].mxu0 }
 0x771   : > { %v3176_v62 = vmax.f32 %v3174_v29, %v8053_v34  ;;  %v8056_v57 = vpop.f32.mrb[149].mxu0 }
 0x772   : > { %9965 = vst [vmem:[#allocation78_spill] sm:$0xff] %v8056_v57  ;;  %v3213_v45 = vmax.f32 %v3211_v16, %v8056_v57 }
 0x774   : > { %v8059_v40 = vpop.f32.mrb[150].mxu0 }
 0x775   : > { %v3177_v3 = vmax.f32 %v3175_v31, %v8059_v40  ;;  %v8062_v48 = vpop.f32.mrb[151].mxu0 }
 0x776   : > { %9966 = vst [vmem:[#allocation38_spill] sm:$0xff] %v8062_v48  ;;  %v3214_v38 = vmax.f32 %v3212_v60, %v8062_v48 }
 0x778   : > { %v8065_v37 = vpop.f32.mrb[152].mxu0 }
 0x779   : > { %v3178_v56 = vmax.f32 %v3176_v62, %v8065_v37  ;;  %v8068_v43 = vpop.f32.mrb[153].mxu0 }
 0x77a   : > { %9967 = vst [vmem:[#allocation23_spill] sm:$0xff] %v8068_v43  ;;  %v3215_v29 = vmax.f32 %v3213_v45, %v8068_v43 }
 0x77c   : > { %v8071_v33 = vpop.f32.mrb[154].mxu0 }
 0x77d   : > { %v3179_v16 = vmax.f32 %v3177_v3, %v8071_v33  ;;  %v8074_v10 = vpop.f32.mrb[155].mxu0 }
 0x77e   : > { %9968 = vst [vmem:[#allocation21_spill] sm:$0xff] %v8074_v10  ;;  %v3216_v31 = vmax.f32 %v3214_v38, %v8074_v10 }
 0x780   : > { %v8077_v17 = vpop.f32.mrb[156].mxu0 }
 0x781   : > { %v3180_v60 = vmax.f32 %v3178_v56, %v8077_v17  ;;  %v8080_v59 = vpop.f32.mrb[157].mxu0 }
 0x782   : > { %9969 = vst [vmem:[#allocation41_spill] sm:$0xff] %v8080_v59  ;;  %v3217_v62 = vmax.f32 %v3215_v29, %v8080_v59 }
 0x784   : > { %v8083_v41 = vpop.f32.mrb[158].mxu0 }
 0x785   : > { %v3181_v45 = vmax.f32 %v3179_v16, %v8083_v41  ;;  %v8086_v43 = vpop.f32.mrb[159].mxu0 }
 0x786   : > { %9970 = vst [vmem:[#allocation43_spill] sm:$0xff] %v8086_v43  ;;  %v3218_v3 = vmax.f32 %v3216_v31, %v8086_v43 }
 0x788   : > { %v8089_v48 = vpop.f32.mrb[160].mxu0 }
 0x789   : > { %v3182_v38 = vmax.f32 %v3180_v60, %v8089_v48  ;;  %v8092_v10 = vpop.f32.mrb[161].mxu0 }
 0x78a   : > { %9971 = vst [vmem:[#allocation22_spill] sm:$0xff] %v8092_v10  ;;  %v3219_v56 = vmax.f32 %v3217_v62, %v8092_v10 }
 0x78c   : > { %v8095_v57 = vpop.f32.mrb[162].mxu0 }
 0x78d   : > { %v3183_v29 = vmax.f32 %v3181_v45, %v8095_v57  ;;  %v8098_v59 = vpop.f32.mrb[163].mxu0 }
 0x78e   : > { %9972 = vst [vmem:[#allocation20_spill] sm:$0xff] %v8098_v59  ;;  %v3220_v16 = vmax.f32 %v3218_v3, %v8098_v59 }
 0x790   : > { %v8101_v35 = vpop.f32.mrb[164].mxu0 }
 0x791   : > { %v3184_v31 = vmax.f32 %v3182_v38, %v8101_v35  ;;  %v8104_v43 = vpop.f32.mrb[165].mxu0 }
 0x792   : > { %9973 = vst [vmem:[#allocation27_spill] sm:$0xff] %v8104_v43  ;;  %v3221_v60 = vmax.f32 %v3219_v56, %v8104_v43 }
 0x794   : > { %v8107_v30 = vpop.f32.mrb[166].mxu0 }
 0x795   : > { %v3185_v62 = vmax.f32 %v3183_v29, %v8107_v30  ;;  %v8110_v10 = vpop.f32.mrb[167].mxu0 }
 0x796   : > { %9974 = vst [vmem:[#allocation25_spill] sm:$0xff] %v8110_v10  ;;  %v3222_v45 = vmax.f32 %v3220_v16, %v8110_v10 }
 0x797   : > { %v3186_v1 = vmax.f32 %v3184_v31, %v3185_v62 }
 0x798   : > { %v3223_v0 = vmax.f32 %v3221_v60, %v3222_v45 }
 0x799   : > { %v3187_v19 = vrot.slane %v3186_v1, 4 }
 0x79a   : > { %v3224_v3 = vrot.slane %v3223_v0, 4 }
 0x79b   : > { %v3188_v59 = vmax.f32 %v3186_v1, %v3187_v19 }
 0x79c   : > { %v3225_v22 = vmax.f32 %v3223_v0, %v3224_v3 }
 0x79d   : > { %v3189_v53 = vrot.slane %v3188_v59, 2 }
 0x79e   : > { %v3226_v38 = vrot.slane %v3225_v22, 2 }
 0x79f   : > { %v3190_v12 = vmax.f32 %v3188_v59, %v3189_v53  ;;  %v9994_v53 = vld [vmem:[#allocation27_spill] sm:$0xff] }
 0x7a0   : > { %v3227_v2 = vmax.f32 %v3225_v22, %v3226_v38 }
 0x7a1   : > { %v3191_v42 = vrot.slane %v3190_v12, 1 }
 0x7a2   : > { %v3228_v56 = vrot.slane %v3227_v2, 1 }
 0x7a3   : > { %v8113_v43 = vmax.f32 %v3190_v12, %v3191_v42 }
 0x7a4   : > { %v8115_v52 = vmax.f32 %v3227_v2, %v3228_v56 }
 0x7a5   : > { %v3230_v29 = vsub.f32 %v7921_v9, %v8113_v43  ;;  %v3232_v16 = vsub.f32 %v7925_v6, %v8113_v43  ;;  %v3234_v19 = vsub.f32 %v7929_v13, %v8113_v43  ;;  %v3236_v0 = vsub.f32 %v7937_v63, %v8113_v43 }
 0x7a6   : > { %v3238_v59 = vsub.f32 %v7945_v50, %v8113_v43  ;;  %v3240_v42 = vsub.f32 %v7951_v8, %v8113_v43  ;;  %v3242_v2 = vsub.f32 %v7957_v7, %v8113_v43  ;;  %v3244_v9 = vsub.f32 %v7963_v54, %v8113_v43 }
 0x7a7   : > { %v3246_v6 = vsub.f32 %v7969_v58, %v8113_v43  ;;  %v3248_v13 = vsub.f32 %v7975_v15, %v8113_v43  ;;  %v3250_v63 = vsub.f32 %v7981_v36, %v8113_v43  ;;  %v3252_v50 = vsub.f32 %v7987_v24, %v8113_v43 }
 0x7a8   : > { %v3254_v8 = vsub.f32 %v7993_v28, %v8113_v43  ;;  %v3256_v7 = vsub.f32 %v7999_v21, %v8113_v43  ;;  %v3258_v54 = vsub.f32 %v8005_v46, %v8113_v43  ;;  %v3260_v58 = vsub.f32 %v8011_v55, %v8113_v43 }
 0x7a9   : > { %v3262_v15 = vsub.f32 %v8017_v44, %v8113_v43  ;;  %v3264_v36 = vsub.f32 %v8023_v49, %v8113_v43  ;;  %v3266_v24 = vsub.f32 %v8029_v32, %v8113_v43  ;;  %v3268_v28 = vsub.f32 %v8035_v27, %v8113_v43 }
 0x7aa   : > { %v3270_v21 = vsub.f32 %v8041_v61, %v8113_v43  ;;  %v3272_v46 = vsub.f32 %v8047_v14, %v8113_v43  ;;  %v3274_v12 = vsub.f32 %v8053_v34, %v8113_v43  ;;  %v3276_v55 = vsub.f32 %v8059_v40, %v8113_v43 }
 0x7ab   : > { %v3294_v27 = vmul.f32 1.442695, %v3230_v29  ;;  %v3298_v1 = vmul.f32 1.442695, %v3232_v16  ;;  %v3302_v61 = vmul.f32 1.442695, %v3234_v19 }
 0x7ac   : > { %v3306_v60 = vmul.f32 1.442695, %v3236_v0  ;;  %v3310_v45 = vmul.f32 1.442695, %v3238_v59  ;;  %v3314_v3 = vmul.f32 1.442695, %v3240_v42 }
 0x7ad   : > { %5528 = vpow2.f32 %v3294_v27  ;;  %v3318_v38 = vmul.f32 1.442695, %v3242_v2  ;;  %v3322_v56 = vmul.f32 1.442695, %v3244_v9  ;;  %v3326_v40 = vmul.f32 1.442695, %v3246_v6 }
 0x7ae   : > { %5530 = vpow2.f32 %v3298_v1  ;;  %v3330_v32 = vmul.f32 1.442695, %v3248_v13  ;;  %v3334_v29 = vmul.f32 1.442695, %v3250_v63  ;;  %v3338_v16 = vmul.f32 1.442695, %v3252_v50 }
 0x7af   : > { %5532 = vpow2.f32 %v3302_v61  ;;  %v3342_v19 = vmul.f32 1.442695, %v3254_v8  ;;  %v3346_v31 = vmul.f32 1.442695, %v3256_v7  ;;  %v3350_v0 = vmul.f32 1.442695, %v3258_v54 }
 0x7b0   : > { %5534 = vpow2.f32 %v3306_v60  ;;  %v3354_v34 = vmul.f32 1.442695, %v3260_v58  ;;  %v3358_v62 = vmul.f32 1.442695, %v3262_v15  ;;  %v3362_v27 = vmul.f32 1.442695, %v3264_v36 }
 0x7b1   : > { %5536 = vpow2.f32 %v3310_v45  ;;  %v3366_v59 = vmul.f32 1.442695, %v3266_v24  ;;  %v3370_v42 = vmul.f32 1.442695, %v3268_v28  ;;  %v3374_v1 = vmul.f32 1.442695, %v3270_v21 }
 0x7b2   : > { %5538 = vpow2.f32 %v3314_v3  ;;  %v8185_v2 = vmul.f32 1.442695, %v3272_v46  ;;  %v8187_v9 = vmul.f32 1.442695, %v3274_v12  ;;  %v8189_v6 = vmul.f32 1.442695, %v3276_v55 }
 0x7b3   : > { %5540 = vpow2.f32 %v3318_v38  ;;  %v9975_v21 = vld [vmem:[#allocation67_spill] sm:$0xff]  ;;  %v9977_v61 = vld [vmem:[#allocation69_spill] sm:$0xff]  ;;  %v9978_v3 = vld [vmem:[#allocation70_spill] sm:$0xff] }
 0x7b4   : > { %5542 = vpow2.f32 %v3322_v56  ;;  %v9979_v56 = vld [vmem:[#allocation71_spill] sm:$0xff]  ;;  %v9981_v28 = vld [vmem:[#allocation74_spill] sm:$0xff]  ;;  %v9982_v24 = vld [vmem:[#allocation76_spill] sm:$0xff] }
 0x7b5   : > { %5544 = vpow2.f32 %v3326_v40  ;;  %v9976_v40 = vld [vmem:[#allocation68_spill] sm:$0xff]  ;;  %v9983_v38 = vld [vmem:[#allocation77_spill] sm:$0xff]  ;;  %v9985_v54 = vld [vmem:[#allocation75_spill] sm:$0xff] }
 0x7b6   : > { %5546 = vpow2.f32 %v3330_v32  ;;  %v9984_v58 = vld [vmem:[#allocation73_spill] sm:$0xff]  ;;  %v9986_v60 = vld [vmem:[#allocation78_spill] sm:$0xff] }
 0x7b7   : > { %v8199_v7 = vpop.eup %5528  ;;  %5548 = vpow2.f32 %v3334_v29  ;;  %v9987_v50 = vld [vmem:[#allocation38_spill] sm:$0xff]  ;;  %v9988_v29 = vld [vmem:[#allocation23_spill] sm:$0xff]  ;;  %v9989_v13 = vld [vmem:[#allocation21_spill] sm:$0xff] }
 0x7b8   : > { %v8207_v36 = vpop.eup %5530  ;;  %5550 = vpow2.f32 %v3338_v16  ;;  %v9980_v16 = vld [vmem:[#allocation72_spill] sm:$0xff] }
 0x7b9   : > { %v8215_v12 = vpop.eup %5532  ;;  %5552 = vpow2.f32 %v3342_v19  ;;  %v3422_v55 = vadd.f32 %v8207_v36, %v8199_v7  ;;  %v9993_v19 = vld [vmem:[#allocation20_spill] sm:$0xff] }
 0x7ba   : > { %v8223_v45 = vpop.eup %5534  ;;  %5554 = vpow2.f32 %v3346_v31  ;;  %v9991_v31 = vld [vmem:[#allocation43_spill] sm:$0xff] }
 0x7bb   : > { %v8231_v46 = vpop.eup %5536  ;;  %5556 = vpow2.f32 %v3350_v0  ;;  %v3423_v32 = vadd.f32 %v8215_v12, %v3422_v55 }
 0x7bc   : > { %v8238_v15 = vpop.eup %5538  ;;  %5558 = vpow2.f32 %v3354_v34 }
 0x7bd   : > { %v8246_v8 = vpop.eup %5540  ;;  %5560 = vpow2.f32 %v3358_v62  ;;  %v3424_v55 = vadd.f32 %v8223_v45, %v3423_v32 }
 0x7be   : > { %v8253_v63 = vpop.eup %5542  ;;  %5562 = vpow2.f32 %v3362_v27 }
 0x7bf   : > { %v8261_v49 = vpop.eup %5544  ;;  %5564 = vpow2.f32 %v3366_v59  ;;  %v3425_v32 = vadd.f32 %v8231_v46, %v3424_v55  ;;  %v9995_v55 = vsub.f32 %v8065_v37, %v8113_v43 }
 0x7c0   : > { %v8268_v44 = vpop.eup %5546  ;;  %5566 = vpow2.f32 %v3370_v42  ;;  %v9996_v42 = vsub.f32 %v8071_v33, %v8113_v43 }
 0x7c1   : > { %v8276_v14 = vpop.eup %5548  ;;  %5568 = vpow2.f32 %v3374_v1  ;;  %v3390_v34 = vmul.f32 1.442695, %v9995_v55  ;;  %v3426_v27 = vadd.f32 %v8238_v15, %v3425_v32  ;;  %v9997_v1 = vsub.f32 %v8077_v17, %v8113_v43 }
 0x7c2   : > { %v8282_v22 = vpop.eup %5550  ;;  %5570 = vpow2.f32 %v8185_v2  ;;  %v3394_v62 = vmul.f32 1.442695, %v9996_v42  ;;  %v9998_v2 = vsub.f32 %v8083_v41, %v8113_v43  ;;  %v10002_v41 = vsub.f32 %v8101_v35, %v8113_v43 }
 0x7c3   : > { %v8288_v0 = vpop.eup %5552  ;;  %5572 = vpow2.f32 %v8187_v9  ;;  %v3398_v59 = vmul.f32 1.442695, %v9997_v1  ;;  %v3427_v37 = vadd.f32 %v8246_v8, %v3426_v27  ;;  %v9999_v9 = vsub.f32 %v8089_v48, %v8113_v43 }
 0x7c4   : > { %v8295_v55 = vpop.eup %5554  ;;  %5574 = vpow2.f32 %v8189_v6  ;;  %v3402_v32 = vmul.f32 1.442695, %v9998_v2  ;;  %v10000_v27 = vsub.f32 %v8095_v57, %v8113_v43 }
 0x7c5   : > { %v8301_v33 = vpop.eup %5556  ;;  %5576 = vpow2.f32 %v3390_v34  ;;  %v3406_v42 = vmul.f32 1.442695, %v9999_v9  ;;  %v3428_v17 = vadd.f32 %v8253_v63, %v3427_v37  ;;  %v3414_v34 = vmul.f32 1.442695, %v10002_v41 }
 0x7c6   : > { %v8307_v1 = vpop.eup %5558  ;;  %5578 = vpow2.f32 %v3394_v62  ;;  %v3410_v6 = vmul.f32 1.442695, %v10000_v27  ;;  %v10003_v37 = vsub.f32 %v8107_v30, %v8113_v43  ;;  %v10006_v43 = vsub.f32 %v7933_v18, %v8115_v52 }
 0x7c7   : > { %v8312_v10 = vpop.eup %5560  ;;  %5580 = vpow2.f32 %v3398_v59  ;;  %v3429_v2 = vadd.f32 %v8261_v49, %v3428_v17  ;;  %v10004_v59 = vsub.f32 %v7923_v20, %v8115_v52  ;;  %v10005_v17 = vsub.f32 %v7927_v11, %v8115_v52 }
 0x7c8   : > { %10001 = vst [vmem:[#allocation42_spill] sm:$0xff] %v8312_v10  ;;  %v8318_v48 = vpop.eup %5562  ;;  %5582 = vpow2.f32 %v3402_v32  ;;  %v3418_v62 = vmul.f32 1.442695, %v10003_v37  ;;  %v3304_v30 = vmul.f32 1.442695, %v10006_v43  ;;  %v10007_v20 = vsub.f32 %v7941_v5, %v8115_v52 }
 0x7c9   : > { %v8323_v9 = vpop.eup %5564  ;;  %5584 = vpow2.f32 %v3406_v42  ;;  %v3430_v57 = vadd.f32 %v8268_v44, %v3429_v2  ;;  %v3296_v27 = vmul.f32 1.442695, %v10004_v59  ;;  %v3300_v32 = vmul.f32 1.442695, %v10005_v17 }
 0x7ca   : > { %v8329_v35 = vpop.eup %5566  ;;  %5586 = vpow2.f32 %v3410_v6  ;;  %v3308_v2 = vmul.f32 1.442695, %v10007_v20  ;;  %v10008_v6 = vsub.f32 %v7948_v26, %v8115_v52  ;;  %v10009_v11 = vsub.f32 %v7954_v51, %v8115_v52 }
 0x7cb   : > { %v8337_v41 = vpop.eup %5568  ;;  %5588 = vpow2.f32 %v3414_v34  ;;  %v3431_v42 = vadd.f32 %v8276_v14, %v3430_v57  ;;  %v10010_v34 = vsub.f32 %v7960_v4, %v8115_v52  ;;  %v10011_v57 = vsub.f32 %v7966_v23, %v8115_v52 }
 0x7cc   : > { %v3312_v37 = vmul.f32 1.442695, %v10008_v6  ;;  %v8346_v59 = vpop.eup %5570  ;;  %5590 = vpow2.f32 %v3418_v62  ;;  %v3316_v18 = vmul.f32 1.442695, %v10009_v11  ;;  %v10012_v62 = vsub.f32 %v7972_v47, %v8115_v52 }
 0x7cd   : > { %v3320_v17 = vmul.f32 1.442695, %v10010_v34  ;;  %v3324_v5 = vmul.f32 1.442695, %v10011_v57  ;;  %v8357_v43 = vpop.eup %5572  ;;  %v3432_v26 = vadd.f32 %v8282_v22, %v3431_v42  ;;  %5592 = vpow2.f32 %v3296_v27 }
 0x7ce   : > { %v3328_v20 = vmul.f32 1.442695, %v10012_v62  ;;  %v10013_v51 = vsub.f32 %v7978_v39, %v8115_v52  ;;  %v8366_v11 = vpop.eup %5574  ;;  %5594 = vpow2.f32 %v3300_v32 }
 0x7cf   : > { %v8374_v42 = vpop.eup %5576  ;;  %v3433_v47 = vadd.f32 %v8288_v0, %v3432_v26  ;;  %5596 = vpow2.f32 %v3304_v30 }
 0x7d0   : > { %v3332_v6 = vmul.f32 1.442695, %v10013_v51  ;;  %v8381_v34 = vpop.eup %5578  ;;  %5598 = vpow2.f32 %v3308_v2  ;;  %v10014_v2 = vsub.f32 %v7984_v25, %v8115_v52  ;;  %v10015_v51 = vsub.f32 %v9975_v21, %v8115_v52 }
 0x7d1   : > { %v8389_v26 = vpop.eup %5580  ;;  %v3434_v30 = vadd.f32 %v8295_v55, %v3433_v47  ;;  %5600 = vpow2.f32 %v3312_v37 }
 0x7d2   : > { %v8396_v39 = vpop.eup %5582  ;;  %5602 = vpow2.f32 %v3316_v18  ;;  %v3336_v32 = vmul.f32 1.442695, %v10014_v2  ;;  %v3340_v62 = vmul.f32 1.442695, %v10015_v51 }
 0x7d3   : > { %v8404_v47 = vpop.eup %5584  ;;  %v3435_v37 = vadd.f32 %v8301_v33, %v3434_v30  ;;  %5604 = vpow2.f32 %v3320_v17  ;;  %v10016_v17 = vsub.f32 %v9976_v40, %v8115_v52  ;;  %v10021_v40 = vsub.f32 %v9981_v28, %v8115_v52 }
 0x7d4   : > { %v8412_v27 = vpop.eup %5586  ;;  %5606 = vpow2.f32 %v3324_v5  ;;  %v10017_v5 = vsub.f32 %v9977_v61, %v8115_v52  ;;  %v10020_v61 = vsub.f32 %v9980_v16, %v8115_v52  ;;  %v10024_v28 = vsub.f32 %v9984_v58, %v8115_v52 }
 0x7d5   : > { %v8417_v57 = vpop.eup %5588  ;;  %v3436_v23 = vadd.f32 %v8307_v1, %v3435_v37  ;;  %5608 = vpow2.f32 %v3328_v20  ;;  %v3344_v25 = vmul.f32 1.442695, %v10016_v17  ;;  %v10018_v20 = vsub.f32 %v9978_v3, %v8115_v52 }
 0x7d6   : > { %v8425_v2 = vpop.eup %5590  ;;  %5610 = vpow2.f32 %v3332_v6  ;;  %v3348_v21 = vmul.f32 1.442695, %v10017_v5  ;;  %v10019_v6 = vsub.f32 %v9979_v56, %v8115_v52  ;;  %v3360_v5 = vmul.f32 1.442695, %v10020_v61 }
 0x7d7   : > { %v5593_v51 = vpop.eup %5592  ;;  %v3437_v18 = vadd.f32 %v8312_v10, %v3436_v23  ;;  %5612 = vpow2.f32 %v3336_v32  ;;  %v3352_v37 = vmul.f32 1.442695, %v10018_v20  ;;  %v10022_v56 = vsub.f32 %v9982_v24, %v8115_v52 }
 0x7d8   : > { %v5595_v17 = vpop.eup %5594  ;;  %5614 = vpow2.f32 %v3340_v62  ;;  %v3356_v30 = vmul.f32 1.442695, %v10019_v6  ;;  %v3364_v62 = vmul.f32 1.442695, %v10021_v40  ;;  %v3376_v40 = vmul.f32 1.442695, %v10024_v28 }
 0x7d9   : > { %v5597_v4 = vpop.eup %5596  ;;  %v3438_v23 = vadd.f32 %v8318_v48, %v3437_v18  ;;  %5616 = vpow2.f32 %v3344_v25  ;;  %v3459_v32 = vadd.f32 %v5595_v17, %v5593_v51  ;;  %v5017_v3 = vpack.c.bf16 %v5595_v17, %v5593_v51 }
 0x7da   : > { %v5599_v20 = vpop.eup %5598  ;;  %5618 = vpow2.f32 %v3348_v21  ;;  %v3368_v6 = vmul.f32 1.442695, %v10022_v56  ;;  %v10023_v21 = vsub.f32 %v9983_v38, %v8115_v52  ;;  %v10025_v24 = vpack.c.bf16 %v8207_v36, %v8199_v7 }
 0x7db   : > { %v5601_v10 = vpop.eup %5600  ;;  %v3439_v16 = vadd.f32 %v8323_v9, %v3438_v23  ;;  %5620 = vpow2.f32 %v3352_v37  ;;  %v3460_v61 = vadd.f32 %v5597_v4, %v3459_v32  ;;  %5018 = vmatprep.subr.bf16.mxu1 %v5017_v3  ;;  %v5021_v18 = vpack.c.bf16 %v5599_v20, %v5597_v4 }
 0x7dc   : > { %v5603_v25 = vpop.eup %5602  ;;  %5622 = vpow2.f32 %v3356_v30  ;;  %v3372_v51 = vmul.f32 1.442695, %v10023_v21  ;;  %5020 = vmatpush1.bf16.msra.mxu1 %v10025_v24  ;;  %v10026_v38 = vsub.f32 %v9985_v54, %v8115_v52  ;;  %v10027_v58 = vsub.f32 %v9986_v60, %v8115_v52  ;;  %v10032_v24 = vld [vmem:[#allocation41_spill] sm:$0xff] }
 0x7dd   : > { %v5605_v17 = vpop.eup %5604  ;;  %v3440_v37 = vadd.f32 %v8329_v35, %v3439_v16  ;;  %5624 = vpow2.f32 %v3360_v5  ;;  %v3461_v23 = vadd.f32 %v5599_v20, %v3460_v61  ;;  %5022 = vmatprep.subr.bf16.mxu1 %v5021_v18  ;;  %v5025_v4 = vpack.c.bf16 %v5603_v25, %v5601_v10 }
 0x7de   : > { %v5607_v30 = vpop.eup %5606  ;;  %5626 = vpow2.f32 %v3364_v62  ;;  %v3380_v32 = vmul.f32 1.442695, %v10026_v38  ;;  %v3384_v3 = vmul.f32 1.442695, %v10027_v58  ;;  %v10028_v20 = vsub.f32 %v9987_v50, %v8115_v52 }
 0x7df   : > { %v5609_v56 = vpop.eup %5608  ;;  %v3441_v7 = vadd.f32 %v8337_v41, %v3440_v37  ;;  %5628 = vpow2.f32 %v3368_v6  ;;  %v3462_v36 = vadd.f32 %v5601_v10, %v3461_v23  ;;  %v5029_v16 = vpack.c.bf16 %v5607_v30, %v5605_v17 }
 0x7e0   : > { %v5611_v5 = vpop.eup %5610  ;;  %5630 = vpow2.f32 %v3372_v51  ;;  %v3388_v62 = vmul.f32 1.442695, %v10028_v20  ;;  %v10029_v54 = vsub.f32 %v9988_v29, %v8115_v52  ;;  %v10030_v60 = vpack.c.bf16 %v8223_v45, %v8215_v12 }
 0x7e1   : > { %v5613_v18 = vpop.eup %5612  ;;  %v3442_v21 = vadd.f32 %v8346_v59, %v3441_v7  ;;  %5632 = vpow2.f32 %v3376_v40  ;;  %v3463_v10 = vadd.f32 %v5603_v25, %v3462_v36  ;;  %v5033_v6 = vpack.c.bf16 %v5611_v5, %v5609_v56 }
 0x7e2   : > { %v3392_v61 = vmul.f32 1.442695, %v10029_v54  ;;  %5024 = vmatpush1.bf16.msra.mxu1 %v10030_v60  ;;  %v5615_v51 = vpop.eup %5614  ;;  %5634 = vpow2.f32 %v3380_v32  ;;  %v10031_v50 = vsub.f32 %v9989_v13, %v8115_v52  ;;  %v10033_v29 = vsub.f32 %v10032_v24, %v8115_v52  ;;  %v10035_v32 = vld [vmem:[#allocation22_spill] sm:$0xff] }
 0x7e3   : > { %5026 = vmatprep.subr.bf16.mxu1 %v5025_v4  ;;  %v5617_v23 = vpop.eup %5616  ;;  %v3443_v12 = vadd.f32 %v8357_v43, %v3442_v21  ;;  %5636 = vpow2.f32 %v3384_v3  ;;  %v3464_v45 = vadd.f32 %v5605_v17, %v3463_v10  ;;  %v5037_v38 = vpack.c.bf16 %v5615_v51, %v5613_v18 }
 0x7e4   : > { %v3396_v28 = vmul.f32 1.442695, %v10031_v50  ;;  %v3400_v37 = vmul.f32 1.442695, %v10033_v29  ;;  %v5619_v40 = vpop.eup %5618  ;;  %5638 = vpow2.f32 %v3388_v62  ;;  %v10034_v25 = vsub.f32 %v9991_v31, %v8115_v52 }
 0x7e5   : > { %v10036_v13 = vsub.f32 %v10035_v32, %v8115_v52  ;;  %v10037_v7 = vpack.c.bf16 %v8238_v15, %v8231_v46  ;;  %v5621_v36 = vpop.eup %5620  ;;  %v3444_v20 = vadd.f32 %v8366_v11, %v3443_v12  ;;  %5640 = vpow2.f32 %v3392_v61 }
 0x7e6   : > { %v3404_v4 = vmul.f32 1.442695, %v10034_v25  ;;  %v3465_v17 = vadd.f32 %v5607_v30, %v3464_v45  ;;  %v5041_v3 = vpack.c.bf16 %v5619_v40, %v5617_v23  ;;  %v5623_v62 = vpop.eup %5622  ;;  %5642 = vpow2.f32 %v3396_v28  ;;  %v10040_v30 = vld [vmem:[#allocation25_spill] sm:$0xff] }
 0x7e7   : > { %v3408_v58 = vmul.f32 1.442695, %v10036_v13  ;;  %5028 = vmatpush1.bf16.msra.mxu1 %v10037_v7  ;;  %v10038_v31 = vsub.f32 %v9993_v19, %v8115_v52  ;;  %v10039_v60 = vsub.f32 %v9994_v53, %v8115_v52  ;;  %v5625_v10 = vpop.eup %5624  ;;  %v3445_v15 = vadd.f32 %v8374_v42, %v3444_v20 }
 0x7e8   : > { %5030 = vmatprep.subr.bf16.mxu1 %v5029_v16  ;;  %5644 = vpow2.f32 %v3400_v37  ;;  %v3466_v46 = vadd.f32 %v5609_v56, %v3465_v17  ;;  %v5045_v50 = vpack.c.bf16 %v5623_v62, %v5621_v36  ;;  %v5627_v61 = vpop.eup %5626  ;;  %v10041_v16 = vsub.f32 %v10040_v30, %v8115_v52 }
 0x7e9   : > { %v3412_v54 = vmul.f32 1.442695, %v10038_v31  ;;  %v3416_v21 = vmul.f32 1.442695, %v10039_v60  ;;  %5646 = vpow2.f32 %v3404_v4  ;;  %v10042_v19 = vpack.c.bf16 %v8253_v63, %v8246_v8  ;;  %v5629_v24 = vpop.eup %5628 }
 0x7ea   : > { %v3420_v28 = vmul.f32 1.442695, %v10041_v16  ;;  %v3446_v53 = vadd.f32 %v8381_v34, %v3445_v15  ;;  %5648 = vpow2.f32 %v3408_v58  ;;  %v3467_v29 = vadd.f32 %v5611_v5, %v3466_v46  ;;  %v5631_v37 = vpop.eup %5630 }
 0x7eb   : > { %5032 = vmatpush1.bf16.msra.mxu1 %v10042_v19  ;;  %v5049_v12 = vpack.c.bf16 %v5627_v61, %v5625_v10  ;;  %5650 = vpow2.f32 %v3412_v54  ;;  %v5633_v56 = vpop.eup %5632  ;;  %v5053_v52 = vpack.c.bf16 %v5631_v37, %v5629_v24  ;;  %v10043_v63 = vpack.c.bf16 %v8268_v44, %v8261_v49 }
 0x7ec   : > { %5034 = vmatprep.subr.bf16.mxu1 %v5033_v6  ;;  %v3447_v45 = vadd.f32 %v8389_v26, %v3446_v53  ;;  %5652 = vpow2.f32 %v3416_v21  ;;  %v3468_v25 = vadd.f32 %v5613_v18, %v3467_v29  ;;  %v5635_v4 = vpop.eup %5634  ;;  %v10044_v31 = vpack.c.bf16 %v8282_v22, %v8276_v14 }
 0x7ed   : > { %5654 = vpow2.f32 %v3420_v28  ;;  %v5637_v8 = vpop.eup %5636  ;;  %v5057_v6 = vpack.c.bf16 %v5635_v4, %v5633_v56  ;;  %v10046_v53 = vpack.c.bf16 %v8307_v1, %v8301_v33  ;;  %v10050_v33 = vpack.c.bf16 %v8346_v59, %v8337_v41 }
 0x7ee   : > { %v3448_v32 = vadd.f32 %v8396_v39, %v3447_v45  ;;  %v3469_v5 = vadd.f32 %v5615_v51, %v3468_v25  ;;  %v5639_v13 = vpop.eup %5638  ;;  %v10053_v41 = vpack.c.bf16 %v8396_v39, %v8389_v26  ;;  %v10059_v26 = vld [vmem:[#allocation48_spill] sm:$0xff] }
 0x7ef   : > { %5036 = vmatpush1.bf16.msra.mxu1 %v10043_v63  ;;  %v5641_v58 = vpop.eup %5640  ;;  %v5061_v17 = vpack.c.bf16 %v5639_v13, %v5637_v8  ;;  %v10056_v63 = vld [vmem:[#allocation31_spill] sm:$0xff] }
 0x7f0   : > { %5038 = vmatprep.subr.bf16.mxu1 %v5037_v38  ;;  %v3449_v7 = vadd.f32 %v8404_v47, %v3448_v32  ;;  %v3470_v20 = vadd.f32 %v5617_v23, %v3469_v5  ;;  %v5643_v18 = vpop.eup %5642  ;;  %v10045_v23 = vpack.c.bf16 %v8295_v55, %v8288_v0  ;;  %v10047_v0 = vld [vmem:[#allocation42_spill] sm:$0xff] }
 0x7f1   : > { %v5065_v60 = vpack.c.bf16 %v5643_v18, %v5641_v58  ;;  %v10048_v55 = vpack.c.bf16 %v8318_v48, %v10047_v0  ;;  %v10051_v48 = vpack.c.bf16 %v8366_v11, %v8357_v43  ;;  %v10054_v11 = vpack.c.bf16 %v8412_v27, %v8404_v47  ;;  %v10060_v32 = vld [vmem:[#allocation50_spill] sm:$0xff] }
 0x7f2   : > { %v5645_v54 = vpop.eup %5644  ;;  %v3450_v44 = vadd.f32 %v8412_v27, %v3449_v7  ;;  %v3471_v49 = vadd.f32 %v5619_v40, %v3470_v20  ;;  %v10061_v5 = vld [vmem:[#allocation30_spill] sm:$0xff]  ;;  %v10067_v20 = vld [vmem:[#allocation49_spill] sm:$0xff] }
 0x7f3   : > { %5040 = vmatpush1.bf16.msra.mxu1 %v10044_v31  ;;  %v5647_v51 = vpop.eup %5646 }
 0x7f4   : > { %5042 = vmatprep.subr.bf16.mxu1 %v5041_v3  ;;  %v5649_v38 = vpop.eup %5648  ;;  %v3451_v21 = vadd.f32 %v8417_v57, %v3450_v44  ;;  %v3472_v15 = vadd.f32 %v5621_v36, %v3471_v49  ;;  %v5069_v46 = vpack.c.bf16 %v5647_v51, %v5645_v54  ;;  %v10073_v44 = vld [vmem:[#allocation53_spill] sm:$0xff]  ;;  %v10074_v49 = vld [vmem:[#allocation52_spill] sm:$0xff] }
 0x7f5   : > { %v5651_v30 = vpop.eup %5650 }
 0x7f6   : > { %v5653_v16 = vpop.eup %5652  ;;  %v8523_v22 = vadd.f32 %v8425_v2, %v3451_v21  ;;  %v3473_v14 = vadd.f32 %v5623_v62, %v3472_v15  ;;  %v5073_v40 = vpack.c.bf16 %v5651_v30, %v5649_v38  ;;  %v10049_v62 = vpack.c.bf16 %v8329_v35, %v8323_v9 }
 0x7f7   : > { %5044 = vmatpush1.bf16.msra.mxu1 %v10045_v23  ;;  %v5655_v3 = vpop.eup %5654  ;;  %v10052_v9 = vpack.c.bf16 %v8381_v34, %v8374_v42  ;;  %v10055_v34 = vpack.c.bf16 %v8425_v2, %v8417_v57  ;;  %v10068_v57 = vld [vmem:[#allocation36_spill] sm:$0xff]  ;;  %v10069_v2 = vld [vmem:[#allocation34_spill] sm:$0xff]  ;;  %v3667_v23 = vpop.trf.xlu0 }
 0x7f8   : > { %5046 = vmatprep.subr.bf16.mxu1 %v5045_v50  ;;  %v3474_v28 = vadd.f32 %v5625_v10, %v3473_v14  ;;  %v5077_v19 = vpack.c.bf16 %v5655_v3, %v5653_v16 }
 0x7fa   : > { %v3475_v36 = vadd.f32 %v5627_v61, %v3474_v28 }
 0x7fb   : > { %5048 = vmatpush1.bf16.msra.mxu1 %v10046_v53  ;;  %v3668_v14 = vpop.trf.xlu0 }
 0x7fc   : > { %5050 = vmatprep.subr.bf16.mxu1 %v5049_v12  ;;  %v3476_v29 = vadd.f32 %v5629_v24, %v3475_v36  ;;  %v3635_v12 = vpop.trf.xlu1 }
 0x7fe   : > { %v3477_v45 = vadd.f32 %v5631_v37, %v3476_v29 }
 0x7ff   : > { %5052 = vmatpush1.bf16.msra.mxu1 %v10048_v55 }
 0x800   : > { %5054 = vmatprep.subr.bf16.mxu1 %v5053_v52  ;;  %v3478_v25 = vadd.f32 %v5633_v56, %v3477_v45  ;;  %v3636_v59 = vpop.trf.xlu1 }
 0x802   : > { %v3479_v10 = vadd.f32 %v5635_v4, %v3478_v25 }
 0x803   : > { %5056 = vmatpush1.bf16.msra.mxu1 %v10049_v62 }
 0x804   : > { %5058 = vmatprep.subr.bf16.mxu1 %v5057_v6  ;;  %v3480_v50 = vadd.f32 %v5637_v8, %v3479_v10  ;;  %v3637_v42 = vpop.trf.xlu1  ;;  %v10057_v8 = vld [vmem:[#allocation29_spill] sm:$0xff]  ;;  %v10062_v6 = vld [vmem:[#allocation28_spill] sm:$0xff] }
 0x805   : > { %v10058_v39 = vpack.c.bf16 %v10056_v63, %v10057_v8  ;;  %v10063_v27 = vpack.c.bf16 %v10061_v5, %v10062_v6 }
 0x806   : > { %v3481_v1 = vadd.f32 %v5639_v13, %v3480_v50  ;;  %v10064_v13 = vld [vmem:[#allocation35_spill] sm:$0xff] }
 0x807   : > { %5060 = vmatpush1.bf16.msra.mxu1 %v10050_v33 }
 0x808   : > { %5062 = vmatprep.subr.bf16.mxu1 %v5061_v17  ;;  %v3482_v61 = vadd.f32 %v5641_v58, %v3481_v1  ;;  %v3638_v47 = vpop.trf.xlu1  ;;  %v10065_v58 = vld [vmem:[#allocation33_spill] sm:$0xff]  ;;  %v10070_v17 = vld [vmem:[#allocation32_spill] sm:$0xff] }
 0x809   : > { %v10066_v7 = vpack.c.bf16 %v10064_v13, %v10065_v58 }
 0x80a   : > { %v3483_v24 = vadd.f32 %v5643_v18, %v3482_v61  ;;  %v10071_v18 = vpack.c.bf16 %v10069_v2, %v10070_v17 }
 0x80b   : > { %5064 = vmatpush1.bf16.msra.mxu1 %v10051_v48 }
 0x80c   : > { %5066 = vmatprep.subr.bf16.mxu1 %v5065_v60  ;;  %v3484_v37 = vadd.f32 %v5645_v54, %v3483_v24  ;;  %v3639_v31 = vpop.trf.xlu1  ;;  %v10072_v54 = vld [vmem:[#allocation51_spill] sm:$0xff]  ;;  %v10075_v60 = vmov 0.0   ;;  %v3453_v24 = vrot.slane %v8523_v22, 4 }
 0x80e   : > { %v3485_v35 = vadd.f32 %v5647_v51, %v3484_v37  ;;  %v3454_v37 = vadd.f32 %v3453_v24, %v8523_v22 }
 0x80f   : > { %5068 = vmatpush1.bf16.msra.mxu1 %v10052_v9 }
 0x810   : > { %5070 = vmatprep.subr.bf16.mxu1 %v5069_v46  ;;  %v3486_v56 = vadd.f32 %v5649_v38, %v3485_v35  ;;  %v3640_v51 = vpop.trf.xlu1  ;;  %v3455_v35 = vrot.slane %v3454_v37, 2 }
 0x812   : > { %v3487_v52 = vadd.f32 %v5651_v30, %v3486_v56 }
 0x813   : > { %5072 = vmatpush1.bf16.msra.mxu1 %v10053_v41  ;;  %v3456_v41 = vadd.f32 %v3455_v35, %v3454_v37 }
 0x814   : > { %5074 = vmatprep.subr.bf16.mxu1 %v5073_v40  ;;  %v3488_v43 = vadd.f32 %v5653_v16, %v3487_v52  ;;  %v3641_v38 = vpop.trf.xlu1 }
 0x815   : > { %v3457_v52 = vrot.slane %v3456_v41, 1 }
 0x816   : > { %v8549_v4 = vadd.f32 %v5655_v3, %v3488_v43  ;;  %v3669_v3 = vpop.trf.xlu0 }
 0x817   : > { %5076 = vmatpush1.bf16.msra.mxu1 %v10054_v11  ;;  %v3458_v11 = vadd.f32 %v3457_v52, %v3456_v41 }
 0x818   : > { %5078 = vmatprep.subr.bf16.mxu1 %v5077_v19  ;;  %v3642_v21 = vpop.trf.xlu1 }
 0x819   : > { %5656 = vrcp.f32 %v3458_v11 }
 0x81a   : > { %v3670_v19 = vpop.trf.xlu0 }
 0x81b   : > { %5080 = vmatpush1.bf16.msra.mxu1 %v10055_v34 }
 0x81c   : > { %5082 = vmatprep.subr.bf16.mxu1 %v10058_v39  ;;  %v3643_v15 = vpop.trf.xlu1 }
 0x81e   : > { %3561 = vmatmul.mubr.f32.vlgmr.msra.gmra.mrb[136].mxu1 %v10059_v26  ;;  %v3671_v36 = vpop.trf.xlu0 }
 0x81f   : > { %3566 = vmatprep.mubr.f32.mxu1 %v10060_v32  ;;  %5084 = vmatpush1.bf16.msra.mxu1 %v10063_v27 }
 0x820   : > { %5086 = vmatprep.subr.bf16.mxu1 %v10066_v7  ;;  %v3644_v46 = vpop.trf.xlu1 }
 0x822   : > { %3567 = vmatmul.mubr.f32.gmra.mrb[138].mxu1 %v10067_v20  ;;  %v3672_v0 = vpop.trf.xlu0 }
 0x823   : > { %3572 = vmatprep.mubr.f32.mxu1 %v10068_v57  ;;  %5088 = vmatpush1.bf16.msra.mxu1 %v10071_v18  ;;  %v5657_v34 = vpop.eup %5656 }
 0x824   : > { %v3645_v30 = vpop.trf.xlu1 }
 0x826   : > { %3573 = vmatmul.mubr.f32.gmra.mrb[140].mxu1 %v10072_v54  ;;  %v3673_v55 = vpop.trf.xlu0 }
 0x827   : > { %3578 = vmatprep.mubr.f32.mxu1 %v10073_v44 }
 0x828   : > { %v3646_v16 = vpop.trf.xlu1 }
 0x82a   : > { %3579 = vmatmul.mubr.f32.gmra.mrb[142].mxu1 %v10074_v49  ;;  %v3674_v45 = vpop.trf.xlu0 }
 0x82b   : > { %3843 = vmatprep.mubr.f32.mxu1 %v10075_v60 }
 0x82c   : > { %v3647_v40 = vpop.trf.xlu1 }
 0x82e   : > { %4826 = vmatmul.mubr.msk.f32.vlgmr.msra.gmra.mrb[144].mxu1 %vm1042_vm2, %v3635_v12  ;;  %v3675_v25 = vpop.trf.xlu0  ;;  %v3490_v12 = vrot.slane %v8549_v4, 4 }
 0x82f   : > { %3849 = vmatprep.mubr.f32.mxu1 %v10075_v60 }
 0x830   : > { %v3648_v28 = vpop.trf.xlu1  ;;  %v3491_v9 = vadd.f32 %v3490_v12, %v8549_v4 }
 0x832   : > { %4827 = vmatmul.mubr.msk.f32.gmra.mrb[146].mxu1 %vm1042_vm2, %v3636_v59  ;;  %v3676_v62 = vpop.trf.xlu0  ;;  %v3492_v56 = vrot.slane %v3491_v9, 2 }
 0x833   : > { %3855 = vmatprep.mubr.f32.mxu1 %v10075_v60 }
 0x834   : > { %v3649_v53 = vpop.trf.xlu1  ;;  %v3493_v59 = vadd.f32 %v3492_v56, %v3491_v9 }
 0x836   : > { %4828 = vmatmul.mubr.msk.f32.gmra.mrb[148].mxu1 %vm1042_vm2, %v3637_v42  ;;  %v3677_v10 = vpop.trf.xlu0  ;;  %v3494_v43 = vrot.slane %v3493_v59, 1 }
 0x837   : > { %3861 = vmatprep.mubr.f32.mxu1 %v10075_v60 }
 0x838   : > { %v3650_v29 = vpop.trf.xlu1  ;;  %v3495_v42 = vadd.f32 %v3494_v43, %v3493_v59 }
 0x83a   : > { %4829 = vmatmul.mubr.msk.f32.gmra.mrb[150].mxu1 %vm1042_vm2, %v3638_v47  ;;  %v3678_v50 = vpop.trf.xlu0  ;;  %5658 = vrcp.f32 %v3495_v42 }
 0x83b   : > { %3867 = vmatprep.mubr.f32.mxu1 %v10075_v60 }
 0x83e   : > { %4830 = vmatmul.mubr.msk.f32.gmra.mrb[152].mxu1 %vm1042_vm2, %v3639_v31  ;;  %v3679_v33 = vpop.trf.xlu0 }
 0x83f   : > { %3873 = vmatprep.mubr.f32.mxu1 %v10075_v60 }
 0x842   : > { %4831 = vmatmul.mubr.msk.f32.gmra.mrb[154].mxu1 %vm1042_vm2, %v3640_v51  ;;  %v3680_v1 = vpop.trf.xlu0 }
 0x843   : > { %3879 = vmatprep.mubr.f32.mxu1 %v10075_v60 }
 0x844   : > { %v5659_v8 = vpop.eup %5658 }
 0x846   : > { %4832 = vmatmul.mubr.msk.f32.gmra.mrb[156].mxu1 %vm1042_vm2, %v3641_v38  ;;  %v3681_v61 = vpop.trf.xlu0 }
 0x847   : > { %3885 = vmatprep.mubr.f32.mxu1 %v10075_v60 }
 0x84a   : > { %4833 = vmatmul.mubr.msk.f32.gmra.mrb[158].mxu1 %vm1042_vm2, %v3642_v21  ;;  %v3682_v48 = vpop.trf.xlu0 }
 0x84b   : > { %3891 = vmatprep.mubr.f32.mxu1 %v10075_v60 }
 0x84e   : > { %4834 = vmatmul.mubr.msk.f32.gmra.mrb[160].mxu1 %vm1042_vm2, %v3643_v15 }
 0x84f   : > { %3897 = vmatprep.mubr.f32.mxu1 %v10075_v60 }
 0x852   : > { %4835 = vmatmul.mubr.msk.f32.gmra.mrb[162].mxu1 %vm1042_vm2, %v3644_v46 }
 0x853   : > { %3903 = vmatprep.mubr.f32.mxu1 %v10075_v60 }
 0x856   : > { %4836 = vmatmul.mubr.msk.f32.gmra.mrb[164].mxu1 %vm1042_vm2, %v3645_v30 }
 0x857   : > { %3909 = vmatprep.mubr.f32.mxu1 %v10075_v60 }
 0x85a   : > { %4837 = vmatmul.mubr.msk.f32.gmra.mrb[166].mxu1 %vm1042_vm2, %v3646_v16 }
 0x85b   : > { %3915 = vmatprep.mubr.f32.mxu1 %v10075_v60 }
 0x85e   : > { %4838 = vmatmul.mubr.msk.f32.gmra.mrb[168].mxu1 %vm1042_vm2, %v3647_v40 }
 0x85f   : > { %3921 = vmatprep.mubr.f32.mxu1 %v10075_v60 }
 0x862   : > { %4839 = vmatmul.mubr.msk.f32.gmra.mrb[170].mxu1 %vm1042_vm2, %v3648_v28 }
 0x863   : > { %3927 = vmatprep.mubr.f32.mxu1 %v10075_v60 }
 0x866   : > { %4840 = vmatmul.mubr.msk.f32.gmra.mrb[172].mxu1 %vm1042_vm2, %v3649_v53 }
 0x867   : > { %3933 = vmatprep.mubr.f32.mxu1 %v10075_v60 }
 0x86a   : > { %4841 = vmatmul.mubr.msk.f32.gmra.mrb[174].mxu1 %vm1042_vm2, %v3650_v29 }
 0x86b   : > { %3939 = vmatprep.mubr.f32.mxu1 %v10075_v60 }
 0x86e   : > { %4842 = vmatmul.mubr.msk.f32.gmra.mrb[176].mxu1 %vm1042_vm2, %v3667_v23 }
 0x86f   : > { %3945 = vmatprep.mubr.f32.mxu1 %v10075_v60 }
 0x872   : > { %4843 = vmatmul.mubr.msk.f32.gmra.mrb[178].mxu1 %vm1042_vm2, %v3668_v14 }
 0x873   : > { %3951 = vmatprep.mubr.f32.mxu1 %v10075_v60 }
 0x876   : > { %4844 = vmatmul.mubr.msk.f32.gmra.mrb[180].mxu1 %vm1042_vm2, %v3669_v3 }
 0x877   : > { %3957 = vmatprep.mubr.f32.mxu1 %v10075_v60 }
 0x87a   : > { %4845 = vmatmul.mubr.msk.f32.gmra.mrb[182].mxu1 %vm1042_vm2, %v3670_v19 }
 0x87b   : > { %3963 = vmatprep.mubr.f32.mxu1 %v10075_v60 }
 0x87e   : > { %4846 = vmatmul.mubr.msk.f32.gmra.mrb[184].mxu1 %vm1042_vm2, %v3671_v36 }
 0x87f   : > { %3969 = vmatprep.mubr.f32.mxu1 %v10075_v60 }
 0x882   : > { %4847 = vmatmul.mubr.msk.f32.gmra.mrb[186].mxu1 %vm1042_vm2, %v3672_v0 }
 0x883   : > { %3975 = vmatprep.mubr.f32.mxu1 %v10075_v60 }
 0x886   : > { %4848 = vmatmul.mubr.msk.f32.gmra.mrb[188].mxu1 %vm1042_vm2, %v3673_v55 }
 0x887   : > { %3981 = vmatprep.mubr.f32.mxu1 %v10075_v60 }
 0x88a   : > { %4849 = vmatmul.mubr.msk.f32.gmra.mrb[190].mxu1 %vm1042_vm2, %v3674_v45 }
 0x88b   : > { %3987 = vmatprep.mubr.f32.mxu1 %v10075_v60 }
 0x88e   : > { %4850 = vmatmul.mubr.msk.f32.gmra.mrb[192].mxu1 %vm1042_vm2, %v3675_v25 }
 0x88f   : > { %3993 = vmatprep.mubr.f32.mxu1 %v10075_v60 }
 0x892   : > { %4851 = vmatmul.mubr.msk.f32.gmra.mrb[194].mxu1 %vm1042_vm2, %v3676_v62 }
 0x893   : > { %3999 = vmatprep.mubr.f32.mxu1 %v10075_v60 }
 0x896   : > { %4852 = vmatmul.mubr.msk.f32.gmra.mrb[196].mxu1 %vm1042_vm2, %v3677_v10 }
 0x897   : > { %4005 = vmatprep.mubr.f32.mxu1 %v10075_v60 }
 0x89a   : > { %4853 = vmatmul.mubr.msk.f32.gmra.mrb[198].mxu1 %vm1042_vm2, %v3678_v50 }
 0x89b   : > { %4011 = vmatprep.mubr.f32.mxu1 %v10075_v60 }
 0x89e   : > { %4854 = vmatmul.mubr.msk.f32.gmra.mrb[200].mxu1 %vm1042_vm2, %v3679_v33 }
 0x89f   : > { %4017 = vmatprep.mubr.f32.mxu1 %v10075_v60 }
 0x8a2   : > { %4855 = vmatmul.mubr.msk.f32.gmra.mrb[202].mxu1 %vm1042_vm2, %v3680_v1 }
 0x8a3   : > { %4023 = vmatprep.mubr.f32.mxu1 %v10075_v60 }
 0x8a6   : > { %4856 = vmatmul.mubr.msk.f32.gmra.mrb[204].mxu1 %vm1042_vm2, %v3681_v61 }
 0x8a7   : > { %4029 = vmatprep.mubr.f32.mxu1 %v10075_v60 }
 0x8aa   : > { %4857 = vmatmul.mubr.msk.f32.gmra.mrb[206].mxu1 %vm1042_vm2, %v3682_v48 }
 0x8f1   : > { %v3562_v63 = vpop.f32.mrb[136].mxu1 }
 0x8f2   : > { %v8641_v39 = vmul.f32 %v5657_v34, %v3562_v63  ;;  %v3564_v26 = vpop.f32.mrb[137].mxu1 }
 0x8f3   : > { %v8643_v32 = vmul.f32 %v5659_v8, %v3564_v26 }
 0x8f4   : > { %10076 = vst [vmem:[#allocation45_spill] sm:$0xff] %v8641_v39 }
 0x8f5   : > { %10077 = vst [vmem:[#allocation26_spill] sm:$0xff] %v8643_v32  ;;  %v3568_v22 = vpop.f32.mrb[138].mxu1 }
 0x8f6   : > { %v8645_v4 = vmul.f32 %v5657_v34, %v3568_v22  ;;  %v3570_v5 = vpop.f32.mrb[139].mxu1 }
 0x8f7   : > { %v8647_v6 = vmul.f32 %v5659_v8, %v3570_v5 }
 0x8f8   : > { %10078 = vst [vmem:[#allocation24_spill] sm:$0xff] %v8645_v4 }
 0x8f9   : > { %10079 = vst [vmem:[#allocation44_spill] sm:$0xff] %v8647_v6  ;;  %v3574_v13 = vpop.f32.mrb[140].mxu1 }
 0x8fa   : > { %v8653_v58 = vmul.f32 %v5657_v34, %v3574_v13  ;;  %v3576_v7 = vpop.f32.mrb[141].mxu1 }
 0x8fb   : > { %v8655_v20 = vmul.f32 %v5659_v8, %v3576_v7 }
 0x8fc   : > { %10080 = vst [vmem:[#allocation47_spill] sm:$0xff] %v8653_v58 }
 0x8fd   : > { %10081 = vst [vmem:[#allocation46_spill] sm:$0xff] %v8655_v20  ;;  %v3580_v57 = vpop.f32.mrb[142].mxu1 }
 0x8fe   : > { %v8657_v2 = vmul.f32 %v5657_v34, %v3580_v57  ;;  %v3582_v17 = vpop.f32.mrb[143].mxu1 }
 0x8ff   : > { %v8659_v18 = vmul.f32 %v5659_v8, %v3582_v17 }
 0x900   : > { %10082 = vst [vmem:[#allocation40_spill] sm:$0xff] %v8657_v2 }
 0x901   : > { %10083 = vst [vmem:[#allocation67_spill] sm:$0xff] %v8659_v18  ;;  %v8665_v44 = vpop.f32.mrb[144].mxu1 }
 0x902   : > { %v8667_v49 = vpop.f32.mrb[145].mxu1 }
 0x905   : > { %v8669_v51 = vpop.f32.mrb[146].mxu1 }
 0x906   : > { %v8671_v38 = vpop.f32.mrb[147].mxu1 }
 0x909   : > { %v8673_v21 = vpop.f32.mrb[148].mxu1 }
 0x90a   : > { %v4036_v15 = vmax.f32 %v8665_v44, %v8673_v21  ;;  %v8677_v46 = vpop.f32.mrb[149].mxu1 }
 0x90b   : > { %v4073_v30 = vmax.f32 %v8667_v49, %v8677_v46 }
 0x90d   : > { %v8681_v23 = vpop.f32.mrb[150].mxu1 }
 0x90e   : > { %v4037_v16 = vmax.f32 %v8669_v51, %v8681_v23  ;;  %v8685_v14 = vpop.f32.mrb[151].mxu1 }
 0x90f   : > { %v4074_v40 = vmax.f32 %v8671_v38, %v8685_v14 }
 0x911   : > { %v8689_v3 = vpop.f32.mrb[152].mxu1 }
 0x912   : > { %v4038_v28 = vmax.f32 %v4036_v15, %v8689_v3  ;;  %v8692_v19 = vpop.f32.mrb[153].mxu1 }
 0x913   : > { %v4075_v53 = vmax.f32 %v4073_v30, %v8692_v19 }
 0x915   : > { %v8695_v36 = vpop.f32.mrb[154].mxu1 }
 0x916   : > { %v4039_v29 = vmax.f32 %v4037_v16, %v8695_v36  ;;  %v8698_v0 = vpop.f32.mrb[155].mxu1 }
 0x917   : > { %v4076_v55 = vmax.f32 %v4074_v40, %v8698_v0 }
 0x919   : > { %v8701_v45 = vpop.f32.mrb[156].mxu1 }
 0x91a   : > { %v4040_v25 = vmax.f32 %v4038_v28, %v8701_v45  ;;  %v8704_v62 = vpop.f32.mrb[157].mxu1 }
 0x91b   : > { %v4077_v10 = vmax.f32 %v4075_v53, %v8704_v62 }
 0x91d   : > { %v8707_v50 = vpop.f32.mrb[158].mxu1 }
 0x91e   : > { %v4041_v33 = vmax.f32 %v4039_v29, %v8707_v50  ;;  %v8710_v1 = vpop.f32.mrb[159].mxu1 }
 0x91f   : > { %v4078_v61 = vmax.f32 %v4076_v55, %v8710_v1 }
 0x921   : > { %v8713_v48 = vpop.f32.mrb[160].mxu1 }
 0x922   : > { %v4042_v24 = vmax.f32 %v4040_v25, %v8713_v48  ;;  %v8716_v12 = vpop.f32.mrb[161].mxu1 }
 0x923   : > { %v4079_v37 = vmax.f32 %v4077_v10, %v8716_v12 }
 0x925   : > { %v8719_v9 = vpop.f32.mrb[162].mxu1 }
 0x926   : > { %v4043_v35 = vmax.f32 %v4041_v33, %v8719_v9  ;;  %v8722_v56 = vpop.f32.mrb[163].mxu1 }
 0x927   : > { %v4080_v41 = vmax.f32 %v4078_v61, %v8722_v56 }
 0x929   : > { %v8725_v59 = vpop.f32.mrb[164].mxu1 }
 0x92a   : > { %v4044_v52 = vmax.f32 %v4042_v24, %v8725_v59  ;;  %v8728_v43 = vpop.f32.mrb[165].mxu1 }
 0x92b   : > { %v4081_v11 = vmax.f32 %v4079_v37, %v8728_v43 }
 0x92d   : > { %v8731_v42 = vpop.f32.mrb[166].mxu1 }
 0x92e   : > { %v4045_v34 = vmax.f32 %v4043_v35, %v8731_v42  ;;  %v8734_v63 = vpop.f32.mrb[167].mxu1 }
 0x92f   : > { %10084 = vst [vmem:[#allocation68_spill] sm:$0xff] %v8734_v63  ;;  %v4082_v8 = vmax.f32 %v4080_v41, %v8734_v63 }
 0x931   : > { %v8737_v26 = vpop.f32.mrb[168].mxu1 }
 0x932   : > { %v4046_v22 = vmax.f32 %v4044_v52, %v8737_v26  ;;  %v8740_v5 = vpop.f32.mrb[169].mxu1 }
 0x933   : > { %10085 = vst [vmem:[#allocation69_spill] sm:$0xff] %v8740_v5  ;;  %v4083_v13 = vmax.f32 %v4081_v11, %v8740_v5 }
 0x935   : > { %v8743_v7 = vpop.f32.mrb[170].mxu1 }
 0x936   : > { %v4047_v57 = vmax.f32 %v4045_v34, %v8743_v7  ;;  %v8746_v17 = vpop.f32.mrb[171].mxu1 }
 0x937   : > { %10086 = vst [vmem:[#allocation70_spill] sm:$0xff] %v8746_v17  ;;  %v4084_v15 = vmax.f32 %v4082_v8, %v8746_v17 }
 0x939   : > { %v8749_v30 = vpop.f32.mrb[172].mxu1 }
 0x93a   : > { %v4048_v16 = vmax.f32 %v4046_v22, %v8749_v30  ;;  %v8752_v40 = vpop.f32.mrb[173].mxu1 }
 0x93b   : > { %10087 = vst [vmem:[#allocation71_spill] sm:$0xff] %v8752_v40  ;;  %v4085_v28 = vmax.f32 %v4083_v13, %v8752_v40 }
 0x93d   : > { %v8755_v53 = vpop.f32.mrb[174].mxu1 }
 0x93e   : > { %v4049_v29 = vmax.f32 %v4047_v57, %v8755_v53  ;;  %v8758_v55 = vpop.f32.mrb[175].mxu1 }
 0x93f   : > { %10088 = vst [vmem:[#allocation72_spill] sm:$0xff] %v8758_v55  ;;  %v4086_v25 = vmax.f32 %v4084_v15, %v8758_v55 }
 0x941   : > { %v8761_v10 = vpop.f32.mrb[176].mxu1 }
 0x942   : > { %v4050_v33 = vmax.f32 %v4048_v16, %v8761_v10  ;;  %v8764_v61 = vpop.f32.mrb[177].mxu1 }
 0x943   : > { %10089 = vst [vmem:[#allocation74_spill] sm:$0xff] %v8764_v61  ;;  %v4087_v24 = vmax.f32 %v4085_v28, %v8764_v61 }
 0x945   : > { %v8767_v37 = vpop.f32.mrb[178].mxu1 }
 0x946   : > { %v4051_v35 = vmax.f32 %v4049_v29, %v8767_v37  ;;  %v8770_v41 = vpop.f32.mrb[179].mxu1 }
 0x947   : > { %10090 = vst [vmem:[#allocation76_spill] sm:$0xff] %v8770_v41  ;;  %v4088_v52 = vmax.f32 %v4086_v25, %v8770_v41 }
 0x949   : > { %v8773_v11 = vpop.f32.mrb[180].mxu1 }
 0x94a   : > { %v4052_v34 = vmax.f32 %v4050_v33, %v8773_v11  ;;  %v8776_v8 = vpop.f32.mrb[181].mxu1 }
 0x94b   : > { %10091 = vst [vmem:[#allocation77_spill] sm:$0xff] %v8776_v8  ;;  %v4089_v22 = vmax.f32 %v4087_v24, %v8776_v8 }
 0x94d   : > { %v8779_v13 = vpop.f32.mrb[182].mxu1 }
 0x94e   : > { %v4053_v57 = vmax.f32 %v4051_v35, %v8779_v13  ;;  %v8782_v15 = vpop.f32.mrb[183].mxu1 }
 0x94f   : > { %10092 = vst [vmem:[#allocation73_spill] sm:$0xff] %v8782_v15  ;;  %v4090_v16 = vmax.f32 %v4088_v52, %v8782_v15 }
 0x951   : > { %v8785_v28 = vpop.f32.mrb[184].mxu1 }
 0x952   : > { %v4054_v29 = vmax.f32 %v4052_v34, %v8785_v28  ;;  %v8788_v25 = vpop.f32.mrb[185].mxu1 }
 0x953   : > { %10093 = vst [vmem:[#allocation75_spill] sm:$0xff] %v8788_v25  ;;  %v4091_v33 = vmax.f32 %v4089_v22, %v8788_v25 }
 0x955   : > { %v8791_v31 = vpop.f32.mrb[186].mxu1 }
 0x956   : > { %v4055_v24 = vmax.f32 %v4053_v57, %v8791_v31  ;;  %v8794_v54 = vpop.f32.mrb[187].mxu1 }
 0x957   : > { %10094 = vst [vmem:[#allocation78_spill] sm:$0xff] %v8794_v54  ;;  %v4092_v35 = vmax.f32 %v4090_v16, %v8794_v54 }
 0x959   : > { %v8797_v27 = vpop.f32.mrb[188].mxu1 }
 0x95a   : > { %v4056_v52 = vmax.f32 %v4054_v29, %v8797_v27  ;;  %v8800_v47 = vpop.f32.mrb[189].mxu1 }
 0x95b   : > { %10095 = vst [vmem:[#allocation38_spill] sm:$0xff] %v8800_v47  ;;  %v4093_v34 = vmax.f32 %v4091_v33, %v8800_v47 }
 0x95d   : > { %v8803_v58 = vpop.f32.mrb[190].mxu1 }
 0x95e   : > { %v4057_v22 = vmax.f32 %v4055_v24, %v8803_v58  ;;  %v8806_v2 = vpop.f32.mrb[191].mxu1 }
 0x95f   : > { %10096 = vst [vmem:[#allocation23_spill] sm:$0xff] %v8806_v2  ;;  %v4094_v57 = vmax.f32 %v4092_v35, %v8806_v2 }
 0x961   : > { %v8809_v20 = vpop.f32.mrb[192].mxu1 }
 0x962   : > { %v4058_v16 = vmax.f32 %v4056_v52, %v8809_v20  ;;  %v8812_v18 = vpop.f32.mrb[193].mxu1 }
 0x963   : > { %10097 = vst [vmem:[#allocation21_spill] sm:$0xff] %v8812_v18  ;;  %v4095_v29 = vmax.f32 %v4093_v34, %v8812_v18 }
 0x965   : > { %v8815_v39 = vpop.f32.mrb[194].mxu1 }
 0x966   : > { %v4059_v33 = vmax.f32 %v4057_v22, %v8815_v39  ;;  %v8818_v4 = vpop.f32.mrb[195].mxu1 }
 0x967   : > { %10098 = vst [vmem:[#allocation43_spill] sm:$0xff] %v8818_v4  ;;  %v4096_v24 = vmax.f32 %v4094_v57, %v8818_v4 }
 0x969   : > { %v8821_v32 = vpop.f32.mrb[196].mxu1 }
 0x96a   : > { %v4060_v35 = vmax.f32 %v4058_v16, %v8821_v32  ;;  %v8824_v6 = vpop.f32.mrb[197].mxu1 }
 0x96b   : > { %10099 = vst [vmem:[#allocation20_spill] sm:$0xff] %v8824_v6  ;;  %v4097_v52 = vmax.f32 %v4095_v29, %v8824_v6 }
 0x96d   : > { %v8827_v60 = vpop.f32.mrb[198].mxu1 }
 0x96e   : > { %v4061_v34 = vmax.f32 %v4059_v33, %v8827_v60  ;;  %v8830_v18 = vpop.f32.mrb[199].mxu1 }
 0x96f   : > { %10100 = vst [vmem:[#allocation27_spill] sm:$0xff] %v8830_v18  ;;  %v4098_v22 = vmax.f32 %v4096_v24, %v8830_v18 }
 0x971   : > { %v8833_v2 = vpop.f32.mrb[200].mxu1 }
 0x972   : > { %v4062_v57 = vmax.f32 %v4060_v35, %v8833_v2  ;;  %v8836_v4 = vpop.f32.mrb[201].mxu1 }
 0x973   : > { %10101 = vst [vmem:[#allocation41_spill] sm:$0xff] %v8836_v4  ;;  %v4099_v16 = vmax.f32 %v4097_v52, %v8836_v4 }
 0x975   : > { %v8839_v47 = vpop.f32.mrb[202].mxu1 }
 0x976   : > { %v4063_v29 = vmax.f32 %v4061_v34, %v8839_v47  ;;  %v8842_v6 = vpop.f32.mrb[203].mxu1 }
 0x977   : > { %10102 = vst [vmem:[#allocation22_spill] sm:$0xff] %v8842_v6  ;;  %v4100_v33 = vmax.f32 %v4098_v22, %v8842_v6 }
 0x979   : > { %v8845_v54 = vpop.f32.mrb[204].mxu1 }
 0x97a   : > { %v4064_v24 = vmax.f32 %v4062_v57, %v8845_v54  ;;  %v8848_v18 = vpop.f32.mrb[205].mxu1 }
 0x97b   : > { %10103 = vst [vmem:[#allocation25_spill] sm:$0xff] %v8848_v18  ;;  %v4101_v35 = vmax.f32 %v4099_v16, %v8848_v18 }
 0x97d   : > { %v8851_v25 = vpop.f32.mrb[206].mxu1 }
 0x97e   : > { %v4065_v52 = vmax.f32 %v4063_v29, %v8851_v25  ;;  %v8854_v4 = vpop.f32.mrb[207].mxu1 }
 0x97f   : > { %10104 = vst [vmem:[#allocation42_spill] sm:$0xff] %v8854_v4  ;;  %v4102_v34 = vmax.f32 %v4100_v33, %v8854_v4 }
 0x980   : > { %v4066_v15 = vmax.f32 %v4064_v24, %v4065_v52 }
 0x981   : > { %v4103_v8 = vmax.f32 %v4101_v35, %v4102_v34 }
 0x982   : > { %v4067_v41 = vrot.slane %v4066_v15, 4 }
 0x983   : > { %v4104_v22 = vrot.slane %v4103_v8, 4 }
 0x984   : > { %v4068_v6 = vmax.f32 %v4066_v15, %v4067_v41 }
 0x985   : > { %v4105_v61 = vmax.f32 %v4103_v8, %v4104_v22 }
 0x986   : > { %v4069_v55 = vrot.slane %v4068_v6, 2 }
 0x987   : > { %v4106_v57 = vrot.slane %v4105_v61, 2 }
 0x988   : > { %v4070_v40 = vmax.f32 %v4068_v6, %v4069_v55  ;;  %v10124_v55 = vld [vmem:[#allocation25_spill] sm:$0xff] }
 0x989   : > { %v4107_v17 = vmax.f32 %v4105_v61, %v4106_v57 }
 0x98a   : > { %v4071_v5 = vrot.slane %v4070_v40, 1 }
 0x98b   : > { %v4108_v16 = vrot.slane %v4107_v17, 1 }
 0x98c   : > { %v8857_v18 = vmax.f32 %v4070_v40, %v4071_v5 }
 0x98d   : > { %v8859_v63 = vmax.f32 %v4107_v17, %v4108_v16 }
 0x98e   : > { %v4110_v29 = vsub.f32 %v8665_v44, %v8857_v18  ;;  %v4112_v33 = vsub.f32 %v8669_v51, %v8857_v18  ;;  %v4114_v41 = vsub.f32 %v8673_v21, %v8857_v18  ;;  %v4116_v8 = vsub.f32 %v8681_v23, %v8857_v18 }
 0x98f   : > { %v4118_v6 = vsub.f32 %v8689_v3, %v8857_v18  ;;  %v4120_v5 = vsub.f32 %v8695_v36, %v8857_v18  ;;  %v4122_v17 = vsub.f32 %v8701_v45, %v8857_v18  ;;  %v4124_v44 = vsub.f32 %v8707_v50, %v8857_v18 }
 0x990   : > { %v4126_v51 = vsub.f32 %v8713_v48, %v8857_v18  ;;  %v4128_v21 = vsub.f32 %v8719_v9, %v8857_v18  ;;  %v4130_v23 = vsub.f32 %v8725_v59, %v8857_v18  ;;  %v4132_v3 = vsub.f32 %v8731_v42, %v8857_v18 }
 0x991   : > { %v4134_v36 = vsub.f32 %v8737_v26, %v8857_v18  ;;  %v4136_v45 = vsub.f32 %v8743_v7, %v8857_v18  ;;  %v4138_v50 = vsub.f32 %v8749_v30, %v8857_v18  ;;  %v4140_v48 = vsub.f32 %v8755_v53, %v8857_v18 }
 0x992   : > { %v4142_v9 = vsub.f32 %v8761_v10, %v8857_v18  ;;  %v4144_v59 = vsub.f32 %v8767_v37, %v8857_v18  ;;  %v4146_v42 = vsub.f32 %v8773_v11, %v8857_v18  ;;  %v4148_v26 = vsub.f32 %v8779_v13, %v8857_v18 }
 0x993   : > { %v4150_v7 = vsub.f32 %v8785_v28, %v8857_v18  ;;  %v4152_v30 = vsub.f32 %v8791_v31, %v8857_v18  ;;  %v4154_v40 = vsub.f32 %v8797_v27, %v8857_v18  ;;  %v4156_v53 = vsub.f32 %v8803_v58, %v8857_v18 }
 0x994   : > { %v4174_v13 = vmul.f32 1.442695, %v4110_v29  ;;  %v4178_v15 = vmul.f32 1.442695, %v4112_v33  ;;  %v4182_v28 = vmul.f32 1.442695, %v4114_v41 }
 0x995   : > { %v4186_v35 = vmul.f32 1.442695, %v4116_v8  ;;  %v4190_v34 = vmul.f32 1.442695, %v4118_v6  ;;  %v4194_v22 = vmul.f32 1.442695, %v4120_v5 }
 0x996   : > { %5660 = vpow2.f32 %v4174_v13  ;;  %v4198_v57 = vmul.f32 1.442695, %v4122_v17  ;;  %v4202_v16 = vmul.f32 1.442695, %v4124_v44  ;;  %v4206_v58 = vmul.f32 1.442695, %v4126_v51 }
 0x997   : > { %5662 = vpow2.f32 %v4178_v15  ;;  %v4210_v11 = vmul.f32 1.442695, %v4128_v21  ;;  %v4214_v29 = vmul.f32 1.442695, %v4130_v23  ;;  %v4218_v33 = vmul.f32 1.442695, %v4132_v3 }
 0x998   : > { %5664 = vpow2.f32 %v4182_v28  ;;  %v4222_v41 = vmul.f32 1.442695, %v4134_v36  ;;  %v4226_v24 = vmul.f32 1.442695, %v4136_v45  ;;  %v4230_v8 = vmul.f32 1.442695, %v4138_v50 }
 0x999   : > { %5666 = vpow2.f32 %v4186_v35  ;;  %v4234_v27 = vmul.f32 1.442695, %v4140_v48  ;;  %v4238_v52 = vmul.f32 1.442695, %v4142_v9  ;;  %v4242_v13 = vmul.f32 1.442695, %v4144_v59 }
 0x99a   : > { %5668 = vpow2.f32 %v4190_v34  ;;  %v4246_v6 = vmul.f32 1.442695, %v4146_v42  ;;  %v4250_v5 = vmul.f32 1.442695, %v4148_v26  ;;  %v4254_v15 = vmul.f32 1.442695, %v4150_v7 }
 0x99b   : > { %5670 = vpow2.f32 %v4194_v22  ;;  %v8929_v17 = vmul.f32 1.442695, %v4152_v30  ;;  %v8931_v44 = vmul.f32 1.442695, %v4154_v40  ;;  %v8933_v51 = vmul.f32 1.442695, %v4156_v53 }
 0x99c   : > { %5672 = vpow2.f32 %v4198_v57  ;;  %v10105_v7 = vld [vmem:[#allocation68_spill] sm:$0xff]  ;;  %v10107_v28 = vld [vmem:[#allocation70_spill] sm:$0xff]  ;;  %v10108_v22 = vld [vmem:[#allocation71_spill] sm:$0xff] }
 0x99d   : > { %5674 = vpow2.f32 %v4202_v16  ;;  %v10109_v16 = vld [vmem:[#allocation72_spill] sm:$0xff]  ;;  %v10112_v42 = vld [vmem:[#allocation77_spill] sm:$0xff]  ;;  %v10114_v48 = vld [vmem:[#allocation75_spill] sm:$0xff] }
 0x99e   : > { %5676 = vpow2.f32 %v4206_v58  ;;  %v10106_v58 = vld [vmem:[#allocation69_spill] sm:$0xff]  ;;  %v10111_v26 = vld [vmem:[#allocation76_spill] sm:$0xff]  ;;  %v10115_v50 = vld [vmem:[#allocation78_spill] sm:$0xff] }
 0x99f   : > { %5678 = vpow2.f32 %v4210_v11  ;;  %v10113_v57 = vld [vmem:[#allocation73_spill] sm:$0xff]  ;;  %v10116_v35 = vld [vmem:[#allocation38_spill] sm:$0xff]  ;;  %v10117_v3 = vld [vmem:[#allocation23_spill] sm:$0xff] }
 0x9a0   : > { %v8943_v45 = vpop.eup %5660  ;;  %5680 = vpow2.f32 %v4214_v29  ;;  %v10118_v29 = vld [vmem:[#allocation21_spill] sm:$0xff]  ;;  %v10119_v21 = vld [vmem:[#allocation43_spill] sm:$0xff] }
 0x9a1   : > { %v8951_v59 = vpop.eup %5662  ;;  %5682 = vpow2.f32 %v4218_v33  ;;  %v10110_v33 = vld [vmem:[#allocation74_spill] sm:$0xff] }
 0x9a2   : > { %v8959_v40 = vpop.eup %5664  ;;  %5684 = vpow2.f32 %v4222_v41  ;;  %v4302_v53 = vadd.f32 %v8951_v59, %v8943_v45  ;;  %v10123_v41 = vld [vmem:[#allocation22_spill] sm:$0xff] }
 0x9a3   : > { %v8967_v34 = vpop.eup %5666  ;;  %5686 = vpow2.f32 %v4226_v24  ;;  %v10121_v24 = vld [vmem:[#allocation27_spill] sm:$0xff] }
 0x9a4   : > { %v8975_v30 = vpop.eup %5668  ;;  %5688 = vpow2.f32 %v4230_v8  ;;  %v4303_v11 = vadd.f32 %v8959_v40, %v4302_v53 }
 0x9a5   : > { %v8982_v9 = vpop.eup %5670  ;;  %5690 = vpow2.f32 %v4234_v27 }
 0x9a6   : > { %v8990_v36 = vpop.eup %5672  ;;  %5692 = vpow2.f32 %v4238_v52  ;;  %v4304_v53 = vadd.f32 %v8967_v34, %v4303_v11 }
 0x9a7   : > { %v8997_v23 = vpop.eup %5674  ;;  %5694 = vpow2.f32 %v4242_v13 }
 0x9a8   : > { %v9005_v37 = vpop.eup %5676  ;;  %5696 = vpow2.f32 %v4246_v6  ;;  %v4305_v11 = vadd.f32 %v8975_v30, %v4304_v53  ;;  %v10125_v53 = vsub.f32 %v8809_v20, %v8857_v18 }
 0x9a9   : > { %v9012_v10 = vpop.eup %5678  ;;  %5698 = vpow2.f32 %v4250_v5  ;;  %v10126_v5 = vsub.f32 %v8815_v39, %v8857_v18 }
 0x9aa   : > { %v9020_v31 = vpop.eup %5680  ;;  %5700 = vpow2.f32 %v4254_v15  ;;  %v4270_v27 = vmul.f32 1.442695, %v10125_v53  ;;  %v4306_v13 = vadd.f32 %v8982_v9, %v4305_v11  ;;  %v10127_v15 = vsub.f32 %v8821_v32, %v8857_v18 }
 0x9ab   : > { %v9026_v61 = vpop.eup %5682  ;;  %5702 = vpow2.f32 %v8929_v17  ;;  %v4274_v52 = vmul.f32 1.442695, %v10126_v5  ;;  %v10128_v17 = vsub.f32 %v8827_v60, %v8857_v18  ;;  %v10132_v60 = vsub.f32 %v8845_v54, %v8857_v18 }
 0x9ac   : > { %v9032_v8 = vpop.eup %5684  ;;  %5704 = vpow2.f32 %v8931_v44  ;;  %v4278_v6 = vmul.f32 1.442695, %v10127_v15  ;;  %v4307_v20 = vadd.f32 %v8990_v36, %v4306_v13  ;;  %v10129_v44 = vsub.f32 %v8833_v2, %v8857_v18 }
 0x9ad   : > { %v9039_v53 = vpop.eup %5686  ;;  %5706 = vpow2.f32 %v8933_v51  ;;  %v4282_v11 = vmul.f32 1.442695, %v10128_v17  ;;  %v10130_v13 = vsub.f32 %v8839_v47, %v8857_v18 }
 0x9ae   : > { %v9045_v39 = vpop.eup %5688  ;;  %5708 = vpow2.f32 %v4270_v27  ;;  %v4286_v5 = vmul.f32 1.442695, %v10129_v44  ;;  %v4308_v32 = vadd.f32 %v8997_v23, %v4307_v20  ;;  %v4294_v27 = vmul.f32 1.442695, %v10132_v60 }
 0x9af   : > { %v9051_v15 = vpop.eup %5690  ;;  %5710 = vpow2.f32 %v4274_v52  ;;  %v4290_v51 = vmul.f32 1.442695, %v10130_v13  ;;  %v10133_v20 = vsub.f32 %v8851_v25, %v8857_v18  ;;  %v10136_v18 = vsub.f32 %v8677_v46, %v8859_v63 }
 0x9b0   : > { %v9056_v4 = vpop.eup %5692  ;;  %5712 = vpow2.f32 %v4278_v6  ;;  %v4309_v17 = vadd.f32 %v9005_v37, %v4308_v32  ;;  %v10134_v6 = vsub.f32 %v8667_v49, %v8859_v63  ;;  %v10135_v32 = vsub.f32 %v8671_v38, %v8859_v63 }
 0x9b1   : > { %10131 = vst [vmem:[#allocation31_spill] sm:$0xff] %v9056_v4  ;;  %v9062_v2 = vpop.eup %5694  ;;  %5714 = vpow2.f32 %v4282_v11  ;;  %v4298_v52 = vmul.f32 1.442695, %v10133_v20  ;;  %v4184_v25 = vmul.f32 1.442695, %v10136_v18  ;;  %v10137_v49 = vsub.f32 %v8685_v14, %v8859_v63 }
 0x9b2   : > { %v9067_v44 = vpop.eup %5696  ;;  %5716 = vpow2.f32 %v4286_v5  ;;  %v4310_v47 = vadd.f32 %v9012_v10, %v4309_v17  ;;  %v4176_v13 = vmul.f32 1.442695, %v10134_v6  ;;  %v4180_v11 = vmul.f32 1.442695, %v10135_v32 }
 0x9b3   : > { %v9073_v54 = vpop.eup %5698  ;;  %5718 = vpow2.f32 %v4290_v51  ;;  %v4188_v17 = vmul.f32 1.442695, %v10137_v49  ;;  %v10138_v51 = vsub.f32 %v8692_v19, %v8859_v63  ;;  %v10139_v38 = vsub.f32 %v8698_v0, %v8859_v63 }
 0x9b4   : > { %v9081_v60 = vpop.eup %5700  ;;  %5720 = vpow2.f32 %v4294_v27  ;;  %v4311_v5 = vadd.f32 %v9020_v31, %v4310_v47  ;;  %v10140_v27 = vsub.f32 %v8704_v62, %v8859_v63  ;;  %v10141_v47 = vsub.f32 %v8710_v1, %v8859_v63 }
 0x9b5   : > { %v4192_v20 = vmul.f32 1.442695, %v10138_v51  ;;  %v9090_v6 = vpop.eup %5702  ;;  %5722 = vpow2.f32 %v4298_v52  ;;  %v4196_v46 = vmul.f32 1.442695, %v10139_v38  ;;  %v10142_v52 = vsub.f32 %v8716_v12, %v8859_v63 }
 0x9b6   : > { %v4200_v32 = vmul.f32 1.442695, %v10140_v27  ;;  %v4204_v14 = vmul.f32 1.442695, %v10141_v47  ;;  %v9101_v18 = vpop.eup %5704  ;;  %v4312_v19 = vadd.f32 %v9026_v61, %v4311_v5  ;;  %5724 = vpow2.f32 %v4176_v13 }
 0x9b7   : > { %v4208_v49 = vmul.f32 1.442695, %v10142_v52  ;;  %v10143_v0 = vsub.f32 %v8722_v56, %v8859_v63  ;;  %v9110_v38 = vpop.eup %5706  ;;  %5726 = vpow2.f32 %v4180_v11 }
 0x9b8   : > { %v9118_v5 = vpop.eup %5708  ;;  %v4313_v12 = vadd.f32 %v9032_v8, %v4312_v19  ;;  %5728 = vpow2.f32 %v4184_v25 }
 0x9b9   : > { %v4212_v51 = vmul.f32 1.442695, %v10143_v0  ;;  %v9125_v27 = vpop.eup %5710  ;;  %5730 = vpow2.f32 %v4188_v17  ;;  %v10144_v17 = vsub.f32 %v8728_v43, %v8859_v63  ;;  %v10145_v0 = vsub.f32 %v10105_v7, %v8859_v63 }
 0x9ba   : > { %v9133_v19 = vpop.eup %5712  ;;  %v4314_v25 = vadd.f32 %v9039_v53, %v4313_v12  ;;  %5732 = vpow2.f32 %v4192_v20 }
 0x9bb   : > { %v9140_v56 = vpop.eup %5714  ;;  %5734 = vpow2.f32 %v4196_v46  ;;  %v4216_v11 = vmul.f32 1.442695, %v10144_v17  ;;  %v4220_v52 = vmul.f32 1.442695, %v10145_v0 }
 0x9bc   : > { %v9148_v12 = vpop.eup %5716  ;;  %v4315_v20 = vadd.f32 %v9045_v39, %v4314_v25  ;;  %5736 = vpow2.f32 %v4200_v32  ;;  %v10146_v32 = vsub.f32 %v10106_v58, %v8859_v63  ;;  %v10151_v58 = vsub.f32 %v10111_v26, %v8859_v63 }
 0x9bd   : > { %v9156_v13 = vpop.eup %5718  ;;  %5738 = vpow2.f32 %v4204_v14  ;;  %v10147_v14 = vsub.f32 %v10107_v28, %v8859_v63  ;;  %v10150_v28 = vsub.f32 %v10110_v33, %v8859_v63  ;;  %v10154_v26 = vsub.f32 %v10114_v48, %v8859_v63 }
 0x9be   : > { %v9161_v47 = vpop.eup %5720  ;;  %v4316_v1 = vadd.f32 %v9051_v15, %v4315_v20  ;;  %5740 = vpow2.f32 %v4208_v49  ;;  %v4224_v43 = vmul.f32 1.442695, %v10146_v32  ;;  %v10148_v49 = vsub.f32 %v10108_v22, %v8859_v63 }
 0x9bf   : > { %v9169_v17 = vpop.eup %5722  ;;  %5742 = vpow2.f32 %v4212_v51  ;;  %v4228_v7 = vmul.f32 1.442695, %v10147_v14  ;;  %v10149_v51 = vsub.f32 %v10109_v16, %v8859_v63  ;;  %v4240_v14 = vmul.f32 1.442695, %v10150_v28 }
 0x9c0   : > { %v5725_v0 = vpop.eup %5724  ;;  %v4317_v46 = vadd.f32 %v9056_v4, %v4316_v1  ;;  %5744 = vpow2.f32 %v4216_v11  ;;  %v4232_v20 = vmul.f32 1.442695, %v10148_v49  ;;  %v10152_v16 = vsub.f32 %v10112_v42, %v8859_v63 }
 0x9c1   : > { %v5727_v32 = vpop.eup %5726  ;;  %5746 = vpow2.f32 %v4220_v52  ;;  %v4236_v25 = vmul.f32 1.442695, %v10149_v51  ;;  %v4244_v52 = vmul.f32 1.442695, %v10151_v58  ;;  %v4256_v58 = vmul.f32 1.442695, %v10154_v26 }
 0x9c2   : > { %v5729_v62 = vpop.eup %5728  ;;  %v4318_v1 = vadd.f32 %v9062_v2, %v4317_v46  ;;  %5748 = vpow2.f32 %v4224_v43  ;;  %v4339_v11 = vadd.f32 %v5727_v32, %v5725_v0  ;;  %v5089_v22 = vpack.c.bf16 %v5727_v32, %v5725_v0 }
 0x9c3   : > { %v5731_v49 = vpop.eup %5730  ;;  %5750 = vpow2.f32 %v4228_v7  ;;  %v4248_v51 = vmul.f32 1.442695, %v10152_v16  ;;  %v10153_v7 = vsub.f32 %v10113_v57, %v8859_v63  ;;  %v10155_v42 = vpack.c.bf16 %v8951_v59, %v8943_v45 }
 0x9c4   : > { %v5733_v4 = vpop.eup %5732  ;;  %v4319_v33 = vadd.f32 %v9067_v44, %v4318_v1  ;;  %5752 = vpow2.f32 %v4232_v20  ;;  %v4340_v28 = vadd.f32 %v5729_v62, %v4339_v11  ;;  %5090 = vmatprep.subr.bf16.mxu0 %v5089_v22  ;;  %v5093_v46 = vpack.c.bf16 %v5731_v49, %v5729_v62 }
 0x9c5   : > { %v5735_v43 = vpop.eup %5734  ;;  %5754 = vpow2.f32 %v4236_v25  ;;  %v4252_v0 = vmul.f32 1.442695, %v10153_v7  ;;  %5092 = vmatpush1.bf16.msra.mxu0 %v10155_v42  ;;  %v10156_v57 = vsub.f32 %v10115_v50, %v8859_v63  ;;  %v10157_v48 = vsub.f32 %v10116_v35, %v8859_v63  ;;  %v10162_v42 = vld [vmem:[#allocation20_spill] sm:$0xff] }
 0x9c6   : > { %v5737_v32 = vpop.eup %5736  ;;  %v4320_v20 = vadd.f32 %v9073_v54, %v4319_v33  ;;  %5756 = vpow2.f32 %v4240_v14  ;;  %v4341_v1 = vadd.f32 %v5731_v49, %v4340_v28  ;;  %5094 = vmatprep.subr.bf16.mxu0 %v5093_v46  ;;  %v5097_v62 = vpack.c.bf16 %v5735_v43, %v5733_v4 }
 0x9c7   : > { %v5739_v25 = vpop.eup %5738  ;;  %5758 = vpow2.f32 %v4244_v52  ;;  %v4260_v11 = vmul.f32 1.442695, %v10156_v57  ;;  %v4264_v22 = vmul.f32 1.442695, %v10157_v48  ;;  %v10158_v49 = vsub.f32 %v10117_v3, %v8859_v63 }
 0x9c8   : > { %v5741_v16 = vpop.eup %5740  ;;  %v4321_v45 = vadd.f32 %v9081_v60, %v4320_v20  ;;  %5760 = vpow2.f32 %v4248_v51  ;;  %v4342_v59 = vadd.f32 %v5733_v4, %v4341_v1  ;;  %v5101_v33 = vpack.c.bf16 %v5739_v25, %v5737_v32 }
 0x9c9   : > { %v5743_v14 = vpop.eup %5742  ;;  %5762 = vpow2.f32 %v4252_v0  ;;  %v4268_v52 = vmul.f32 1.442695, %v10158_v49  ;;  %v10159_v50 = vsub.f32 %v10118_v29, %v8859_v63  ;;  %v10160_v35 = vpack.c.bf16 %v8967_v34, %v8959_v40 }
 0x9ca   : > { %v5745_v46 = vpop.eup %5744  ;;  %v4322_v7 = vadd.f32 %v9090_v6, %v4321_v45  ;;  %5764 = vpow2.f32 %v4256_v58  ;;  %v4343_v4 = vadd.f32 %v5735_v43, %v4342_v59  ;;  %v5105_v51 = vpack.c.bf16 %v5743_v14, %v5741_v16 }
 0x9cb   : > { %v4272_v28 = vmul.f32 1.442695, %v10159_v50  ;;  %5096 = vmatpush1.bf16.msra.mxu0 %v10160_v35  ;;  %v5747_v0 = vpop.eup %5746  ;;  %5766 = vpow2.f32 %v4260_v11  ;;  %v10161_v3 = vsub.f32 %v10119_v21, %v8859_v63  ;;  %v10163_v29 = vsub.f32 %v10162_v42, %v8859_v63  ;;  %v10165_v11 = vld [vmem:[#allocation41_spill] sm:$0xff] }
 0x9cc   : > { %5098 = vmatprep.subr.bf16.mxu0 %v5097_v62  ;;  %v5749_v1 = vpop.eup %5748  ;;  %v4323_v40 = vadd.f32 %v9101_v18, %v4322_v7  ;;  %5768 = vpow2.f32 %v4264_v22  ;;  %v4344_v34 = vadd.f32 %v5737_v32, %v4343_v4  ;;  %v5109_v57 = vpack.c.bf16 %v5747_v0, %v5745_v46 }
 0x9cd   : > { %v4276_v26 = vmul.f32 1.442695, %v10161_v3  ;;  %v4280_v20 = vmul.f32 1.442695, %v10163_v29  ;;  %v5751_v58 = vpop.eup %5750  ;;  %5770 = vpow2.f32 %v4268_v52  ;;  %v10164_v43 = vsub.f32 %v10121_v24, %v8859_v63 }
 0x9ce   : > { %v10166_v21 = vsub.f32 %v10165_v11, %v8859_v63  ;;  %v10167_v45 = vpack.c.bf16 %v8982_v9, %v8975_v30  ;;  %v5753_v59 = vpop.eup %5752  ;;  %v4324_v49 = vadd.f32 %v9110_v38, %v4323_v40  ;;  %5772 = vpow2.f32 %v4272_v28 }
 0x9cf   : > { %v4284_v62 = vmul.f32 1.442695, %v10164_v43  ;;  %v4345_v32 = vadd.f32 %v5739_v25, %v4344_v34  ;;  %v5113_v22 = vpack.c.bf16 %v5751_v58, %v5749_v1  ;;  %v5755_v52 = vpop.eup %5754  ;;  %5774 = vpow2.f32 %v4276_v26  ;;  %v10170_v25 = vld [vmem:[#allocation42_spill] sm:$0xff] }
 0x9d0   : > { %v4288_v48 = vmul.f32 1.442695, %v10166_v21  ;;  %5100 = vmatpush1.bf16.msra.mxu0 %v10167_v45  ;;  %v10168_v24 = vsub.f32 %v10123_v41, %v8859_v63  ;;  %v10169_v35 = vsub.f32 %v10124_v55, %v8859_v63  ;;  %v5757_v4 = vpop.eup %5756  ;;  %v4325_v9 = vadd.f32 %v9118_v5, %v4324_v49 }
 0x9d1   : > { %5102 = vmatprep.subr.bf16.mxu0 %v5101_v33  ;;  %5776 = vpow2.f32 %v4280_v20  ;;  %v4346_v30 = vadd.f32 %v5741_v16, %v4345_v32  ;;  %v5117_v3 = vpack.c.bf16 %v5755_v52, %v5753_v59  ;;  %v5759_v28 = vpop.eup %5758  ;;  %v10171_v33 = vsub.f32 %v10170_v25, %v8859_v63 }
 0x9d2   : > { %v4292_v50 = vmul.f32 1.442695, %v10168_v24  ;;  %v4296_v7 = vmul.f32 1.442695, %v10169_v35  ;;  %5778 = vpow2.f32 %v4284_v62  ;;  %v10172_v41 = vpack.c.bf16 %v8997_v23, %v8990_v36  ;;  %v5761_v42 = vpop.eup %5760 }
 0x9d3   : > { %v4300_v26 = vmul.f32 1.442695, %v10171_v33  ;;  %v4326_v55 = vadd.f32 %v9125_v27, %v4325_v9  ;;  %5780 = vpow2.f32 %v4288_v48  ;;  %v4347_v29 = vadd.f32 %v5743_v14, %v4346_v30  ;;  %v5763_v20 = vpop.eup %5762 }
 0x9d4   : > { %5104 = vmatpush1.bf16.msra.mxu0 %v10172_v41  ;;  %v5121_v40 = vpack.c.bf16 %v5759_v28, %v5757_v4  ;;  %5782 = vpow2.f32 %v4292_v50  ;;  %v5765_v16 = vpop.eup %5764  ;;  %v5125_v63 = vpack.c.bf16 %v5763_v20, %v5761_v42  ;;  %v10173_v23 = vpack.c.bf16 %v9012_v10, %v9005_v37 }
 0x9d5   : > { %5106 = vmatprep.subr.bf16.mxu0 %v5105_v51  ;;  %v4327_v34 = vadd.f32 %v9133_v19, %v4326_v55  ;;  %5784 = vpow2.f32 %v4296_v7  ;;  %v4348_v43 = vadd.f32 %v5745_v46, %v4347_v29  ;;  %v5767_v62 = vpop.eup %5766  ;;  %v10174_v24 = vpack.c.bf16 %v9026_v61, %v9020_v31 }
 0x9d6   : > { %5786 = vpow2.f32 %v4300_v26  ;;  %v5769_v36 = vpop.eup %5768  ;;  %v5129_v51 = vpack.c.bf16 %v5767_v62, %v5765_v16  ;;  %v10176_v55 = vpack.c.bf16 %v9051_v15, %v9045_v39  ;;  %v10180_v39 = vpack.c.bf16 %v9090_v6, %v9081_v60 }
 0x9d7   : > { %v4328_v11 = vadd.f32 %v9140_v56, %v4327_v34  ;;  %v4349_v14 = vadd.f32 %v5747_v0, %v4348_v43  ;;  %v5771_v21 = vpop.eup %5770  ;;  %v10183_v60 = vpack.c.bf16 %v9140_v56, %v9133_v19  ;;  %v10190_v56 = vld [vmem:[#allocation13_spill] sm:$0xff]  ;;  %v10191_v19 = vld [vmem:[#allocation56_spill] sm:$0xff] }
 0x9d8   : > { %5108 = vmatpush1.bf16.msra.mxu0 %v10173_v23  ;;  %v5773_v48 = vpop.eup %5772  ;;  %v5133_v32 = vpack.c.bf16 %v5771_v21, %v5769_v36  ;;  %v10189_v23 = vld [vmem:[#allocation54_spill] sm:$0xff] }
 0x9d9   : > { %5110 = vmatprep.subr.bf16.mxu0 %v5109_v57  ;;  %v4329_v45 = vadd.f32 %v9148_v12, %v4328_v11  ;;  %v4350_v49 = vadd.f32 %v5749_v1, %v4349_v14  ;;  %v5775_v46 = vpop.eup %5774  ;;  %v10175_v1 = vpack.c.bf16 %v9039_v53, %v9032_v8  ;;  %v10177_v8 = vld [vmem:[#allocation31_spill] sm:$0xff] }
 0x9da   : > { %v5137_v35 = vpack.c.bf16 %v5775_v46, %v5773_v48  ;;  %v10178_v53 = vpack.c.bf16 %v9062_v2, %v10177_v8  ;;  %v10181_v2 = vpack.c.bf16 %v9110_v38, %v9101_v18  ;;  %v10184_v18 = vpack.c.bf16 %v9156_v13, %v9148_v12  ;;  %v10195_v12 = vld [vmem:[#allocation37_spill] sm:$0xff]  ;;  %v10227_v8 = vld [vmem:[#allocation40_spill] sm:$0xff] }
 0x9db   : > { %v5777_v50 = vpop.eup %5776  ;;  %v4330_v10 = vadd.f32 %v9156_v13, %v4329_v45  ;;  %v4351_v37 = vadd.f32 %v5751_v58, %v4350_v49  ;;  %v10194_v13 = vld [vmem:[#allocation39_spill] sm:$0xff]  ;;  %v10202_v45 = vld [vmem:[#allocation62_spill] sm:$0xff]  ;;  %v10203_v49 = vld [vmem:[#allocation60_spill] sm:$0xff] }
 0x9dc   : > { %5112 = vmatpush1.bf16.msra.mxu0 %v10174_v24  ;;  %v5779_v0 = vpop.eup %5778  ;;  %v10196_v14 = vpack.c.bf16 %v10194_v13, %v10195_v12  ;;  %v10206_v24 = vld [vmem:[#allocation57_spill] sm:$0xff] }
 0x9dd   : > { %5114 = vmatprep.subr.bf16.mxu0 %v5113_v22  ;;  %v5781_v57 = vpop.eup %5780  ;;  %v4331_v7 = vadd.f32 %v9161_v47, %v4330_v10  ;;  %v4352_v9 = vadd.f32 %v5753_v59, %v4351_v37  ;;  %v5141_v30 = vpack.c.bf16 %v5779_v0, %v5777_v50  ;;  %v10208_v10 = vld [vmem:[#allocation59_spill] sm:$0xff] }
 0x9de   : > { %v5783_v25 = vpop.eup %5782 }
 0x9df   : > { %v5785_v33 = vpop.eup %5784  ;;  %v9267_v61 = vadd.f32 %v9169_v17, %v4331_v7  ;;  %v4353_v31 = vadd.f32 %v5755_v52, %v4352_v9  ;;  %v5145_v58 = vpack.c.bf16 %v5783_v25, %v5781_v57  ;;  %v10179_v52 = vpack.c.bf16 %v9073_v54, %v9067_v44  ;;  %v10213_v7 = vld [vmem:[#allocation12_spill] sm:$0xff]  ;;  %v10214_v9 = vld [vmem:[#allocation65_spill] sm:$0xff] }
 0x9e0   : > { %5116 = vmatpush1.bf16.msra.mxu0 %v10175_v1  ;;  %v5787_v22 = vpop.eup %5786  ;;  %v10182_v44 = vpack.c.bf16 %v9125_v27, %v9118_v5  ;;  %v10185_v5 = vpack.c.bf16 %v9169_v17, %v9161_v47  ;;  %v10186_v27 = vld [vmem:[#allocation18_spill] sm:$0xff]  ;;  %v10217_v1 = vmov 0.0  }
 0x9e1   : > { %5118 = vmatprep.subr.bf16.mxu0 %v5117_v3  ;;  %v4354_v26 = vadd.f32 %v5757_v4, %v4353_v31  ;;  %v5149_v41 = vpack.c.bf16 %v5787_v22, %v5785_v33  ;;  %v10198_v47 = vld [vmem:[#allocation14_spill] sm:$0xff] }
 0x9e2   : > { %v10199_v17 = vld [vmem:[#allocation58_spill] sm:$0xff] }
 0x9e3   : > { %v4355_v59 = vadd.f32 %v5759_v28, %v4354_v26  ;;  %v10219_v31 = vld [vmem:[#allocation26_spill] sm:$0xff]  ;;  %v10222_v26 = vld [vmem:[#allocation45_spill] sm:$0xff] }
 0x9e4   : > { %5120 = vmatpush1.bf16.msra.mxu0 %v10176_v55  ;;  %v10224_v55 = vld [vmem:[#allocation67_spill] sm:$0xff] }
 0x9e5   : > { %5122 = vmatprep.subr.bf16.mxu0 %v5121_v40  ;;  %v4356_v29 = vadd.f32 %v5761_v42, %v4355_v59  ;;  %v10225_v59 = vld [vmem:[#allocation46_spill] sm:$0xff] }
 0x9e7   : > { %v4357_v34 = vadd.f32 %v5763_v20, %v4356_v29  ;;  %v10226_v29 = vpack.c.bf16 %v10224_v55, %v10225_v59 }
 0x9e8   : > { %5124 = vmatpush1.bf16.msra.mxu0 %v10178_v53  ;;  %v10228_v53 = vld [vmem:[#allocation47_spill] sm:$0xff] }
 0x9e9   : > { %5126 = vmatprep.subr.bf16.mxu0 %v5125_v63  ;;  %v4358_v43 = vadd.f32 %v5765_v16, %v4357_v34  ;;  %v10187_v63 = vld [vmem:[#allocation17_spill] sm:$0xff]  ;;  %v10229_v34 = vpack.c.bf16 %v10227_v8, %v10228_v53 }
 0x9eb   : > { %v4359_v4 = vadd.f32 %v5767_v62, %v4358_v43  ;;  %v10188_v62 = vpack.c.bf16 %v10186_v27, %v10187_v63  ;;  %v4476_v43 = vld [vmem:[%s9406_s3] sm:$0xf] }
 0x9ec   : > { %5128 = vmatpush1.bf16.msra.mxu0 %v10179_v52  ;;  %v5941_v52 = vmov 0  }
 0x9ed   : > { %5130 = vmatprep.subr.bf16.mxu0 %v5129_v51  ;;  %v4360_v3 = vadd.f32 %v5769_v36, %v4359_v4  ;;  %v10192_v36 = vld [vmem:[#allocation19_spill] sm:$0xff]  ;;  %5260 = vset.pattern.permute.xlu1 %v5941_v52  ;;  %v4333_v4 = vrot.slane %v9267_v61, 4 }
 0x9ee   : > { %v10193_v11 = vpack.c.bf16 %v10191_v19, %v10192_v36  ;;  %v10197_v51 = vld [vmem:[#allocation15_spill] sm:$0xff]  ;;  %5261 = vset.pattern.permute.xlu0 %v5941_v52  ;;  %4479 = vperm.xlu1 %5260, %v4476_v43  }
 0x9ef   : > { %v4361_v15 = vadd.f32 %v5771_v21, %v4360_v3  ;;  %v10200_v21 = vld [vmem:[#allocation16_spill] sm:$0xff] }
 0x9f0   : > { %5132 = vmatpush1.bf16.msra.mxu0 %v10180_v39  ;;  %v4334_v39 = vadd.f32 %v4333_v4, %v9267_v61 }
 0x9f1   : > { %5134 = vmatprep.subr.bf16.mxu0 %v5133_v32  ;;  %v4362_v28 = vadd.f32 %v5773_v48, %v4361_v15  ;;  %v10201_v48 = vpack.c.bf16 %v10199_v17, %v10200_v21  ;;  %v10204_v32 = vpack.c.bf16 %v10202_v45, %v10203_v49  ;;  %v4475_v45 = vld [vmem:[%s9405_s2] sm:$0xf] }
 0x9f3   : > { %v4363_v42 = vadd.f32 %v5775_v46, %v4362_v28  ;;  %v10205_v46 = vld [vmem:[#allocation55_spill] sm:$0xff]  ;;  %v4335_v28 = vrot.slane %v4334_v39, 2 }
 0x9f4   : > { %5136 = vmatpush1.bf16.msra.mxu0 %v10181_v2 }
 0x9f5   : > { %5138 = vmatprep.subr.bf16.mxu0 %v5137_v35  ;;  %v4364_v40 = vadd.f32 %v5777_v50, %v4363_v42  ;;  %v10207_v50 = vld [vmem:[#allocation61_spill] sm:$0xff]  ;;  %v10210_v35 = vld [vmem:[#allocation66_spill] sm:$0xff]  ;;  %v4336_v42 = vadd.f32 %v4335_v28, %v4334_v39 }
 0x9f6   : > { %v10209_v37 = vpack.c.bf16 %v10207_v50, %v10208_v10 }
 0x9f7   : > { %v4365_v54 = vadd.f32 %v5779_v0, %v4364_v40  ;;  %v10211_v0 = vld [vmem:[#allocation64_spill] sm:$0xff] }
 0x9f8   : > { %5140 = vmatpush1.bf16.msra.mxu0 %v10182_v44  ;;  %v4337_v44 = vrot.slane %v4336_v42, 1 }
 0x9f9   : > { %5142 = vmatprep.subr.bf16.mxu0 %v5141_v30  ;;  %v4366_v20 = vadd.f32 %v5781_v57, %v4365_v54  ;;  %v10212_v57 = vpack.c.bf16 %v10210_v35, %v10211_v0  ;;  %v10215_v30 = vld [vmem:[#allocation63_spill] sm:$0xff] }
 0x9fb   : > { %v4367_v6 = vadd.f32 %v5783_v25, %v4366_v20  ;;  %v10216_v25 = vpack.c.bf16 %v10214_v9, %v10215_v30  ;;  %v4338_v20 = vadd.f32 %v4337_v44, %v4336_v42 }
 0x9fc   : > { %5144 = vmatpush1.bf16.msra.mxu0 %v10183_v60 }
 0x9fd   : > { %5146 = vmatprep.subr.bf16.mxu0 %v5145_v58  ;;  %v4368_v16 = vadd.f32 %v5785_v33, %v4367_v6  ;;  %v10218_v33 = vld [vmem:[#allocation44_spill] sm:$0xff]  ;;  %5788 = vrcp.f32 %v4338_v20 }
 0x9fe   : > { %v10220_v58 = vpack.c.bf16 %v10218_v33, %v10219_v31 }
 0x9ff   : > { %v4369_v38 = vadd.f32 %v5787_v22, %v4368_v16  ;;  %v10221_v22 = vld [vmem:[#allocation24_spill] sm:$0xff] }
 0xa00   : > { %5148 = vmatpush1.bf16.msra.mxu0 %v10184_v18 }
 0xa01   : > { %5150 = vmatprep.subr.bf16.mxu0 %v5149_v41  ;;  %v10223_v41 = vpack.c.bf16 %v10221_v22, %v10222_v26  ;;  %v4370_v3 = vrot.slane %v4369_v38, 4 }
 0xa03   : > { %v4371_v15 = vadd.f32 %v4370_v3, %v4369_v38 }
 0xa04   : > { %5152 = vmatpush1.bf16.msra.mxu0 %v10185_v5 }
 0xa05   : > { %5154 = vmatprep.subr.bf16.mxu0 %v10188_v62  ;;  %v4372_v2 = vrot.slane %v4371_v15, 2 }
 0xa07   : > { %4441 = vmatmul.mubr.f32.vlgmr.msra.gmra.mrb[168].mxu0 %v10189_v23  ;;  %v4373_v40 = vadd.f32 %v4372_v2, %v4371_v15  ;;  %v5789_v6 = vpop.eup %5788 }
 0xa08   : > { %4446 = vmatprep.mubr.f32.mxu0 %v10190_v56  ;;  %5156 = vmatpush1.bf16.msra.mxu0 %v10193_v11 }
 0xa09   : > { %5158 = vmatprep.subr.bf16.mxu0 %v10196_v14  ;;  %v4374_v54 = vrot.slane %v4373_v40, 1 }
 0xa0b   : > { %4447 = vmatmul.mubr.f32.gmra.mrb[170].mxu0 %v10197_v51  ;;  %v4375_v60 = vadd.f32 %v4374_v54, %v4373_v40 }
 0xa0c   : > { %4452 = vmatprep.mubr.f32.mxu0 %v10198_v47  ;;  %5160 = vmatpush1.bf16.msra.mxu0 %v10201_v48 }
 0xa0d   : > { %5162 = vmatprep.subr.bf16.mxu0 %v10204_v32  ;;  %5790 = vrcp.f32 %v4375_v60 }
 0xa0f   : > { %4453 = vmatmul.mubr.f32.gmra.mrb[172].mxu0 %v10205_v46 }
 0xa10   : > { %4458 = vmatprep.mubr.f32.mxu0 %v10206_v24  ;;  %5164 = vmatpush1.bf16.msra.mxu0 %v10209_v37 }
 0xa11   : > { %5166 = vmatprep.subr.bf16.mxu0 %v10212_v57 }
 0xa13   : > { %4459 = vmatmul.mubr.f32.gmra.mrb[174].mxu0 %v10213_v7 }
 0xa14   : > { %5168 = vmatpush1.bf16.msra.mxu0 %v10216_v25  ;;  %4546 = vmatprep.mubr.f32.mxu0 %v10217_v1 }
 0xa15   : > { %5170 = vmatprep.subr.bf16.mxu0 %v10220_v58 }
 0xa17   : > { %v5791_v18 = vpop.eup %5790 }
 0xa18   : > { %5172 = vmatpush1.bf16.msra.mxu0 %v10223_v41 }
 0xa19   : > { %5174 = vmatprep.subr.bf16.mxu0 %v10226_v29 }
 0xa1c   : > { %5176 = vmatpush1.bf16.msra.mxu0 %v10229_v34 }
 0xa6d   : > { %v4480_v49 = vpop.permute.xlu1 %4479 }
 0xada   : > { %v4442_v16 = vpop.f32.mrb[168].mxu0 }
 0xadb   : > { %v4467_v5 = vmul.f32 %v5789_v6, %v4442_v16  ;;  %v4444_v27 = vpop.f32.mrb[169].mxu0 }
 0xadc   : > { %v4468_v63 = vmul.f32 %v5791_v18, %v4444_v27 }
 0xade   : > { %v4448_v62 = vpop.f32.mrb[170].mxu0 }
 0xadf   : > { %v4469_v23 = vmul.f32 %v5789_v6, %v4448_v62  ;;  %v4450_v61 = vpop.f32.mrb[171].mxu0 }
 0xae0   : > { %v4470_v38 = vmul.f32 %v5791_v18, %v4450_v61 }
 0xae1   : > { %v5179_v56 = vpack.c.bf16 %v4469_v23, %v4467_v5 }
 0xae2   : > { %v5177_v19 = vpack.c.bf16 %v4470_v38, %v4468_v63  ;;  %v4454_v36 = vpop.f32.mrb[172].mxu0 }
 0xae3   : > { %v4471_v11 = vmul.f32 %v5789_v6, %v4454_v36  ;;  %v4456_v13 = vpop.f32.mrb[173].mxu0 }
 0xae4   : > { %v4472_v12 = vmul.f32 %v5791_v18, %v4456_v13  ;;  %5178 = vmatprep.subr.bf16.mxu0 %v5177_v19 }
 0xae5   : > { %5180 = vmatpush1.bf16.msra.mxu0 %v5179_v56 }
 0xae6   : > { %v4460_v14 = vpop.f32.mrb[174].mxu0 }
 0xae7   : > { %v4473_v51 = vmul.f32 %v5789_v6, %v4460_v14  ;;  %v4462_v47 = vpop.f32.mrb[175].mxu0 }
 0xae8   : > { %v4474_v17 = vmul.f32 %v5791_v18, %v4462_v47 }
 0xae9   : > { %v5183_v21 = vpack.c.bf16 %v4473_v51, %v4471_v11 }
 0xaea   : > { %v5181_v48 = vpack.c.bf16 %v4474_v17, %v4472_v12 }
 0xaec   : > { %5182 = vmatprep.subr.bf16.mxu0 %v5181_v48 }
 0xaed   : > { %5184 = vmatpush1.bf16.msra.mxu0 %v5183_v21 }
 0xaf0   : > { %4547 = vmatmul.mubr.f32.vlgmr.msra.gmra.mrb[176].mxu0 %v4475_v45 }
 0xbc3   : > { %v4548_v32 = vpop.f32.mrb[176].mxu0 }
 0xbc4   : > { %v4549_v46 = vadd.f32 %v4548_v32, %v4480_v49  ;;  %v4550_v24 = vpop.f32.mrb[177].mxu0 }
 0xbc5   : > { %v4551_v50 = vadd.f32 %v4550_v24, %v4480_v49 }
 0xbc7   : > { %v4555_v10 = vcombine.low %v4549_v46, %v4551_v50 }
 0xbc9   : > { %4557 = vst [vmem:[%s240_s21] sm:$0xff] %v4555_v10 }
 0xbca   : > { %5863 = shalt.err (!%p5860_p5)
}
 0xbcb   : > { %s5864_s22 = scalar_lea.hbm %s9354_s12, 128  ;;  %s5868_s25 = scalar_lea.hbm %s9407_s4, 256 }
 0xbcc   : > { %p5865_p10 = scmp.ne.s32.totalorder %s9354_s12, %s5864_s22  ;;  %p5869_p7 = scmp.lt.u32.totalorder %s9354_s12, %s9407_s4 }
 0xbcd   : > { %p5870_p3 = scmp.lt.u32.totalorder %s5868_s25, %s5864_s22  ;;  %p5872_p2 = scmp.lt.u32.totalorder %s5864_s22, %s9354_s12 }
 0xbce   : > { %p5866_p4 = pnand %p5865_p10, %p6069_p13 }
 0xbcf   : > { %p5871_p11 = por %p5870_p3, %p5869_p7 }
 0xbd0   : > { %p5867_p1 = pneg %p5866_p4 }
 0xbd1   : > { %p5873_p6 = por %p5872_p2, %p5871_p11 }
 0xbd3   : > { %p5874_p8 = pnand %p5873_p6, %p5867_p1 }
 0xbd5   : > { %5877 = shalt.err (!%p5874_p8)
}
 0xbd6   : > { %5191 = dma.vmem_to_hbm [thread:$0]  (%p6069_p13), %s9356_s6, 128, %s9354_s12, %s4559_s24  }
 0xbd7 PF: > { %s4587_s14 = sand.u32 1, %s5916_s15   ;;  %p10230_p9 = scmp.ne.s32.totalorder %s9632_s26, 0 }
 0xbd8   : > { %p10231_p12 = scmp.ge.s32.totalorder %s5936_s20, 2  ;;  %s4588_s21 = scalar_lea.sflag [#allocation5], %s4587_s14 }
 0xbda   : > { %p5202_p0 = pnand %p10231_p12, %p10230_p9 }
 0xbdc   : > { %5911 = dma.done.wait (!%p5202_p0), %s4588_s21, 128  }
 0xbdd   : > { %5913 = vsyncadd (!%p5202_p0), %s4588_s21, 4294967168  ;;  %s21_s20 = sadd.s32 1, %s5936_s20   ;;  %s10232_s15 = smov %s5920_s16 }
 0xbde   : > { %p18_p5 = scmp.ge.s32.totalorder %s21_s20, 4   ;;  %s10233_s16 = smov %s5924_s17 }
 0xbdf   : > { %s10234_s17 = smov %s6077_s10  ;;  %s10235_s18 = smov %s5932_s19 }
 0xbe0   : > { %s10236_s19 = smov %s10238_s5  ;;  %20 = sbr.rel (!%p18_p5) target bundleno = 7 (0x7), region = 90 }
 0xbe7   :  { %4593 = vsyncpa [#allocation4], 1 }
 0xbe8   :  { %4595 = vsyncpa [#allocation4 + $0x1], 1 }
 0xbe9   :  { %4596 = vsyncpa [#allocation7], 1 }
 0xbea   :  { %4597 = vsyncpa [#allocation5], 1 }
 0xbeb   :  { %4599 = vsyncpa [#allocation5 + $0x1], 1 }

</bundles_post_ra>
